<compile_context>
chip_gen: v5e
topology: v5e:2x2
jax: 0.10.0
libtpu: 0.0.40
codegen_flags: <defaults>
</compile_context>

<pallas_src>
import functools

import jax
import jax.numpy as jnp
from jax.experimental import pallas as pl
from jax.experimental.pallas import tpu as pltpu


def _fused_double_conv_kernel(x_ref, w1_ref, b1_ref, w2_ref, b2_ref, o_ref,
                              xp1_ref, col1_ref, xp2_ref, col2_ref):
    # x_ref   : (1, H, W, Cin)     un-padded input tile (one batch element)
    # w1_ref  : (9*Cin,  Cmid)     BN-folded layer-1 weights, (ky,kx,cin)-major
    # b1_ref  : (1, Cmid)          BN-folded layer-1 bias
    # w2_ref  : (9*Cmid, Cout)     BN-folded layer-2 weights
    # b2_ref  : (1, Cout)          BN-folded layer-2 bias
    # o_ref   : (1, H, W, Cout)
    # xp*_ref : (H+2, W+2, C)  VMEM  zero-padded activations (per layer)
    # col*_ref: (H*W, 9*C)     VMEM  im2col patch matrices (per layer)
    H = o_ref.shape[1]
    W = o_ref.shape[2]

    def conv3x3_bias_relu(xp_ref, col_ref, w_ref, b_ref):
        """relu(conv3x3(padded activations) + bias) -> (H*W, C_out) in f32."""
        C = xp_ref.shape[2]
        # im2col: 9 shifted windows written side-by-side into VMEM, then one big
        # MXU matmul with K = 9*C (instead of 9 tiny K=C matmuls + 8 VPU adds
        # over the accumulator).
        for ky in range(3):
            for kx in range(3):
                t = ky * 3 + kx
                tap = xp_ref[ky:ky + H, kx:kx + W, :].reshape(H * W, C)
                col_ref[:, t * C:(t + 1) * C] = tap.astype(col_ref.dtype)
        acc = jnp.dot(col_ref[...], w_ref[...],
                      preferred_element_type=jnp.float32)
        acc = acc + b_ref[...]            # (1, C_out) broadcasts over the rows
        return jnp.maximum(acc, 0.0)      # ReLU (epilogue kept in f32)

    # ---- layer 1: zero-pad the input inside VMEM (no padded HBM copy) ----
    xp1_ref[...] = jnp.zeros_like(xp1_ref)
    xp1_ref[1:H + 1, 1:W + 1, :] = x_ref[0].astype(xp1_ref.dtype)
    y1 = conv3x3_bias_relu(xp1_ref, col1_ref, w1_ref, b1_ref)     # (H*W, Cmid)

    # ---- layer 2: the intermediate activation never leaves VMEM ----
    Cmid = xp2_ref.shape[2]
    xp2_ref[...] = jnp.zeros_like(xp2_ref)
    xp2_ref[1:H + 1, 1:W + 1, :] = y1.reshape(H, W, Cmid).astype(xp2_ref.dtype)
    y2 = conv3x3_bias_relu(xp2_ref, col2_ref, w2_ref, b2_ref)     # (H*W, Cout)

    Cout = o_ref.shape[3]
    o_ref[0] = y2.reshape(H, W, Cout).astype(o_ref.dtype)


def _conv_block_nhwc(x_nhwc, w1_eff, b1_eff, w2_eff, b2_eff, compute_dtype):
    """Fused (Conv3x3+BN+ReLU) x2. x_nhwc: (N,H,W,Cin) f32 -> (N,H,W,Cout) f32."""
    N, H, W, Cin = x_nhwc.shape
    Cmid = w1_eff.shape[-1]
    Cout = w2_eff.shape[-1]

    # Flatten (3,3,Cin,Cout) -> (9*Cin, Cout), matching the kernel's im2col order.
    w1_flat = w1_eff.reshape(9 * Cin, Cmid).astype(compute_dtype)
    w2_flat = w2_eff.reshape(9 * Cmid, Cout).astype(compute_dtype)
    b1 = b1_eff.reshape(1, Cmid).astype(jnp.float32)
    b2 = b2_eff.reshape(1, Cout).astype(jnp.float32)
    x_in = x_nhwc.astype(compute_dtype)

    # TODO(synk): for large H (or wide channels) add a spatial "parallel" grid axis
    # with manual halo DMA so per-step VMEM stays within v7x's 64 MiB; unnecessary
    # at these demo shapes (whole-image scratch is < 1 MiB).
    return pl.pallas_call(
        _fused_double_conv_kernel,
        out_shape=jax.ShapeDtypeStruct((N, H, W, Cout), jnp.float32),
        grid=(N,),
        in_specs=[
            pl.BlockSpec((1, H, W, Cin), lambda n: (n, 0, 0, 0)),
            pl.BlockSpec((9 * Cin, Cmid), lambda n: (0, 0)),
            pl.BlockSpec((1, Cmid), lambda n: (0, 0)),
            pl.BlockSpec((9 * Cmid, Cout), lambda n: (0, 0)),
            pl.BlockSpec((1, Cout), lambda n: (0, 0)),
        ],
        out_specs=pl.BlockSpec((1, H, W, Cout), lambda n: (n, 0, 0, 0)),
        scratch_shapes=[
            pltpu.VMEM((H + 2, W + 2, Cin), compute_dtype),    # padded input
            pltpu.VMEM((H * W, 9 * Cin), compute_dtype),       # im2col layer 1
            pltpu.VMEM((H + 2, W + 2, Cmid), compute_dtype),   # padded intermediate
            pltpu.VMEM((H * W, 9 * Cmid), compute_dtype),      # im2col layer 2
        ],
        compiler_params=pltpu.CompilerParams(
            dimension_semantics=("parallel",),
            vmem_limit_bytes=32 * 1024 * 1024,
        ),
    )(x_in, w1_flat, b1, w2_flat, b2)


def _fold_bn(w_oihw, conv_b, gamma, beta, run_mean, run_var, eps=1e-5):
    """Fold eval-mode BatchNorm into conv weight/bias.

    w_oihw: (Cout, Cin, 3, 3) PyTorch layout -> returns (3,3,Cin,Cout) + (Cout,)
    """
    scale = gamma / jnp.sqrt(run_var + eps)              # (Cout,)
    w_hwio = jnp.transpose(w_oihw, (2, 3, 1, 0))         # (3,3,Cin,Cout)
    w_eff = w_hwio * scale[None, None, None, :]
    b_eff = (conv_b - run_mean) * scale + beta
    return w_eff.astype(jnp.float32), b_eff.astype(jnp.float32)


def init_conv_params(key, in_ch, out_ch):
    """Deterministic params mirroring the PyTorch module's shapes."""
    ks = jax.random.split(key, 8)

    def conv_init(kw, kb, cin, cout):
        fan_in = cin * 9
        bound = 1.0 / (fan_in ** 0.5)
        w = jax.random.uniform(kw, (cout, cin, 3, 3), jnp.float32,
                               -bound, bound)
        b = jax.random.uniform(kb, (cout,), jnp.float32, -bound, bound)
        return w, b

    w1, b1 = conv_init(ks[0], ks[1], in_ch, out_ch)
    w2, b2 = conv_init(ks[2], ks[3], out_ch, out_ch)

    # BatchNorm params / running stats (eval-mode), deterministic but non-trivial.
    gamma1 = 1.0 + 0.1 * jax.random.normal(ks[4], (out_ch,), jnp.float32)
    beta1 = 0.1 * jax.random.normal(ks[5], (out_ch,), jnp.float32)
    mean1 = 0.05 * jax.random.normal(ks[6], (out_ch,), jnp.float32)
    var1 = 1.0 + 0.1 * jax.random.uniform(ks[7], (out_ch,), jnp.float32)

    k2 = jax.random.split(ks[7], 4)
    gamma2 = 1.0 + 0.1 * jax.random.normal(k2[0], (out_ch,), jnp.float32)
    beta2 = 0.1 * jax.random.normal(k2[1], (out_ch,), jnp.float32)
    mean2 = 0.05 * jax.random.normal(k2[2], (out_ch,), jnp.float32)
    var2 = 1.0 + 0.1 * jax.random.uniform(k2[3], (out_ch,), jnp.float32)

    return {
        "w1": w1, "b1": b1, "bn1": (gamma1, beta1, mean1, var1),
        "w2": w2, "b2": b2, "bn2": (gamma2, beta2, mean2, var2),
    }


@functools.partial(jax.jit, static_argnames=("compute_dtype",))
def conv_block_forward(x_nchw, params, compute_dtype=jnp.float32):
    """Equivalent of Conv.forward: NCHW in, NCHW out.

    compute_dtype=jnp.bfloat16 enables the bf16 MXU/DMA path (recommended on
    v6e/v7x); default f32 matches the PyTorch reference numerics.
    """
    x_nhwc = jnp.transpose(x_nchw, (0, 2, 3, 1)).astype(jnp.float32)

    w1_eff, b1_eff = _fold_bn(params["w1"], params["b1"], *params["bn1"])
    w2_eff, b2_eff = _fold_bn(params["w2"], params["b2"], *params["bn2"])

    y = _conv_block_nhwc(x_nhwc, w1_eff, b1_eff, w2_eff, b2_eff, compute_dtype)
    return jnp.transpose(y, (0, 3, 1, 2))   # back to NCHW


def _reference_forward(x_nchw, params):
    """Pure-JAX (XLA conv) reference with the same eval-mode BN folding."""
    x = jnp.transpose(x_nchw, (0, 2, 3, 1)).astype(jnp.float32)
    for w, b, bn in ((params["w1"], params["b1"], params["bn1"]),
                     (params["w2"], params["b2"], params["bn2"])):
        w_eff, b_eff = _fold_bn(w, b, *bn)
        x = jax.lax.conv_general_dilated(
            x, w_eff, window_strides=(1, 1), padding="SAME",
            dimension_numbers=("NHWC", "HWIO", "NHWC"))
        x = jnp.maximum(x + b_eff, 0.0)
    return jnp.transpose(x, (0, 3, 1, 2))


if __name__ == "__main__":
    key = jax.random.PRNGKey(0)
    k_x, k_p = jax.random.split(key)

    N, IN_CH, OUT_CH, H, W = 2, 4, 8, 16, 16
    x = jax.random.normal(k_x, (N, IN_CH, H, W), jnp.float32)   # NCHW like PyTorch
    params = init_conv_params(k_p, IN_CH, OUT_CH)

    out = conv_block_forward(x, params)
    jax.block_until_ready(out)

    assert out.shape == (N, OUT_CH, H, W), out.shape
    assert bool(jnp.all(out >= 0.0))        # ReLU output

    ref = _reference_forward(x, params)
    assert bool(jnp.allclose(out, ref, atol=1e-3, rtol=1e-3)), \
        float(jnp.max(jnp.abs(out - ref)))

    print("KERNEL_OK")
</pallas_src>

<mosaic_0001>
module attributes {stable_mosaic.version = 11 : i64} {
  func.func @_fused_double_conv_kernel(%arg0: i32, %arg1: memref<1x16x16x4xf32, #tpu.memory_space<vmem>>, %arg2: memref<36x8xf32, #tpu.memory_space<vmem>>, %arg3: memref<1x8xf32, #tpu.memory_space<vmem>>, %arg4: memref<72x8xf32, #tpu.memory_space<vmem>>, %arg5: memref<1x8xf32, #tpu.memory_space<vmem>>, %arg6: memref<1x16x16x8xf32, #tpu.memory_space<vmem>>, %arg7: memref<18x18x4xf32, #tpu.memory_space<vmem>>, %arg8: memref<256x36xf32, #tpu.memory_space<vmem>>, %arg9: memref<18x18x8xf32, #tpu.memory_space<vmem>>, %arg10: memref<256x72xf32, #tpu.memory_space<vmem>>) attributes {dimension_semantics = [#tpu.dimension_semantics<parallel>], iteration_bounds = array<i64: 2>, scalar_prefetch = 0 : i64, scratch_operands = 4 : i64, tpu.core_type = #tpu.core_type<tc>, window_params = [{transform_indices = @transform_0, window_bounds = array<i64: 1, 16, 16, 4>}, {pipeline_mode = #tpu.pipeline_mode<synchronous>, transform_indices = @transform_1, window_bounds = array<i64: 36, 8>}, {pipeline_mode = #tpu.pipeline_mode<synchronous>, transform_indices = @transform_2, window_bounds = array<i64: 1, 8>}, {pipeline_mode = #tpu.pipeline_mode<synchronous>, transform_indices = @transform_3, window_bounds = array<i64: 72, 8>}, {pipeline_mode = #tpu.pipeline_mode<synchronous>, transform_indices = @transform_4, window_bounds = array<i64: 1, 8>}, {transform_indices = @transform_5, window_bounds = array<i64: 1, 16, 16, 8>}]} {
    %cst = arith.constant 0.000000e+00 : f32
    %0 = vector.broadcast %cst : f32 to vector<18x18x4xf32>
    %c0 = arith.constant 0 : index
    %c0_0 = arith.constant 0 : index
    %c0_1 = arith.constant 0 : index
    %1 = vector.load %arg7[%c0, %c0_0, %c0_1] : memref<18x18x4xf32, #tpu.memory_space<vmem>>, vector<18x18x4xf32>
    tpu.vector_store %arg7[%c0, %c0_0, %c0_1], %0 {strides = array<i32>} : memref<18x18x4xf32, #tpu.memory_space<vmem>>, vector<18x18x4xf32>,
    %c0_2 = arith.constant 0 : index
    %c0_3 = arith.constant 0 : index
    %c0_4 = arith.constant 0 : index
    %c0_5 = arith.constant 0 : index
    %2 = vector.load %arg1[%c0_2, %c0_3, %c0_4, %c0_5] : memref<1x16x16x4xf32, #tpu.memory_space<vmem>>, vector<1x16x16x4xf32>
    %3 = vector.shape_cast %2 : vector<1x16x16x4xf32> to vector<16x16x4xf32>
    %c1 = arith.constant 1 : index
    %c1_6 = arith.constant 1 : index
    %c0_7 = arith.constant 0 : index
    %4 = vector.load %arg7[%c1, %c1_6, %c0_7] : memref<18x18x4xf32, #tpu.memory_space<vmem>>, vector<16x16x4xf32>
    tpu.vector_store %arg7[%c1, %c1_6, %c0_7], %3 {strides = array<i32>} : memref<18x18x4xf32, #tpu.memory_space<vmem>>, vector<16x16x4xf32>,
    %c0_8 = arith.constant 0 : index
    %c0_9 = arith.constant 0 : index
    %c0_10 = arith.constant 0 : index
    %5 = vector.load %arg7[%c0_8, %c0_9, %c0_10] : memref<18x18x4xf32, #tpu.memory_space<vmem>>, vector<16x16x4xf32>
    %6 = vector.shape_cast %5 : vector<16x16x4xf32> to vector<256x4xf32>
    %c0_11 = arith.constant 0 : index
    %c0_12 = arith.constant 0 : index
    %7 = vector.load %arg8[%c0_11, %c0_12] : memref<256x36xf32, #tpu.memory_space<vmem>>, vector<256x4xf32>
    tpu.vector_store %arg8[%c0_11, %c0_12], %6 {strides = array<i32>} : memref<256x36xf32, #tpu.memory_space<vmem>>, vector<256x4xf32>,
    %c0_13 = arith.constant 0 : index
    %c1_14 = arith.constant 1 : index
    %c0_15 = arith.constant 0 : index
    %8 = vector.load %arg7[%c0_13, %c1_14, %c0_15] : memref<18x18x4xf32, #tpu.memory_space<vmem>>, vector<16x16x4xf32>
    %9 = vector.shape_cast %8 : vector<16x16x4xf32> to vector<256x4xf32>
    %c0_16 = arith.constant 0 : index
    %c4 = arith.constant 4 : index
    %10 = vector.load %arg8[%c0_16, %c4] : memref<256x36xf32, #tpu.memory_space<vmem>>, vector<256x4xf32>
    tpu.vector_store %arg8[%c0_16, %c4], %9 {strides = array<i32>} : memref<256x36xf32, #tpu.memory_space<vmem>>, vector<256x4xf32>,
    %c0_17 = arith.constant 0 : index
    %c2 = arith.constant 2 : index
    %c0_18 = arith.constant 0 : index
    %11 = vector.load %arg7[%c0_17, %c2, %c0_18] : memref<18x18x4xf32, #tpu.memory_space<vmem>>, vector<16x16x4xf32>
    %12 = vector.shape_cast %11 : vector<16x16x4xf32> to vector<256x4xf32>
    %c0_19 = arith.constant 0 : index
    %c8 = arith.constant 8 : index
    %13 = vector.load %arg8[%c0_19, %c8] : memref<256x36xf32, #tpu.memory_space<vmem>>, vector<256x4xf32>
    tpu.vector_store %arg8[%c0_19, %c8], %12 {strides = array<i32>} : memref<256x36xf32, #tpu.memory_space<vmem>>, vector<256x4xf32>,
    %c1_20 = arith.constant 1 : index
    %c0_21 = arith.constant 0 : index
    %c0_22 = arith.constant 0 : index
    %14 = vector.load %arg7[%c1_20, %c0_21, %c0_22] : memref<18x18x4xf32, #tpu.memory_space<vmem>>, vector<16x16x4xf32>
    %15 = vector.shape_cast %14 : vector<16x16x4xf32> to vector<256x4xf32>
    %c0_23 = arith.constant 0 : index
    %c12 = arith.constant 12 : index
    %16 = vector.load %arg8[%c0_23, %c12] : memref<256x36xf32, #tpu.memory_space<vmem>>, vector<256x4xf32>
    tpu.vector_store %arg8[%c0_23, %c12], %15 {strides = array<i32>} : memref<256x36xf32, #tpu.memory_space<vmem>>, vector<256x4xf32>,
    %c1_24 = arith.constant 1 : index
    %c1_25 = arith.constant 1 : index
    %c0_26 = arith.constant 0 : index
    %17 = vector.load %arg7[%c1_24, %c1_25, %c0_26] : memref<18x18x4xf32, #tpu.memory_space<vmem>>, vector<16x16x4xf32>
    %18 = vector.shape_cast %17 : vector<16x16x4xf32> to vector<256x4xf32>
    %c0_27 = arith.constant 0 : index
    %c16 = arith.constant 16 : index
    %19 = vector.load %arg8[%c0_27, %c16] : memref<256x36xf32, #tpu.memory_space<vmem>>, vector<256x4xf32>
    tpu.vector_store %arg8[%c0_27, %c16], %18 {strides = array<i32>} : memref<256x36xf32, #tpu.memory_space<vmem>>, vector<256x4xf32>,
    %c1_28 = arith.constant 1 : index
    %c2_29 = arith.constant 2 : index
    %c0_30 = arith.constant 0 : index
    %20 = vector.load %arg7[%c1_28, %c2_29, %c0_30] : memref<18x18x4xf32, #tpu.memory_space<vmem>>, vector<16x16x4xf32>
    %21 = vector.shape_cast %20 : vector<16x16x4xf32> to vector<256x4xf32>
    %c0_31 = arith.constant 0 : index
    %c20 = arith.constant 20 : index
    %22 = vector.load %arg8[%c0_31, %c20] : memref<256x36xf32, #tpu.memory_space<vmem>>, vector<256x4xf32>
    tpu.vector_store %arg8[%c0_31, %c20], %21 {strides = array<i32>} : memref<256x36xf32, #tpu.memory_space<vmem>>, vector<256x4xf32>,
    %c2_32 = arith.constant 2 : index
    %c0_33 = arith.constant 0 : index
    %c0_34 = arith.constant 0 : index
    %23 = vector.load %arg7[%c2_32, %c0_33, %c0_34] : memref<18x18x4xf32, #tpu.memory_space<vmem>>, vector<16x16x4xf32>
    %24 = vector.shape_cast %23 : vector<16x16x4xf32> to vector<256x4xf32>
    %c0_35 = arith.constant 0 : index
    %c24 = arith.constant 24 : index
    %25 = vector.load %arg8[%c0_35, %c24] : memref<256x36xf32, #tpu.memory_space<vmem>>, vector<256x4xf32>
    tpu.vector_store %arg8[%c0_35, %c24], %24 {strides = array<i32>} : memref<256x36xf32, #tpu.memory_space<vmem>>, vector<256x4xf32>,
    %c2_36 = arith.constant 2 : index
    %c1_37 = arith.constant 1 : index
    %c0_38 = arith.constant 0 : index
    %26 = vector.load %arg7[%c2_36, %c1_37, %c0_38] : memref<18x18x4xf32, #tpu.memory_space<vmem>>, vector<16x16x4xf32>
    %27 = vector.shape_cast %26 : vector<16x16x4xf32> to vector<256x4xf32>
    %c0_39 = arith.constant 0 : index
    %c28 = arith.constant 28 : index
    %28 = vector.load %arg8[%c0_39, %c28] : memref<256x36xf32, #tpu.memory_space<vmem>>, vector<256x4xf32>
    tpu.vector_store %arg8[%c0_39, %c28], %27 {strides = array<i32>} : memref<256x36xf32, #tpu.memory_space<vmem>>, vector<256x4xf32>,
    %c2_40 = arith.constant 2 : index
    %c2_41 = arith.constant 2 : index
    %c0_42 = arith.constant 0 : index
    %29 = vector.load %arg7[%c2_40, %c2_41, %c0_42] : memref<18x18x4xf32, #tpu.memory_space<vmem>>, vector<16x16x4xf32>
    %30 = vector.shape_cast %29 : vector<16x16x4xf32> to vector<256x4xf32>
    %c0_43 = arith.constant 0 : index
    %c32 = arith.constant 32 : index
    %31 = vector.load %arg8[%c0_43, %c32] : memref<256x36xf32, #tpu.memory_space<vmem>>, vector<256x4xf32>
    tpu.vector_store %arg8[%c0_43, %c32], %30 {strides = array<i32>} : memref<256x36xf32, #tpu.memory_space<vmem>>, vector<256x4xf32>,
    %c0_44 = arith.constant 0 : index
    %c0_45 = arith.constant 0 : index
    %32 = vector.load %arg8[%c0_44, %c0_45] : memref<256x36xf32, #tpu.memory_space<vmem>>, vector<256x36xf32>
    %c0_46 = arith.constant 0 : index
    %c0_47 = arith.constant 0 : index
    %33 = vector.load %arg2[%c0_46, %c0_47] : memref<36x8xf32, #tpu.memory_space<vmem>>, vector<36x8xf32>
    %cst_48 = arith.constant dense<0.000000e+00> : vector<256x8xf32>
    %34 = tpu.matmul %32, %33, %cst_48 {dimension_numbers = #tpu.dot_dimension_numbers<[1], [0], [0], [1], [0, 0, 1, 1], [], []>} : vector<256x36xf32>, vector<36x8xf32>, vector<256x8xf32> -> vector<256x8xf32>
    %c0_49 = arith.constant 0 : index
    %c0_50 = arith.constant 0 : index
    %35 = vector.load %arg3[%c0_49, %c0_50] : memref<1x8xf32, #tpu.memory_space<vmem>>, vector<1x8xf32>
    %36 = vector.broadcast %35 : vector<1x8xf32> to vector<256x8xf32>
    %37 = arith.addf %34, %36 : vector<256x8xf32>
    %cst_51 = arith.constant 0.000000e+00 : f32
    %38 = vector.broadcast %cst_51 : f32 to vector<256x8xf32>
    %39 = arith.maximumf %37, %38 : vector<256x8xf32>
    %cst_52 = arith.constant 0.000000e+00 : f32
    %40 = vector.broadcast %cst_52 : f32 to vector<18x18x8xf32>
    %c0_53 = arith.constant 0 : index
    %c0_54 = arith.constant 0 : index
    %c0_55 = arith.constant 0 : index
    %41 = vector.load %arg9[%c0_53, %c0_54, %c0_55] : memref<18x18x8xf32, #tpu.memory_space<vmem>>, vector<18x18x8xf32>
    tpu.vector_store %arg9[%c0_53, %c0_54, %c0_55], %40 {strides = array<i32>} : memref<18x18x8xf32, #tpu.memory_space<vmem>>, vector<18x18x8xf32>,
    %42 = vector.shape_cast %39 : vector<256x8xf32> to vector<16x16x8xf32>
    %c1_56 = arith.constant 1 : index
    %c1_57 = arith.constant 1 : index
    %c0_58 = arith.constant 0 : index
    %43 = vector.load %arg9[%c1_56, %c1_57, %c0_58] : memref<18x18x8xf32, #tpu.memory_space<vmem>>, vector<16x16x8xf32>
    tpu.vector_store %arg9[%c1_56, %c1_57, %c0_58], %42 {strides = array<i32>} : memref<18x18x8xf32, #tpu.memory_space<vmem>>, vector<16x16x8xf32>,
    %c0_59 = arith.constant 0 : index
    %c0_60 = arith.constant 0 : index
    %c0_61 = arith.constant 0 : index
    %44 = vector.load %arg9[%c0_59, %c0_60, %c0_61] : memref<18x18x8xf32, #tpu.memory_space<vmem>>, vector<16x16x8xf32>
    %45 = vector.shape_cast %44 : vector<16x16x8xf32> to vector<256x8xf32>
    %c0_62 = arith.constant 0 : index
    %c0_63 = arith.constant 0 : index
    %46 = vector.load %arg10[%c0_62, %c0_63] : memref<256x72xf32, #tpu.memory_space<vmem>>, vector<256x8xf32>
    tpu.vector_store %arg10[%c0_62, %c0_63], %45 {strides = array<i32>} : memref<256x72xf32, #tpu.memory_space<vmem>>, vector<256x8xf32>,
    %c0_64 = arith.constant 0 : index
    %c1_65 = arith.constant 1 : index
    %c0_66 = arith.constant 0 : index
    %47 = vector.load %arg9[%c0_64, %c1_65, %c0_66] : memref<18x18x8xf32, #tpu.memory_space<vmem>>, vector<16x16x8xf32>
    %48 = vector.shape_cast %47 : vector<16x16x8xf32> to vector<256x8xf32>
    %c0_67 = arith.constant 0 : index
    %c8_68 = arith.constant 8 : index
    %49 = vector.load %arg10[%c0_67, %c8_68] : memref<256x72xf32, #tpu.memory_space<vmem>>, vector<256x8xf32>
    tpu.vector_store %arg10[%c0_67, %c8_68], %48 {strides = array<i32>} : memref<256x72xf32, #tpu.memory_space<vmem>>, vector<256x8xf32>,
    %c0_69 = arith.constant 0 : index
    %c2_70 = arith.constant 2 : index
    %c0_71 = arith.constant 0 : index
    %50 = vector.load %arg9[%c0_69, %c2_70, %c0_71] : memref<18x18x8xf32, #tpu.memory_space<vmem>>, vector<16x16x8xf32>
    %51 = vector.shape_cast %50 : vector<16x16x8xf32> to vector<256x8xf32>
    %c0_72 = arith.constant 0 : index
    %c16_73 = arith.constant 16 : index
    %52 = vector.load %arg10[%c0_72, %c16_73] : memref<256x72xf32, #tpu.memory_space<vmem>>, vector<256x8xf32>
    tpu.vector_store %arg10[%c0_72, %c16_73], %51 {strides = array<i32>} : memref<256x72xf32, #tpu.memory_space<vmem>>, vector<256x8xf32>,
    %c1_74 = arith.constant 1 : index
    %c0_75 = arith.constant 0 : index
    %c0_76 = arith.constant 0 : index
    %53 = vector.load %arg9[%c1_74, %c0_75, %c0_76] : memref<18x18x8xf32, #tpu.memory_space<vmem>>, vector<16x16x8xf32>
    %54 = vector.shape_cast %53 : vector<16x16x8xf32> to vector<256x8xf32>
    %c0_77 = arith.constant 0 : index
    %c24_78 = arith.constant 24 : index
    %55 = vector.load %arg10[%c0_77, %c24_78] : memref<256x72xf32, #tpu.memory_space<vmem>>, vector<256x8xf32>
    tpu.vector_store %arg10[%c0_77, %c24_78], %54 {strides = array<i32>} : memref<256x72xf32, #tpu.memory_space<vmem>>, vector<256x8xf32>,
    %c1_79 = arith.constant 1 : index
    %c1_80 = arith.constant 1 : index
    %c0_81 = arith.constant 0 : index
    %56 = vector.load %arg9[%c1_79, %c1_80, %c0_81] : memref<18x18x8xf32, #tpu.memory_space<vmem>>, vector<16x16x8xf32>
    %57 = vector.shape_cast %56 : vector<16x16x8xf32> to vector<256x8xf32>
    %c0_82 = arith.constant 0 : index
    %c32_83 = arith.constant 32 : index
    %58 = vector.load %arg10[%c0_82, %c32_83] : memref<256x72xf32, #tpu.memory_space<vmem>>, vector<256x8xf32>
    tpu.vector_store %arg10[%c0_82, %c32_83], %57 {strides = array<i32>} : memref<256x72xf32, #tpu.memory_space<vmem>>, vector<256x8xf32>,
    %c1_84 = arith.constant 1 : index
    %c2_85 = arith.constant 2 : index
    %c0_86 = arith.constant 0 : index
    %59 = vector.load %arg9[%c1_84, %c2_85, %c0_86] : memref<18x18x8xf32, #tpu.memory_space<vmem>>, vector<16x16x8xf32>
    %60 = vector.shape_cast %59 : vector<16x16x8xf32> to vector<256x8xf32>
    %c0_87 = arith.constant 0 : index
    %c40 = arith.constant 40 : index
    %61 = vector.load %arg10[%c0_87, %c40] : memref<256x72xf32, #tpu.memory_space<vmem>>, vector<256x8xf32>
    tpu.vector_store %arg10[%c0_87, %c40], %60 {strides = array<i32>} : memref<256x72xf32, #tpu.memory_space<vmem>>, vector<256x8xf32>,
    %c2_88 = arith.constant 2 : index
    %c0_89 = arith.constant 0 : index
    %c0_90 = arith.constant 0 : index
    %62 = vector.load %arg9[%c2_88, %c0_89, %c0_90] : memref<18x18x8xf32, #tpu.memory_space<vmem>>, vector<16x16x8xf32>
    %63 = vector.shape_cast %62 : vector<16x16x8xf32> to vector<256x8xf32>
    %c0_91 = arith.constant 0 : index
    %c48 = arith.constant 48 : index
    %64 = vector.load %arg10[%c0_91, %c48] : memref<256x72xf32, #tpu.memory_space<vmem>>, vector<256x8xf32>
    tpu.vector_store %arg10[%c0_91, %c48], %63 {strides = array<i32>} : memref<256x72xf32, #tpu.memory_space<vmem>>, vector<256x8xf32>,
    %c2_92 = arith.constant 2 : index
    %c1_93 = arith.constant 1 : index
    %c0_94 = arith.constant 0 : index
    %65 = vector.load %arg9[%c2_92, %c1_93, %c0_94] : memref<18x18x8xf32, #tpu.memory_space<vmem>>, vector<16x16x8xf32>
    %66 = vector.shape_cast %65 : vector<16x16x8xf32> to vector<256x8xf32>
    %c0_95 = arith.constant 0 : index
    %c56 = arith.constant 56 : index
    %67 = vector.load %arg10[%c0_95, %c56] : memref<256x72xf32, #tpu.memory_space<vmem>>, vector<256x8xf32>
    tpu.vector_store %arg10[%c0_95, %c56], %66 {strides = array<i32>} : memref<256x72xf32, #tpu.memory_space<vmem>>, vector<256x8xf32>,
    %c2_96 = arith.constant 2 : index
    %c2_97 = arith.constant 2 : index
    %c0_98 = arith.constant 0 : index
    %68 = vector.load %arg9[%c2_96, %c2_97, %c0_98] : memref<18x18x8xf32, #tpu.memory_space<vmem>>, vector<16x16x8xf32>
    %69 = vector.shape_cast %68 : vector<16x16x8xf32> to vector<256x8xf32>
    %c0_99 = arith.constant 0 : index
    %c64 = arith.constant 64 : index
    %70 = vector.load %arg10[%c0_99, %c64] : memref<256x72xf32, #tpu.memory_space<vmem>>, vector<256x8xf32>
    tpu.vector_store %arg10[%c0_99, %c64], %69 {strides = array<i32>} : memref<256x72xf32, #tpu.memory_space<vmem>>, vector<256x8xf32>,
    %c0_100 = arith.constant 0 : index
    %c0_101 = arith.constant 0 : index
    %71 = vector.load %arg10[%c0_100, %c0_101] : memref<256x72xf32, #tpu.memory_space<vmem>>, vector<256x72xf32>
    %c0_102 = arith.constant 0 : index
    %c0_103 = arith.constant 0 : index
    %72 = vector.load %arg4[%c0_102, %c0_103] : memref<72x8xf32, #tpu.memory_space<vmem>>, vector<72x8xf32>
    %cst_104 = arith.constant dense<0.000000e+00> : vector<256x8xf32>
    %73 = tpu.matmul %71, %72, %cst_104 {dimension_numbers = #tpu.dot_dimension_numbers<[1], [0], [0], [1], [0, 0, 1, 1], [], []>} : vector<256x72xf32>, vector<72x8xf32>, vector<256x8xf32> -> vector<256x8xf32>
    %c0_105 = arith.constant 0 : index
    %c0_106 = arith.constant 0 : index
    %74 = vector.load %arg5[%c0_105, %c0_106] : memref<1x8xf32, #tpu.memory_space<vmem>>, vector<1x8xf32>
    %75 = vector.broadcast %74 : vector<1x8xf32> to vector<256x8xf32>
    %76 = arith.addf %73, %75 : vector<256x8xf32>
    %cst_107 = arith.constant 0.000000e+00 : f32
    %77 = vector.broadcast %cst_107 : f32 to vector<256x8xf32>
    %78 = arith.maximumf %76, %77 : vector<256x8xf32>
    %79 = vector.shape_cast %78 : vector<256x8xf32> to vector<16x16x8xf32>
    %c0_108 = arith.constant 0 : index
    %c0_109 = arith.constant 0 : index
    %c0_110 = arith.constant 0 : index
    %c0_111 = arith.constant 0 : index
    %80 = vector.load %arg6[%c0_108, %c0_109, %c0_110, %c0_111] : memref<1x16x16x8xf32, #tpu.memory_space<vmem>>, vector<1x16x16x8xf32>
    %81 = vector.shape_cast %80 : vector<1x16x16x8xf32> to vector<16x16x8xf32>
    %82 = vector.shape_cast %79 : vector<16x16x8xf32> to vector<1x16x16x8xf32>
    tpu.vector_store %arg6[%c0_108, %c0_109, %c0_110, %c0_111], %82 {strides = array<i32>} : memref<1x16x16x8xf32, #tpu.memory_space<vmem>>, vector<1x16x16x8xf32>,
    return
  }
  func.func @transform_0(%arg0: i32) -> (i32, i32, i32, i32) {
    %c0_i32 = arith.constant 0 : i32
    %c0_i32_0 = arith.constant 0 : i32
    %c0_i32_1 = arith.constant 0 : i32
    %c0_i32_2 = arith.constant 0 : i32
    return %arg0, %c0_i32, %c0_i32_0, %c0_i32_1 : i32, i32, i32, i32
  }
  func.func @transform_1(%arg0: i32) -> (i32, i32) {
    %c0_i32 = arith.constant 0 : i32
    %c0_i32_0 = arith.constant 0 : i32
    %c0_i32_1 = arith.constant 0 : i32
    return %c0_i32, %c0_i32_0 : i32, i32
  }
  func.func @transform_2(%arg0: i32) -> (i32, i32) {
    %c0_i32 = arith.constant 0 : i32
    %c0_i32_0 = arith.constant 0 : i32
    %c0_i32_1 = arith.constant 0 : i32
    return %c0_i32, %c0_i32_0 : i32, i32
  }
  func.func @transform_3(%arg0: i32) -> (i32, i32) {
    %c0_i32 = arith.constant 0 : i32
    %c0_i32_0 = arith.constant 0 : i32
    %c0_i32_1 = arith.constant 0 : i32
    return %c0_i32, %c0_i32_0 : i32, i32
  }
  func.func @transform_4(%arg0: i32) -> (i32, i32) {
    %c0_i32 = arith.constant 0 : i32
    %c0_i32_0 = arith.constant 0 : i32
    %c0_i32_1 = arith.constant 0 : i32
    return %c0_i32, %c0_i32_0 : i32, i32
  }
  func.func @transform_5(%arg0: i32) -> (i32, i32, i32, i32) {
    %c0_i32 = arith.constant 0 : i32
    %c0_i32_0 = arith.constant 0 : i32
    %c0_i32_1 = arith.constant 0 : i32
    %c0_i32_2 = arith.constant 0 : i32
    return %arg0, %c0_i32, %c0_i32_0, %c0_i32_1 : i32, i32, i32, i32
  }
}

</mosaic_0001>

<bundles_post_ra>
// kernel: conv_block_forward.1
= control target key start
LH: loop header
LB: loop body
LE: loop exit
PB: predicated region body
PF: predicated region fallthrough
CT: control target
= control target key end

     0   :  { %s4480_s18 = smov 0   ;;  %s6925_s0 = inlined_call_operand.vmem [shape: f32[2,16,16,4], index: 0, kind: input, shape index: {}]   ;;  %s6926_s1 = inlined_call_operand.vmem [shape: f32[36,8], index: 1, kind: input, shape index: {}]   ;;  %s6927_s2 = inlined_call_operand.vmem [shape: f32[1,8], index: 2, kind: input, shape index: {}]   ;;  %s6928_s3 = inlined_call_operand.vmem [shape: f32[72,8], index: 3, kind: input, shape index: {}]   ;;  %s6929_s4 = inlined_call_operand.vmem [shape: f32[1,8], index: 4, kind: input, shape index: {}]   ;;  %s6930_s5 = inlined_call_operand.vmem [shape: f32[2,16,16,8], index: 5, kind: output, shape index: {}]  }
   0x1 LB: > { %s4314_s19 = sadd.s32 4294967295, %s4435_s18   ;;  %p4318_p0 = scmp.ge.s32.totalorder %s4435_s18, 1  ;;  %s4435_s18 = sphi %s4480_s18, %s15_s18  }
   0x2   : > { %p187_p1 = scmp.lt.s32.totalorder %s4435_s18, 3 }
   0x4   : > { %p188_p2 = pnand %p4318_p0, %p187_p1 }
   0x6   : > { %191 = sbr.rel (%p188_p2) target bundleno = 1927 (0x787), region = 40 }
   0xb   : > { %vm225_vm0 = vcmask 31744   ;;  %v6931_v0 = vmov 0.0   ;;  %s4438_s20 = smov 4   ;;  %p215_p3 = scmp.lt.s32.totalorder %s4314_s19, 1  ;;  %vm228_vm1 = vcmask 25600   ;;  %vm570_vm2 = vcmask 64544  }
   0xc   : > { %226 = vst.msk [vmem:[#allocation2] sm:$0xff] %vm225_vm0, %v6931_v0  ;;  %s4439_s25 = smov 8   ;;  %s4440_s26 = smov 12   ;;  %vm763_vm3 = vcmask 97344   ;;  %vm956_vm4 = vcmask 130144   ;;  %vm1149_vm5 = vcmask 162944  }
   0xd   : > { %227 = vst.msk [vmem:[#allocation2 + $0x8] sm:$0xff] %vm225_vm0, %v6931_v0  ;;  %s7121_s19 = smov (!%p215_p3, %s4314_s19), 1  ;;  %s4441_s27 = smov 16   ;;  %vm1342_vm6 = vcmask 195744   ;;  %vm1536_vm7 = vcmask 228544   ;;  %vm1729_vm8 = vcmask 261344  }
   0xe   : > { %230 = vst.msk [vmem:[#allocation2 + $0x18] sm:$0xff] %vm225_vm0, %v6931_v0  ;;  %s4390_s21 = sshll.u32 %s7121_s19, 8  ;;  %s4442_s28 = smov 20   ;;  %vm2093_vm9 = vcmask 1043456   ;;  %vm1922_vm10 = vcmask 294144   ;;  %vm1996_vm11 = vcmask 293888  }
   0xf   : > { %231 = vst.msk [vmem:[#allocation2 + $0x20] sm:$0xff] %vm225_vm0, %v6931_v0  ;;  %s4563_s24 = scalar_lea.vmem %s6925_s0, %s4390_s21  ;;  %s4443_s29 = smov 24   ;;  %vm2242_vm12 = vcmask 64512   ;;  %vm2245_vm13 = vcmask 58368   ;;  %vm2555_vm14 = vcmask 130112   ;;  %vm2748_vm15 = vcmask 195712  }
  0x10   : > { %233 = vst.msk [vmem:[#allocation2 + $0x30] sm:$0xff] %vm225_vm0, %v6931_v0  ;;  %v281_v2 = vld [vmem:[%s4563_s24] sm:$0xff]  ;;  %v282_v5 = vld [vmem:[%s4563_s24 + $0x8] sm:$0xff]  ;;  %v288_v8 = vld [vmem:[%s4563_s24 + $0x38] sm:$0xff]  ;;  %s4444_s30 = smov 28   ;;  %s4445_s6 = smov 32  }
  0x11   : > { %234 = vst.msk [vmem:[#allocation2 + $0x38] sm:$0xff] %vm225_vm0, %v6931_v0  ;;  %v285_v6 = vld [vmem:[%s4563_s24 + $0x20] sm:$0xff]  ;;  %v286_v7 = vld [vmem:[%s4563_s24 + $0x28] sm:$0xff]  ;;  %v283_v9 = vld [vmem:[%s4563_s24 + $0x10] sm:$0xff]  ;;  %s4446_s22 = smov 40   ;;  %s4447_s23 = smov 48  }
  0x12   : > { %236 = vst.msk [vmem:[#allocation2 + $0x48] sm:$0xff] %vm225_vm0, %v6931_v0  ;;  %v289_v10 = vld [vmem:[%s4563_s24 + $0x40] sm:$0xff]  ;;  %v291_v11 = vld [vmem:[%s4563_s24 + $0x50] sm:$0xff]  ;;  %v284_v12 = vld [vmem:[%s4563_s24 + $0x18] sm:$0xff] }
  0x13   : > { %237 = vst.msk [vmem:[#allocation2 + $0x50] sm:$0xff] %vm225_vm0, %v6931_v0  ;;  %v292_v13 = vld [vmem:[%s4563_s24 + $0x58] sm:$0xff]  ;;  %v294_v14 = vld [vmem:[%s4563_s24 + $0x68] sm:$0xff]  ;;  %v287_v16 = vld [vmem:[%s4563_s24 + $0x30] sm:$0xff] }
  0x14   : > { %v410_v1 = vld [vmem:[#allocation2 + $0x1] sm:$0xff]  ;;  %239 = vst.msk [vmem:[#allocation2 + $0x60] sm:$0xff] %vm225_vm0, %v6931_v0  ;;  %v295_v18 = vld [vmem:[%s4563_s24 + $0x70] sm:$0xff]  ;;  %v300_v23 = vld [vmem:[%s4563_s24 + $0x98] sm:$0xff] }
  0x15   : > { %474 = vrot.lane.b32.xlu0 %v410_v1, %s4438_s20  ;;  %240 = vst.msk [vmem:[#allocation2 + $0x68] sm:$0xff] %vm225_vm0, %v6931_v0  ;;  %v297_v19 = vld [vmem:[%s4563_s24 + $0x80] sm:$0xff]  ;;  %v290_v20 = vld [vmem:[%s4563_s24 + $0x48] sm:$0xff]  ;;  %v303_v29 = vld [vmem:[%s4563_s24 + $0xb0] sm:$0xff] }
  0x16   : > { %242 = vst.msk [vmem:[#allocation2 + $0x78] sm:$0xff] %vm225_vm0, %v6931_v0  ;;  %v298_v22 = vld [vmem:[%s4563_s24 + $0x88] sm:$0xff]  ;;  %v293_v25 = vld [vmem:[%s4563_s24 + $0x60] sm:$0xff]  ;;  %v296_v30 = vld [vmem:[%s4563_s24 + $0x78] sm:$0xff] }
  0x17   : > { %243 = vst.msk [vmem:[#allocation2 + $0x80] sm:$0xff] %vm225_vm0, %v6931_v0  ;;  %v301_v27 = vld [vmem:[%s4563_s24 + $0xa0] sm:$0xff]  ;;  %v304_v33 = vld [vmem:[%s4563_s24 + $0xb8] sm:$0xff]  ;;  %v306_v35 = vld [vmem:[%s4563_s24 + $0xc8] sm:$0xff] }
  0x18   : > { %245 = vst.msk [vmem:[#allocation2 + $0x90] sm:$0xff] %vm225_vm0, %v6931_v0  ;;  %v299_v36 = vld [vmem:[%s4563_s24 + $0x90] sm:$0xff]  ;;  %v309_v41 = vld [vmem:[%s4563_s24 + $0xe0] sm:$0xff]  ;;  %v302_v42 = vld [vmem:[%s4563_s24 + $0xa8] sm:$0xff] }
  0x19   : > { %246 = vst.msk [vmem:[#allocation2 + $0x98] sm:$0xff] %vm225_vm0, %v6931_v0  ;;  %v307_v39 = vld [vmem:[%s4563_s24 + $0xd0] sm:$0xff]  ;;  %v310_v45 = vld [vmem:[%s4563_s24 + $0xe8] sm:$0xff]  ;;  %v305_v47 = vld [vmem:[%s4563_s24 + $0xc0] sm:$0xff] }
  0x1a   : > { %248 = vst.msk [vmem:[#allocation2 + $0xa8] sm:$0xff] %vm225_vm0, %v6931_v0  ;;  %v308_v51 = vld [vmem:[%s4563_s24 + $0xd8] sm:$0xff]  ;;  %v346_v62 = vld [vmem:[#allocation2] sm:$0xff] }
  0x1b   : > { %249 = vst.msk [vmem:[#allocation2 + $0xb0] sm:$0xff] %vm225_vm0, %v6931_v0 }
  0x1c   : > { %251 = vst.msk [vmem:[#allocation2 + $0xc0] sm:$0xff] %vm225_vm0, %v6931_v0 }
  0x1d   : > { %252 = vst.msk [vmem:[#allocation2 + $0xc8] sm:$0xff] %vm225_vm0, %v6931_v0 }
  0x1e   : > { %254 = vst.msk [vmem:[#allocation2 + $0xd8] sm:$0xff] %vm225_vm0, %v6931_v0 }
  0x1f   : > { %255 = vst.msk [vmem:[#allocation2 + $0xe0] sm:$0xff] %vm225_vm0, %v6931_v0 }
  0x20   : > { %257 = vst.msk [vmem:[#allocation2 + $0xf0] sm:$0xff] %vm225_vm0, %v6931_v0 }
  0x21   : > { %258 = vst.msk [vmem:[#allocation2 + $0xf8] sm:$0xff] %vm225_vm0, %v6931_v0 }
  0x22   : > { %260 = vst.msk [vmem:[#allocation2 + $0x108] sm:$0xff] %vm225_vm0, %v6931_v0 }
  0x23   : > { %261 = vst.msk [vmem:[#allocation2 + $0x110] sm:$0xff] %vm225_vm0, %v6931_v0 }
  0x24   : > { %263 = vst.msk [vmem:[#allocation2 + $0x120] sm:$0xff] %vm225_vm0, %v6931_v0 }
  0x25   : > { %264 = vst.msk [vmem:[#allocation2 + $0x128] sm:$0xff] %vm225_vm0, %v6931_v0 }
  0x26   : > { %266 = vst.msk [vmem:[#allocation2 + $0x138] sm:$0xff] %vm225_vm0, %v6931_v0 }
  0x27   : > { %267 = vst.msk [vmem:[#allocation2 + $0x140] sm:$0xff] %vm225_vm0, %v6931_v0 }
  0x28   : > { %269 = vst.msk [vmem:[#allocation2 + $0x150] sm:$0xff] %vm225_vm0, %v6931_v0 }
  0x29   : > { %270 = vst.msk [vmem:[#allocation2 + $0x158] sm:$0xff] %vm225_vm0, %v6931_v0 }
  0x2a   : > { %272 = vst.msk [vmem:[#allocation2 + $0x168] sm:$0xff] %vm225_vm0, %v6931_v0 }
  0x2b   : > { %273 = vst.msk [vmem:[#allocation2 + $0x170] sm:$0xff] %vm225_vm0, %v6931_v0 }
  0x2c   : > { %275 = vst.msk [vmem:[#allocation2 + $0x180] sm:$0xff] %vm225_vm0, %v6931_v0 }
  0x2d   : > { %276 = vst.msk [vmem:[#allocation2 + $0x188] sm:$0xff] %vm225_vm0, %v6931_v0 }
  0x2e   : > { %278 = vst.msk [vmem:[#allocation2 + $0x198] sm:$0xff] %vm225_vm0, %v6931_v0 }
  0x2f   : > { %279 = vst.msk [vmem:[#allocation2 + $0x1a0] sm:$0xff] %vm225_vm0, %v6931_v0 }
  0x30   : > { %314 = vst.msk [vmem:[#allocation2 + $0x19] sm:$0xff] %vm225_vm0, %v281_v2 }
  0x31   : > { %229 = vst.msk [vmem:[#allocation2 + $0x10] sm:$0x3] %vm228_vm1, %v6931_v0 }
  0x32   : > { %232 = vst.msk [vmem:[#allocation2 + $0x28] sm:$0x3] %vm228_vm1, %v6931_v0 }
  0x33   : > { %235 = vst.msk [vmem:[#allocation2 + $0x40] sm:$0x3] %vm228_vm1, %v6931_v0 }
  0x34   : > { %238 = vst.msk [vmem:[#allocation2 + $0x58] sm:$0x3] %vm228_vm1, %v6931_v0 }
  0x35   : > { %241 = vst.msk [vmem:[#allocation2 + $0x70] sm:$0x3] %vm228_vm1, %v6931_v0 }
  0x36   : > { %244 = vst.msk [vmem:[#allocation2 + $0x88] sm:$0x3] %vm228_vm1, %v6931_v0 }
  0x37   : > { %v4589_v3 = vld [vmem:[#allocation2 + $0x19] sm:$0xff]  ;;  %247 = vst.msk [vmem:[#allocation2 + $0xa0] sm:$0x3] %vm228_vm1, %v6931_v0 }
  0x38   : > { %478 = vrot.lane.b32.xlu1 %v4589_v3, %s4438_s20  ;;  %v411_v4 = vld [vmem:[#allocation2 + $0x9] sm:$0xff]  ;;  %250 = vst.msk [vmem:[#allocation2 + $0xb8] sm:$0x3] %vm228_vm1, %v6931_v0 }
  0x39   : > { %476 = vrot.lane.b32.xlu0 %v411_v4, %s4438_s20  ;;  %253 = vst.msk [vmem:[#allocation2 + $0xd0] sm:$0x3] %vm228_vm1, %v6931_v0  ;;  %v604_v2 = vld [vmem:[#allocation2 + $0xa] sm:$0xff] }
  0x3a   : > { %256 = vst.msk [vmem:[#allocation2 + $0xe8] sm:$0x3] %vm228_vm1, %v6931_v0 }
  0x3b   : > { %259 = vst.msk [vmem:[#allocation2 + $0x100] sm:$0x3] %vm228_vm1, %v6931_v0 }
  0x3c   : > { %262 = vst.msk [vmem:[#allocation2 + $0x118] sm:$0x3] %vm228_vm1, %v6931_v0 }
  0x3d   : > { %265 = vst.msk [vmem:[#allocation2 + $0x130] sm:$0x3] %vm228_vm1, %v6931_v0 }
  0x3e   : > { %268 = vst.msk [vmem:[#allocation2 + $0x148] sm:$0x3] %vm228_vm1, %v6931_v0 }
  0x3f   : > { %271 = vst.msk [vmem:[#allocation2 + $0x160] sm:$0x3] %vm228_vm1, %v6931_v0 }
  0x40   : > { %274 = vst.msk [vmem:[#allocation2 + $0x178] sm:$0x3] %vm228_vm1, %v6931_v0 }
  0x41   : > { %277 = vst.msk [vmem:[#allocation2 + $0x190] sm:$0x3] %vm228_vm1, %v6931_v0 }
  0x42   : > { %280 = vst.msk [vmem:[#allocation2 + $0x1a8] sm:$0x3] %vm228_vm1, %v6931_v0  ;;  %vm3134_vm1 = vcmask 326912  }
  0x43   : > { %315 = vst.msk [vmem:[#allocation2 + $0x21] sm:$0xff] %vm225_vm0, %v282_v5  ;;  %v4797_v5 = vld [vmem:[#allocation2 + $0x18] sm:$0xff] }
  0x44   : > { %318 = vst.msk [vmem:[#allocation2 + $0x49] sm:$0xff] %vm225_vm0, %v285_v6  ;;  %v347_v6 = vld [vmem:[#allocation2 + $0x8] sm:$0xff] }
  0x45   : > { %319 = vst.msk [vmem:[#allocation2 + $0x51] sm:$0xff] %vm225_vm0, %v286_v7 }
  0x46   : > { %321 = vst.msk [vmem:[#allocation2 + $0x69] sm:$0xff] %vm225_vm0, %v288_v8 }
  0x47   : > { %316 = vst.msk [vmem:[#allocation2 + $0x31] sm:$0xff] %vm225_vm0, %v283_v9 }
  0x48   : > { %322 = vst.msk [vmem:[#allocation2 + $0x79] sm:$0xff] %vm225_vm0, %v289_v10  ;;  %v603_v10 = vld [vmem:[#allocation2 + $0x2] sm:$0xff] }
  0x49   : > { %324 = vst.msk [vmem:[#allocation2 + $0x91] sm:$0xff] %vm225_vm0, %v291_v11 }
  0x4a   : > { %v4635_v15 = vld [vmem:[#allocation2 + $0x21] sm:$0xff]  ;;  %317 = vst.msk [vmem:[#allocation2 + $0x39] sm:$0xff] %vm225_vm0, %v284_v12 }
  0x4b   : > { %480 = vrot.lane.b32.xlu1 %v4635_v15, %s4438_s20  ;;  %v4641_v17 = vld [vmem:[#allocation2 + $0x49] sm:$0xff]  ;;  %325 = vst.msk [vmem:[#allocation2 + $0x99] sm:$0xff] %vm225_vm0, %v292_v13  ;;  %v4808_v8 = vld [vmem:[#allocation2 + $0x1a] sm:$0xff] }
  0x4c   : > { %486 = vrot.lane.b32.xlu0 %v4641_v17, %s4438_s20  ;;  %327 = vst.msk [vmem:[#allocation2 + $0xb1] sm:$0xff] %vm225_vm0, %v294_v14  ;;  %v4659_v24 = vld [vmem:[#allocation2 + $0x51] sm:$0xff]  ;;  %v4816_v11 = vld [vmem:[#allocation2 + $0x20] sm:$0xff]  ;;  %v4820_v12 = vld [vmem:[#allocation2 + $0x48] sm:$0xff] }
  0x4d   : > { %320 = vst.msk [vmem:[#allocation2 + $0x61] sm:$0xff] %vm225_vm0, %v287_v16  ;;  %v4663_v26 = vld [vmem:[#allocation2 + $0x69] sm:$0xff]  ;;  %v4831_v16 = vld [vmem:[#allocation2 + $0x52] sm:$0xff] }
  0x4e   : > { %v4651_v21 = vld [vmem:[#allocation2 + $0x31] sm:$0xff]  ;;  %328 = vst.msk [vmem:[#allocation2 + $0xc1] sm:$0xff] %vm225_vm0, %v295_v18  ;;  %v4837_v18 = vld [vmem:[#allocation2 + $0x22] sm:$0xff] }
  0x4f   : > { %482 = vrot.lane.b32.xlu2 %v4651_v21, %s4438_s20  ;;  %330 = vst.msk [vmem:[#allocation2 + $0xd9] sm:$0xff] %vm225_vm0, %v297_v19  ;;  %v4682_v31 = vld [vmem:[#allocation2 + $0x79] sm:$0xff]  ;;  %v4782_v63 = vld [vmem:[#allocation2 + $0x30] sm:$0xff] }
  0x50   : > { %323 = vst.msk [vmem:[#allocation2 + $0x81] sm:$0xff] %vm225_vm0, %v290_v20  ;;  %v4684_v32 = vld [vmem:[#allocation2 + $0x91] sm:$0xff] }
  0x51   : > { %331 = vst.msk [vmem:[#allocation2 + $0xe1] sm:$0xff] %vm225_vm0, %v298_v22  ;;  %v4673_v28 = vld [vmem:[#allocation2 + $0x39] sm:$0xff]  ;;  %v4839_v19 = vld [vmem:[#allocation2 + $0x50] sm:$0xff] }
  0x52   : > { %333 = vst.msk [vmem:[#allocation2 + $0xf9] sm:$0xff] %vm225_vm0, %v300_v23  ;;  %v4700_v37 = vld [vmem:[#allocation2 + $0x99] sm:$0xff] }
  0x53   : > { %488 = vrot.lane.b32.xlu1 %v4659_v24, %s4438_s20  ;;  %326 = vst.msk [vmem:[#allocation2 + $0xa9] sm:$0xff] %vm225_vm0, %v293_v25  ;;  %v4702_v38 = vld [vmem:[#allocation2 + $0xb1] sm:$0xff]  ;;  %v4827_v14 = vld [vmem:[#allocation2 + $0x3a] sm:$0xff] }
  0x54   : > { %492 = vrot.lane.b32.xlu0 %v4663_v26, %s4438_s20  ;;  %334 = vst.msk [vmem:[#allocation2 + $0x109] sm:$0xff] %vm225_vm0, %v301_v27  ;;  %v4692_v34 = vld [vmem:[#allocation2 + $0x61] sm:$0xff]  ;;  %v4801_v7 = vld [vmem:[#allocation2 + $0x38] sm:$0xff] }
  0x55   : > { %336 = vst.msk [vmem:[#allocation2 + $0x121] sm:$0xff] %vm225_vm0, %v303_v29  ;;  %v4718_v43 = vld [vmem:[#allocation2 + $0xc1] sm:$0xff]  ;;  %v4810_v9 = vld [vmem:[#allocation2 + $0x32] sm:$0xff] }
  0x56   : > { %329 = vst.msk [vmem:[#allocation2 + $0xc9] sm:$0xff] %vm225_vm0, %v296_v30  ;;  %v4720_v44 = vld [vmem:[#allocation2 + $0xd9] sm:$0xff]  ;;  %v4843_v20 = vld [vmem:[#allocation2 + $0x68] sm:$0xff] }
  0x57   : > { %484 = vrot.lane.b32.xlu2 %v4673_v28, %s4438_s20  ;;  %337 = vst.msk [vmem:[#allocation2 + $0x129] sm:$0xff] %vm225_vm0, %v304_v33  ;;  %v4710_v40 = vld [vmem:[#allocation2 + $0x81] sm:$0xff]  ;;  %v4863_v33 = vld [vmem:[#allocation2 + $0x4a] sm:$0xff]  ;;  %v4921_v0 = vld [vmem:[#allocation2 + $0xd8] sm:$0xff] }
  0x58   : > { %339 = vst.msk [vmem:[#allocation2 + $0x141] sm:$0xff] %vm225_vm0, %v306_v35  ;;  %v4734_v48 = vld [vmem:[#allocation2 + $0xe1] sm:$0xff]  ;;  %v4866_v35 = vld [vmem:[#allocation2 + $0x78] sm:$0xff] }
  0x59   : > { %332 = vst.msk [vmem:[#allocation2 + $0xf1] sm:$0xff] %vm225_vm0, %v299_v36  ;;  %v4736_v49 = vld [vmem:[#allocation2 + $0xf9] sm:$0xff]  ;;  %v4851_v23 = vld [vmem:[#allocation2 + $0x62] sm:$0xff]  ;;  %v4870_v36 = vld [vmem:[#allocation2 + $0x90] sm:$0xff] }
  0x5a   : > { %340 = vst.msk [vmem:[#allocation2 + $0x151] sm:$0xff] %vm225_vm0, %v307_v39  ;;  %v4728_v46 = vld [vmem:[#allocation2 + $0xa9] sm:$0xff]  ;;  %v4822_v13 = vld [vmem:[#allocation2 + $0x60] sm:$0xff] }
  0x5b   : > { %494 = vrot.lane.b32.xlu1 %v4682_v31, %s4438_s20  ;;  %342 = vst.msk [vmem:[#allocation2 + $0x169] sm:$0xff] %vm225_vm0, %v309_v41  ;;  %v4748_v52 = vld [vmem:[#allocation2 + $0x109] sm:$0xff]  ;;  %v4845_v22 = vld [vmem:[#allocation2 + $0x80] sm:$0xff] }
  0x5c   : > { %498 = vrot.lane.b32.xlu0 %v4684_v32, %s4438_s20  ;;  %335 = vst.msk [vmem:[#allocation2 + $0x111] sm:$0xff] %vm225_vm0, %v302_v42  ;;  %v4750_v53 = vld [vmem:[#allocation2 + $0x121] sm:$0xff] }
  0x5d   : > { %343 = vst.msk [vmem:[#allocation2 + $0x171] sm:$0xff] %vm225_vm0, %v310_v45  ;;  %v4742_v50 = vld [vmem:[#allocation2 + $0xc9] sm:$0xff]  ;;  %v4855_v25 = vld [vmem:[#allocation2 + $0x7a] sm:$0xff] }
  0x5e   : > { %338 = vst.msk [vmem:[#allocation2 + $0x139] sm:$0xff] %vm225_vm0, %v305_v47  ;;  %v4760_v55 = vld [vmem:[#allocation2 + $0x129] sm:$0xff]  ;;  %v4882_v42 = vld [vmem:[#allocation2 + $0x9a] sm:$0xff] }
  0x5f   : > { %490 = vrot.lane.b32.xlu2 %v4692_v34, %s4438_s20  ;;  %341 = vst.msk [vmem:[#allocation2 + $0x159] sm:$0xff] %vm225_vm0, %v308_v51  ;;  %v4762_v56 = vld [vmem:[#allocation2 + $0x141] sm:$0xff]  ;;  %v4889_v47 = vld [vmem:[#allocation2 + $0x6a] sm:$0xff]  ;;  %v4891_v51 = vld [vmem:[#allocation2 + $0x98] sm:$0xff] }
  0x60   : > { %v4756_v54 = vld [vmem:[#allocation2 + $0xf1] sm:$0xff]  ;;  %378 = vst.msk [vmem:[#allocation3] sm:$0xff] %vm225_vm0, %v346_v62  ;;  %v4872_v39 = vld [vmem:[#allocation2 + $0xa8] sm:$0xff] }
  0x61   : > { %v4772_v58 = vld [vmem:[#allocation2 + $0x151] sm:$0xff]  ;;  %382 = vst.msk [vmem:[#allocation3 + $0x20] sm:$0xff] %vm225_vm0, %v4782_v63  ;;  %v4878_v41 = vld [vmem:[#allocation2 + $0x82] sm:$0xff] }
  0x62   : > { %6997 = vst [vmem:[#allocation6_spill] sm:$0xff] %v4772_v58  ;;  %v4774_v59 = vld [vmem:[#allocation2 + $0x169] sm:$0xff] }
  0x63   : > { %500 = vrot.lane.b32.xlu1 %v4700_v37, %s4438_s20  ;;  %v4768_v57 = vld [vmem:[#allocation2 + $0x111] sm:$0xff]  ;;  %380 = vst.msk [vmem:[#allocation3 + $0x10] sm:$0xff] %vm225_vm0, %v4797_v5  ;;  %v4897_v62 = vld [vmem:[#allocation2 + $0xc8] sm:$0xff] }
  0x64   : > { %504 = vrot.lane.b32.xlu0 %v4702_v38, %s4438_s20  ;;  %v4790_v1 = vld [vmem:[#allocation2 + $0x171] sm:$0xff]  ;;  %379 = vst.msk [vmem:[#allocation3 + $0x8] sm:$0xff] %vm225_vm0, %v347_v6  ;;  %v4907_v6 = vld [vmem:[#allocation2 + $0xc2] sm:$0xff] }
  0x65   : > { %v4780_v60 = vld [vmem:[#allocation2 + $0x139] sm:$0xff]  ;;  %6998 = vst [vmem:[#allocation7_spill] sm:$0xff] %v4790_v1 }
  0x66   : > { %v4795_v4 = vld [vmem:[#allocation2 + $0x159] sm:$0xff]  ;;  %383 = vst.msk [vmem:[#allocation3 + $0x28] sm:$0xff] %vm225_vm0, %v4801_v7 }
  0x67   : > { %496 = vrot.lane.b32.xlu2 %v4710_v40, %s4438_s20  ;;  %6999 = vst [vmem:[#allocation8_spill] sm:$0xff] %v4808_v8 }
  0x68   : > { %7000 = vst [vmem:[#allocation9_spill] sm:$0xff] %v4810_v9 }
  0x69   : > { %381 = vst.msk [vmem:[#allocation3 + $0x18] sm:$0xff] %vm225_vm0, %v4816_v11 }
  0x6a   : > { %384 = vst.msk [vmem:[#allocation3 + $0x30] sm:$0xff] %vm225_vm0, %v4820_v12 }
  0x6b   : > { %506 = vrot.lane.b32.xlu1 %v4718_v43, %s4438_s20  ;;  %7001 = vst [vmem:[#allocation10_spill] sm:$0xff] %v4827_v14 }
  0x6c   : > { %510 = vrot.lane.b32.xlu0 %v4720_v44, %s4438_s20  ;;  %386 = vst.msk [vmem:[#allocation3 + $0x40] sm:$0xff] %vm225_vm0, %v4822_v13 }
  0x6d   : > { %7002 = vst [vmem:[#allocation11_spill] sm:$0xff] %v4831_v16 }
  0x6e   : > { %7003 = vst [vmem:[#allocation12_spill] sm:$0xff] %v4837_v18 }
  0x6f   : > { %502 = vrot.lane.b32.xlu2 %v4728_v46, %s4438_s20  ;;  %385 = vst.msk [vmem:[#allocation3 + $0x38] sm:$0xff] %vm225_vm0, %v4839_v19 }
  0x70   : > { %387 = vst.msk [vmem:[#allocation3 + $0x48] sm:$0xff] %vm225_vm0, %v4843_v20 }
  0x71   : > { %7004 = vst [vmem:[#allocation13_spill] sm:$0xff] %v4851_v23 }
  0x72   : > { %389 = vst.msk [vmem:[#allocation3 + $0x58] sm:$0xff] %vm225_vm0, %v4845_v22 }
  0x73   : > { %512 = vrot.lane.b32.xlu1 %v4734_v48, %s4438_s20  ;;  %7005 = vst [vmem:[#allocation14_spill] sm:$0xff] %v4855_v25 }
  0x74   : > { %516 = vrot.lane.b32.xlu0 %v4736_v49, %s4438_s20  ;;  %7006 = vst [vmem:[#allocation15_spill] sm:$0xff] %v4863_v33 }
  0x75   : > { %388 = vst.msk [vmem:[#allocation3 + $0x50] sm:$0xff] %vm225_vm0, %v4866_v35 }
  0x76   : > { %390 = vst.msk [vmem:[#allocation3 + $0x60] sm:$0xff] %vm225_vm0, %v4870_v36 }
  0x77   : > { %508 = vrot.lane.b32.xlu2 %v4742_v50, %s4438_s20  ;;  %7007 = vst [vmem:[#allocation16_spill] sm:$0xff] %v4878_v41 }
  0x78   : > { %392 = vst.msk [vmem:[#allocation3 + $0x70] sm:$0xff] %vm225_vm0, %v4872_v39 }
  0x79   : > { %7008 = vst [vmem:[#allocation17_spill] sm:$0xff] %v4882_v42 }
  0x7a   : > { %7009 = vst [vmem:[#allocation18_spill] sm:$0xff] %v4889_v47 }
  0x7b   : > { %518 = vrot.lane.b32.xlu1 %v4748_v52, %s4438_s20  ;;  %391 = vst.msk [vmem:[#allocation3 + $0x68] sm:$0xff] %vm225_vm0, %v4891_v51 }
  0x7c   : > { %522 = vrot.lane.b32.xlu0 %v4750_v53, %s4438_s20  ;;  %395 = vst.msk [vmem:[#allocation3 + $0x88] sm:$0xff] %vm225_vm0, %v4897_v62 }
  0x7d   : > { %7011 = vst [vmem:[#allocation20_spill] sm:$0xff] %v4907_v6 }
  0x7e   : > { %396 = vst.msk [vmem:[#allocation3 + $0x90] sm:$0xff] %vm225_vm0, %v4921_v0 }
  0x7f   : > { %514 = vrot.lane.b32.xlu2 %v4756_v54, %s4438_s20 }
  0x83   : > { %524 = vrot.lane.b32.xlu1 %v4760_v55, %s4438_s20 }
  0x84   : > { %528 = vrot.lane.b32.xlu0 %v4762_v56, %s4438_s20 }
  0x87   : > { %520 = vrot.lane.b32.xlu2 %v4768_v57, %s4438_s20  ;;  %v475_v61 = vpop.permute.xlu0 %474 }
  0x88   : > { %571 = vst.msk [vmem:[#allocation3] sm:$0xff] %vm570_vm2, %v475_v61  ;;  %v4895_v61 = vld [vmem:[#allocation2 + $0xb0] sm:$0xff] }
  0x89   : > { %393 = vst.msk [vmem:[#allocation3 + $0x78] sm:$0xff] %vm225_vm0, %v4895_v61 }
  0x8b   : > { %530 = vrot.lane.b32.xlu1 %v4772_v58, %s4438_s20 }
  0x8c   : > { %534 = vrot.lane.b32.xlu0 %v4774_v59, %s4438_s20 }
  0x8f   : > { %526 = vrot.lane.b32.xlu2 %v4780_v60, %s4438_s20 }
  0x93   : > { %536 = vrot.lane.b32.xlu1 %v4790_v1, %s4438_s20 }
  0x94   : > { %669 = vrot.lane.b32.xlu0 %v604_v2, %s4439_s25  ;;  %v4903_v2 = vld [vmem:[#allocation2 + $0xaa] sm:$0xff] }
  0x95   : > { %7010 = vst [vmem:[#allocation19_spill] sm:$0xff] %v4903_v2 }
  0x97   : > { %532 = vrot.lane.b32.xlu2 %v4795_v4, %s4438_s20 }
  0x9b   : > { %671 = vrot.lane.b32.xlu1 %v4808_v8, %s4439_s25 }
  0x9c   : > { %675 = vrot.lane.b32.xlu0 %v4810_v9, %s4439_s25 }
  0x9f   : > { %667 = vrot.lane.b32.xlu2 %v603_v10, %s4439_s25 }
  0xa3   : > { %677 = vrot.lane.b32.xlu1 %v4827_v14, %s4439_s25 }
  0xa4   : > { %681 = vrot.lane.b32.xlu0 %v4831_v16, %s4439_s25 }
  0xa7   : > { %673 = vrot.lane.b32.xlu2 %v4837_v18, %s4439_s25  ;;  %v5029_v18 = vld [vmem:[#allocation2 + $0x168] sm:$0xff] }
  0xa8   : > { %408 = vst.msk [vmem:[#allocation3 + $0xf0] sm:$0xff] %vm225_vm0, %v5029_v18 }
  0xa9   : > { %v483_v27 = vpop.permute.xlu2 %482 }
  0xaa   : > { %575 = vst.msk [vmem:[#allocation3 + $0x20] sm:$0xff] %vm570_vm2, %v483_v27  ;;  %v479_v29 = vpop.permute.xlu1 %478  ;;  %v4914_v27 = vld [vmem:[#allocation2 + $0x92] sm:$0xff] }
  0xab   : > { %683 = vrot.lane.b32.xlu1 %v4851_v23, %s4439_s25  ;;  %573 = vst.msk [vmem:[#allocation3 + $0x10] sm:$0xff] %vm570_vm2, %v479_v29  ;;  %v477_v30 = vpop.permute.xlu0 %476  ;;  %v4916_v29 = vld [vmem:[#allocation2 + $0xc0] sm:$0xff] }
  0xac   : > { %687 = vrot.lane.b32.xlu0 %v4855_v25, %s4439_s25  ;;  %572 = vst.msk [vmem:[#allocation3 + $0x8] sm:$0xff] %vm570_vm2, %v477_v30 }
  0xad   : > { %7012 = vst [vmem:[#allocation21_spill] sm:$0xff] %v4914_v27 }
  0xae   : > { %394 = vst.msk [vmem:[#allocation3 + $0x80] sm:$0xff] %vm225_vm0, %v4916_v29 }
  0xaf   : > { %679 = vrot.lane.b32.xlu2 %v4863_v33, %s4439_s25  ;;  %v5002_v33 = vld [vmem:[#allocation2 + $0x140] sm:$0xff] }
  0xb0   : > { %405 = vst.msk [vmem:[#allocation3 + $0xd8] sm:$0xff] %vm225_vm0, %v5002_v33 }
  0xb1   : > { %v485_v45 = vpop.permute.xlu2 %484 }
  0xb2   : > { %576 = vst.msk [vmem:[#allocation3 + $0x28] sm:$0xff] %vm570_vm2, %v485_v45 }
  0xb3   : > { %689 = vrot.lane.b32.xlu1 %v4878_v41, %s4439_s25 }
  0xb4   : > { %693 = vrot.lane.b32.xlu0 %v4882_v42, %s4439_s25 }
  0xb7   : > { %685 = vrot.lane.b32.xlu2 %v4889_v47, %s4439_s25  ;;  %v4975_v47 = vld [vmem:[#allocation2 + $0x120] sm:$0xff] }
  0xb8   : > { %402 = vst.msk [vmem:[#allocation3 + $0xc0] sm:$0xff] %vm225_vm0, %v4975_v47 }
  0xb9   : > { %v491_v10 = vpop.permute.xlu2 %490 }
  0xba   : > { %579 = vst.msk [vmem:[#allocation3 + $0x40] sm:$0xff] %vm570_vm2, %v491_v10  ;;  %v4923_v10 = vld [vmem:[#allocation2 + $0xf0] sm:$0xff] }
  0xbb   : > { %695 = vrot.lane.b32.xlu1 %v4903_v2, %s4439_s25  ;;  %v4928_v2 = vld [vmem:[#allocation2 + $0xca] sm:$0xff]  ;;  %398 = vst.msk [vmem:[#allocation3 + $0xa0] sm:$0xff] %vm225_vm0, %v4923_v10 }
  0xbc   : > { %699 = vrot.lane.b32.xlu0 %v4907_v6, %s4439_s25  ;;  %7013 = vst [vmem:[#allocation22_spill] sm:$0xff] %v4928_v2  ;;  %v4932_v6 = vld [vmem:[#allocation2 + $0xe2] sm:$0xff] }
  0xbd   : > { %v481_v30 = vpop.permute.xlu1 %480  ;;  %7014 = vst [vmem:[#allocation23_spill] sm:$0xff] %v4932_v6 }
  0xbe   : > { %574 = vst.msk [vmem:[#allocation3 + $0x18] sm:$0xff] %vm570_vm2, %v481_v30  ;;  %v487_v45 = vpop.permute.xlu0 %486  ;;  %v4941_v30 = vld [vmem:[#allocation2 + $0xb2] sm:$0xff] }
  0xbf   : > { %577 = vst.msk [vmem:[#allocation3 + $0x30] sm:$0xff] %vm570_vm2, %v487_v45  ;;  %691 = vrot.lane.b32.xlu2 %v4914_v27, %s4439_s25  ;;  %v4943_v45 = vld [vmem:[#allocation2 + $0xe0] sm:$0xff]  ;;  %v4948_v27 = vld [vmem:[#allocation2 + $0xf8] sm:$0xff] }
  0xc0   : > { %7015 = vst [vmem:[#allocation24_spill] sm:$0xff] %v4941_v30 }
  0xc1   : > { %v497_v41 = vpop.permute.xlu2 %496  ;;  %397 = vst.msk [vmem:[#allocation3 + $0x98] sm:$0xff] %vm225_vm0, %v4943_v45 }
  0xc2   : > { %582 = vst.msk [vmem:[#allocation3 + $0x58] sm:$0xff] %vm570_vm2, %v497_v41  ;;  %v4950_v41 = vld [vmem:[#allocation2 + $0x110] sm:$0xff] }
  0xc3   : > { %701 = vrot.lane.b32.xlu1 %v4928_v2, %s4439_s25  ;;  %v4955_v2 = vld [vmem:[#allocation2 + $0xf2] sm:$0xff]  ;;  %399 = vst.msk [vmem:[#allocation3 + $0xa8] sm:$0xff] %vm225_vm0, %v4948_v27 }
  0xc4   : > { %705 = vrot.lane.b32.xlu0 %v4932_v6, %s4439_s25  ;;  %7016 = vst [vmem:[#allocation25_spill] sm:$0xff] %v4955_v2  ;;  %v4959_v6 = vld [vmem:[#allocation2 + $0x10a] sm:$0xff] }
  0xc5   : > { %v489_v42 = vpop.permute.xlu1 %488  ;;  %7017 = vst [vmem:[#allocation26_spill] sm:$0xff] %v4959_v6 }
  0xc6   : > { %578 = vst.msk [vmem:[#allocation3 + $0x38] sm:$0xff] %vm570_vm2, %v489_v42  ;;  %v493_v23 = vpop.permute.xlu0 %492  ;;  %v4970_v42 = vld [vmem:[#allocation2 + $0x108] sm:$0xff] }
  0xc7   : > { %580 = vst.msk [vmem:[#allocation3 + $0x48] sm:$0xff] %vm570_vm2, %v493_v23  ;;  %697 = vrot.lane.b32.xlu2 %v4941_v30, %s4439_s25  ;;  %v4968_v23 = vld [vmem:[#allocation2 + $0xda] sm:$0xff] }
  0xc8   : > { %401 = vst.msk [vmem:[#allocation3 + $0xb8] sm:$0xff] %vm225_vm0, %v4950_v41 }
  0xc9   : > { %v503_v25 = vpop.permute.xlu2 %502  ;;  %7018 = vst [vmem:[#allocation27_spill] sm:$0xff] %v4968_v23 }
  0xca   : > { %585 = vst.msk [vmem:[#allocation3 + $0x70] sm:$0xff] %vm570_vm2, %v503_v25  ;;  %v4977_v25 = vld [vmem:[#allocation2 + $0x138] sm:$0xff] }
  0xcb   : > { %707 = vrot.lane.b32.xlu1 %v4955_v2, %s4439_s25  ;;  %400 = vst.msk [vmem:[#allocation3 + $0xb0] sm:$0xff] %vm225_vm0, %v4970_v42  ;;  %v4982_v2 = vld [vmem:[#allocation2 + $0x112] sm:$0xff] }
  0xcc   : > { %711 = vrot.lane.b32.xlu0 %v4959_v6, %s4439_s25  ;;  %7019 = vst [vmem:[#allocation28_spill] sm:$0xff] %v4982_v2  ;;  %v4986_v6 = vld [vmem:[#allocation2 + $0x12a] sm:$0xff] }
  0xcd   : > { %v495_v30 = vpop.permute.xlu1 %494  ;;  %7020 = vst [vmem:[#allocation29_spill] sm:$0xff] %v4986_v6 }
  0xce   : > { %581 = vst.msk [vmem:[#allocation3 + $0x50] sm:$0xff] %vm570_vm2, %v495_v30  ;;  %v499_v14 = vpop.permute.xlu0 %498  ;;  %v4997_v30 = vld [vmem:[#allocation2 + $0x128] sm:$0xff] }
  0xcf   : > { %583 = vst.msk [vmem:[#allocation3 + $0x60] sm:$0xff] %vm570_vm2, %v499_v14  ;;  %703 = vrot.lane.b32.xlu2 %v4968_v23, %s4439_s25  ;;  %v4995_v14 = vld [vmem:[#allocation2 + $0xfa] sm:$0xff] }
  0xd0   : > { %404 = vst.msk [vmem:[#allocation3 + $0xd0] sm:$0xff] %vm225_vm0, %v4977_v25 }
  0xd1   : > { %v509_v16 = vpop.permute.xlu2 %508  ;;  %7021 = vst [vmem:[#allocation30_spill] sm:$0xff] %v4995_v14 }
  0xd2   : > { %588 = vst.msk [vmem:[#allocation3 + $0x88] sm:$0xff] %vm570_vm2, %v509_v16  ;;  %v5004_v16 = vld [vmem:[#allocation2 + $0x158] sm:$0xff] }
  0xd3   : > { %713 = vrot.lane.b32.xlu1 %v4982_v2, %s4439_s25  ;;  %403 = vst.msk [vmem:[#allocation3 + $0xc8] sm:$0xff] %vm225_vm0, %v4997_v30  ;;  %v5009_v2 = vld [vmem:[#allocation2 + $0x13a] sm:$0xff] }
  0xd4   : > { %717 = vrot.lane.b32.xlu0 %v4986_v6, %s4439_s25  ;;  %7022 = vst [vmem:[#allocation31_spill] sm:$0xff] %v5009_v2  ;;  %v5013_v6 = vld [vmem:[#allocation2 + $0x152] sm:$0xff] }
  0xd5   : > { %v501_v23 = vpop.permute.xlu1 %500  ;;  %7023 = vst [vmem:[#allocation32_spill] sm:$0xff] %v5013_v6 }
  0xd6   : > { %584 = vst.msk [vmem:[#allocation3 + $0x68] sm:$0xff] %vm570_vm2, %v501_v23  ;;  %v505_v8 = vpop.permute.xlu0 %504  ;;  %v5024_v23 = vld [vmem:[#allocation2 + $0x150] sm:$0xff] }
  0xd7   : > { %586 = vst.msk [vmem:[#allocation3 + $0x78] sm:$0xff] %vm570_vm2, %v505_v8  ;;  %709 = vrot.lane.b32.xlu2 %v4995_v14, %s4439_s25  ;;  %v5022_v8 = vld [vmem:[#allocation2 + $0x122] sm:$0xff] }
  0xd8   : > { %407 = vst.msk [vmem:[#allocation3 + $0xe8] sm:$0xff] %vm225_vm0, %v5004_v16 }
  0xd9   : > { %v515_v9 = vpop.permute.xlu2 %514  ;;  %7024 = vst [vmem:[#allocation33_spill] sm:$0xff] %v5022_v8 }
  0xda   : > { %591 = vst.msk [vmem:[#allocation3 + $0xa0] sm:$0xff] %vm570_vm2, %v515_v9  ;;  %v5034_v9 = vld [vmem:[#allocation2 + $0x15a] sm:$0xff] }
  0xdb   : > { %719 = vrot.lane.b32.xlu1 %v5009_v2, %s4439_s25  ;;  %406 = vst.msk [vmem:[#allocation3 + $0xe0] sm:$0xff] %vm225_vm0, %v5024_v23  ;;  %v5038_v2 = vld [vmem:[#allocation2 + $0x172] sm:$0xff] }
  0xdc   : > { %723 = vrot.lane.b32.xlu0 %v5013_v6, %s4439_s25  ;;  %7025 = vst [vmem:[#allocation34_spill] sm:$0xff] %v5034_v9 }
  0xdd   : > { %v507_v14 = vpop.permute.xlu1 %506  ;;  %7026 = vst [vmem:[#allocation35_spill] sm:$0xff] %v5038_v2 }
  0xde   : > { %587 = vst.msk [vmem:[#allocation3 + $0x80] sm:$0xff] %vm570_vm2, %v507_v14  ;;  %v511_v1 = vpop.permute.xlu0 %510  ;;  %v5047_v14 = vld [vmem:[#allocation2 + $0x170] sm:$0xff] }
  0xdf   : > { %589 = vst.msk [vmem:[#allocation3 + $0x90] sm:$0xff] %vm570_vm2, %v511_v1  ;;  %715 = vrot.lane.b32.xlu2 %v5022_v8, %s4439_s25  ;;  %v5045_v1 = vld [vmem:[#allocation2 + $0x142] sm:$0xff] }
  0xe0   : > { %409 = vst.msk [vmem:[#allocation3 + $0xf8] sm:$0xff] %vm225_vm0, %v5047_v14 }
  0xe1   : > { %v521_v6 = vpop.permute.xlu2 %520 }
  0xe2   : > { %594 = vst.msk [vmem:[#allocation3 + $0xb8] sm:$0xff] %vm570_vm2, %v521_v6 }
  0xe3   : > { %725 = vrot.lane.b32.xlu1 %v5034_v9, %s4439_s25  ;;  %v5060_v9 = vld [vmem:[#allocation2 + $0x16a] sm:$0xff] }
  0xe4   : > { %729 = vrot.lane.b32.xlu0 %v5038_v2, %s4439_s25 }
  0xe5   : > { %v513_v8 = vpop.permute.xlu1 %512 }
  0xe6   : > { %590 = vst.msk [vmem:[#allocation3 + $0x98] sm:$0xff] %vm570_vm2, %v513_v8  ;;  %v517_v58 = vpop.permute.xlu0 %516 }
  0xe7   : > { %592 = vst.msk [vmem:[#allocation3 + $0xa8] sm:$0xff] %vm570_vm2, %v517_v58  ;;  %721 = vrot.lane.b32.xlu2 %v5045_v1, %s4439_s25 }
  0xe9   : > { %v527_v6 = vpop.permute.xlu2 %526 }
  0xea   : > { %597 = vst.msk [vmem:[#allocation3 + $0xd0] sm:$0xff] %vm570_vm2, %v527_v6 }
  0xeb   : > { %860 = vrot.lane.b32.xlu1 %v4797_v5, %s4440_s26 }
  0xec   : > { %864 = vrot.lane.b32.xlu0 %v4782_v63, %s4440_s26 }
  0xed   : > { %v519_v2 = vpop.permute.xlu1 %518 }
  0xee   : > { %593 = vst.msk [vmem:[#allocation3 + $0xb0] sm:$0xff] %vm570_vm2, %v519_v2  ;;  %v523_v8 = vpop.permute.xlu0 %522 }
  0xef   : > { %595 = vst.msk [vmem:[#allocation3 + $0xc0] sm:$0xff] %vm570_vm2, %v523_v8  ;;  %727 = vrot.lane.b32.xlu2 %v5060_v9, %s4439_s25 }
  0xf1   : > { %v533_v58 = vpop.permute.xlu2 %532 }
  0xf2   : > { %600 = vst.msk [vmem:[#allocation3 + $0xe8] sm:$0xff] %vm570_vm2, %v533_v58 }
  0xf3   : > { %866 = vrot.lane.b32.xlu1 %v4801_v7, %s4440_s26 }
  0xf4   : > { %870 = vrot.lane.b32.xlu0 %v4839_v19, %s4440_s26 }
  0xf5   : > { %v525_v63 = vpop.permute.xlu1 %524 }
  0xf6   : > { %596 = vst.msk [vmem:[#allocation3 + $0xc8] sm:$0xff] %vm570_vm2, %v525_v63  ;;  %v529_v5 = vpop.permute.xlu0 %528 }
  0xf7   : > { %598 = vst.msk [vmem:[#allocation3 + $0xd8] sm:$0xff] %vm570_vm2, %v529_v5  ;;  %862 = vrot.lane.b32.xlu2 %v4816_v11, %s4440_s26 }
  0xf9   : > { %v668_v2 = vpop.permute.xlu2 %667 }
  0xfa   : > { %764 = vst.msk [vmem:[#allocation3] sm:$0xff] %vm763_vm3, %v668_v2  ;;  %v311_v2 = vld [vmem:[%s4563_s24 + $0xf0] sm:$0xff] }
  0xfb   : > { %872 = vrot.lane.b32.xlu1 %v4822_v13, %s4440_s26  ;;  %344 = vst.msk [vmem:[#allocation2 + $0x181] sm:$0xff] %vm225_vm0, %v311_v2 }
  0xfc   : > { %876 = vrot.lane.b32.xlu0 %v4866_v35, %s4440_s26 }
  0xfd   : > { %v531_v7 = vpop.permute.xlu1 %530 }
  0xfe   : > { %599 = vst.msk [vmem:[#allocation3 + $0xe0] sm:$0xff] %vm570_vm2, %v531_v7  ;;  %v535_v6 = vpop.permute.xlu0 %534 }
  0xff   : > { %601 = vst.msk [vmem:[#allocation3 + $0xf0] sm:$0xff] %vm570_vm2, %v535_v6  ;;  %868 = vrot.lane.b32.xlu2 %v4820_v12, %s4440_s26 }
 0x101   : > { %v674_v11 = vpop.permute.xlu2 %673 }
 0x102   : > { %767 = vst.msk [vmem:[#allocation3 + $0x18] sm:$0xff] %vm763_vm3, %v674_v11 }
 0x103   : > { %878 = vrot.lane.b32.xlu1 %v4845_v22, %s4440_s26 }
 0x104   : > { %882 = vrot.lane.b32.xlu0 %v4891_v51, %s4440_s26 }
 0x105   : > { %v537_v13 = vpop.permute.xlu1 %536 }
 0x106   : > { %602 = vst.msk [vmem:[#allocation3 + $0xf8] sm:$0xff] %vm570_vm2, %v537_v13  ;;  %v670_v8 = vpop.permute.xlu0 %669  ;;  %vm3327_vm2 = vcmask 392512  }
 0x107   : > { %765 = vst.msk [vmem:[#allocation3 + $0x8] sm:$0xff] %vm763_vm3, %v670_v8  ;;  %874 = vrot.lane.b32.xlu2 %v4843_v20, %s4440_s26 }
 0x109   : > { %v680_v58 = vpop.permute.xlu2 %679 }
 0x10a   : > { %770 = vst.msk [vmem:[#allocation3 + $0x30] sm:$0xff] %vm763_vm3, %v680_v58 }
 0x10b   : > { %884 = vrot.lane.b32.xlu1 %v4872_v39, %s4440_s26 }
 0x10c   : > { %888 = vrot.lane.b32.xlu0 %v4916_v29, %s4440_s26 }
 0x10d   : > { %v672_v22 = vpop.permute.xlu1 %671 }
 0x10e   : > { %766 = vst.msk [vmem:[#allocation3 + $0x10] sm:$0xff] %vm763_vm3, %v672_v22  ;;  %v676_v63 = vpop.permute.xlu0 %675 }
 0x10f   : > { %768 = vst.msk [vmem:[#allocation3 + $0x20] sm:$0xff] %vm763_vm3, %v676_v63  ;;  %880 = vrot.lane.b32.xlu2 %v4870_v36, %s4440_s26 }
 0x111   : > { %v686_v5 = vpop.permute.xlu2 %685 }
 0x112   : > { %773 = vst.msk [vmem:[#allocation3 + $0x48] sm:$0xff] %vm763_vm3, %v686_v5 }
 0x113   : > { %890 = vrot.lane.b32.xlu1 %v4897_v62, %s4440_s26 }
 0x114   : > { %894 = vrot.lane.b32.xlu0 %v4943_v45, %s4440_s26 }
 0x115   : > { %v678_v39 = vpop.permute.xlu1 %677 }
 0x116   : > { %769 = vst.msk [vmem:[#allocation3 + $0x28] sm:$0xff] %vm763_vm3, %v678_v39  ;;  %v682_v7 = vpop.permute.xlu0 %681 }
 0x117   : > { %771 = vst.msk [vmem:[#allocation3 + $0x38] sm:$0xff] %vm763_vm3, %v682_v7  ;;  %886 = vrot.lane.b32.xlu2 %v4895_v61, %s4440_s26  ;;  %v5151_v7 = vld [vmem:[#allocation2 + $0x180] sm:$0xff] }
 0x119   : > { %v692_v6 = vpop.permute.xlu2 %691 }
 0x11a   : > { %776 = vst.msk [vmem:[#allocation3 + $0x60] sm:$0xff] %vm763_vm3, %v692_v6 }
 0x11b   : > { %896 = vrot.lane.b32.xlu1 %v4923_v10, %s4440_s26  ;;  %v312_v10 = vld [vmem:[%s4563_s24 + $0xf8] sm:$0xff]  ;;  %s4448_s24 = smov 56  }
 0x11c   : > { %900 = vrot.lane.b32.xlu0 %v4970_v42, %s4440_s26  ;;  %345 = vst.msk [vmem:[#allocation2 + $0x189] sm:$0xff] %vm225_vm0, %v312_v10  ;;  %vm2941_vm0 = vcmask 261312  }
 0x11d   : > { %v684_v62 = vpop.permute.xlu1 %683 }
 0x11e   : > { %772 = vst.msk [vmem:[#allocation3 + $0x40] sm:$0xff] %vm763_vm3, %v684_v62  ;;  %v688_v11 = vpop.permute.xlu0 %687 }
 0x11f   : > { %774 = vst.msk [vmem:[#allocation3 + $0x50] sm:$0xff] %vm763_vm3, %v688_v11  ;;  %892 = vrot.lane.b32.xlu2 %v4921_v0, %s4440_s26 }
 0x121   : > { %v698_v13 = vpop.permute.xlu2 %697 }
 0x122   : > { %779 = vst.msk [vmem:[#allocation3 + $0x78] sm:$0xff] %vm763_vm3, %v698_v13 }
 0x123   : > { %902 = vrot.lane.b32.xlu1 %v4950_v41, %s4440_s26  ;;  %v5167_v10 = vld [vmem:[#allocation2 + $0x188] sm:$0xff] }
 0x124   : > { %906 = vrot.lane.b32.xlu0 %v4997_v30, %s4440_s26 }
 0x125   : > { %v690_v8 = vpop.permute.xlu1 %689 }
 0x126   : > { %775 = vst.msk [vmem:[#allocation3 + $0x58] sm:$0xff] %vm763_vm3, %v690_v8  ;;  %v694_v58 = vpop.permute.xlu0 %693 }
 0x127   : > { %777 = vst.msk [vmem:[#allocation3 + $0x68] sm:$0xff] %vm763_vm3, %v694_v58  ;;  %898 = vrot.lane.b32.xlu2 %v4948_v27, %s4440_s26 }
 0x129   : > { %v704_v22 = vpop.permute.xlu2 %703 }
 0x12a   : > { %782 = vst.msk [vmem:[#allocation3 + $0x90] sm:$0xff] %vm763_vm3, %v704_v22 }
 0x12b   : > { %908 = vrot.lane.b32.xlu1 %v4977_v25, %s4440_s26 }
 0x12c   : > { %912 = vrot.lane.b32.xlu0 %v5024_v23, %s4440_s26 }
 0x12d   : > { %v696_v41 = vpop.permute.xlu1 %695 }
 0x12e   : > { %778 = vst.msk [vmem:[#allocation3 + $0x70] sm:$0xff] %vm763_vm3, %v696_v41  ;;  %v700_v63 = vpop.permute.xlu0 %699 }
 0x12f   : > { %780 = vst.msk [vmem:[#allocation3 + $0x80] sm:$0xff] %vm763_vm3, %v700_v63  ;;  %904 = vrot.lane.b32.xlu2 %v4975_v47, %s4440_s26  ;;  %v7027_v63 = vld [vmem:[#allocation6_spill] sm:$0xff] }
 0x131   : > { %v710_v5 = vpop.permute.xlu2 %709 }
 0x132   : > { %785 = vst.msk [vmem:[#allocation3 + $0xa8] sm:$0xff] %vm763_vm3, %v710_v5 }
 0x133   : > { %914 = vrot.lane.b32.xlu1 %v5004_v16, %s4440_s26 }
 0x134   : > { %918 = vrot.lane.b32.xlu0 %v5047_v14, %s4440_s26 }
 0x135   : > { %v702_v2 = vpop.permute.xlu1 %701 }
 0x136   : > { %781 = vst.msk [vmem:[#allocation3 + $0x88] sm:$0xff] %vm763_vm3, %v702_v2  ;;  %v706_v39 = vpop.permute.xlu0 %705 }
 0x137   : > { %783 = vst.msk [vmem:[#allocation3 + $0x98] sm:$0xff] %vm763_vm3, %v706_v39  ;;  %910 = vrot.lane.b32.xlu2 %v5002_v33, %s4440_s26 }
 0x139   : > { %v716_v6 = vpop.permute.xlu2 %715 }
 0x13a   : > { %788 = vst.msk [vmem:[#allocation3 + $0xc0] sm:$0xff] %vm763_vm3, %v716_v6  ;;  %v7029_v6 = vld [vmem:[#allocation7_spill] sm:$0xff] }
 0x13b   : > { %920 = vrot.lane.b32.xlu1 %v5151_v7, %s4440_s26 }
 0x13c   : > { %1053 = vrot.lane.b32.xlu0 %v4589_v3, %s4441_s27 }
 0x13d   : > { %v708_v62 = vpop.permute.xlu1 %707 }
 0x13e   : > { %784 = vst.msk [vmem:[#allocation3 + $0xa0] sm:$0xff] %vm763_vm3, %v708_v62  ;;  %v712_v11 = vpop.permute.xlu0 %711 }
 0x13f   : > { %786 = vst.msk [vmem:[#allocation3 + $0xb0] sm:$0xff] %vm763_vm3, %v712_v11  ;;  %916 = vrot.lane.b32.xlu2 %v5029_v18, %s4440_s26  ;;  %v7030_v11 = vld [vmem:[#allocation9_spill] sm:$0xff] }
 0x141   : > { %v722_v13 = vpop.permute.xlu2 %721 }
 0x142   : > { %791 = vst.msk [vmem:[#allocation3 + $0xd8] sm:$0xff] %vm763_vm3, %v722_v13  ;;  %v7031_v13 = vld [vmem:[#allocation15_spill] sm:$0xff] }
 0x143   : > { %1055 = vrot.lane.b32.xlu1 %v4635_v15, %s4441_s27 }
 0x144   : > { %1059 = vrot.lane.b32.xlu0 %v4673_v28, %s4441_s27 }
 0x145   : > { %v714_v3 = vpop.permute.xlu1 %713 }
 0x146   : > { %787 = vst.msk [vmem:[#allocation3 + $0xb8] sm:$0xff] %vm763_vm3, %v714_v3  ;;  %v718_v8 = vpop.permute.xlu0 %717 }
 0x147   : > { %789 = vst.msk [vmem:[#allocation3 + $0xc8] sm:$0xff] %vm763_vm3, %v718_v8  ;;  %922 = vrot.lane.b32.xlu2 %v5167_v10, %s4440_s26 }
 0x149   : > { %v728_v58 = vpop.permute.xlu2 %727 }
 0x14a   : > { %794 = vst.msk [vmem:[#allocation3 + $0xf0] sm:$0xff] %vm763_vm3, %v728_v58  ;;  %v7032_v58 = vld [vmem:[#allocation8_spill] sm:$0xff] }
 0x14b   : > { %1061 = vrot.lane.b32.xlu1 %v4641_v17, %s4441_s27 }
 0x14c   : > { %1065 = vrot.lane.b32.xlu0 %v4692_v34, %s4441_s27 }
 0x14d   : > { %v720_v15 = vpop.permute.xlu1 %719 }
 0x14e   : > { %790 = vst.msk [vmem:[#allocation3 + $0xd0] sm:$0xff] %vm763_vm3, %v720_v15  ;;  %v724_v28 = vpop.permute.xlu0 %723 }
 0x14f   : > { %792 = vst.msk [vmem:[#allocation3 + $0xe0] sm:$0xff] %vm763_vm3, %v724_v28  ;;  %1057 = vrot.lane.b32.xlu2 %v4651_v21, %s4441_s27  ;;  %v7033_v28 = vld [vmem:[#allocation11_spill] sm:$0xff] }
 0x151   : > { %v863_v22 = vpop.permute.xlu2 %862 }
 0x152   : > { %958 = vst.msk [vmem:[#allocation3 + $0x8] sm:$0xff] %vm956_vm4, %v863_v22  ;;  %v7034_v22 = vld [vmem:[#allocation18_spill] sm:$0xff] }
 0x153   : > { %1067 = vrot.lane.b32.xlu1 %v4663_v26, %s4441_s27 }
 0x154   : > { %1071 = vrot.lane.b32.xlu0 %v4710_v40, %s4441_s27 }
 0x155   : > { %v726_v17 = vpop.permute.xlu1 %725 }
 0x156   : > { %793 = vst.msk [vmem:[#allocation3 + $0xe8] sm:$0xff] %vm763_vm3, %v726_v17  ;;  %v730_v34 = vpop.permute.xlu0 %729 }
 0x157   : > { %795 = vst.msk [vmem:[#allocation3 + $0xf8] sm:$0xff] %vm763_vm3, %v730_v34  ;;  %1063 = vrot.lane.b32.xlu2 %v4659_v24, %s4441_s27  ;;  %vm3521_vm3 = vcmask 458112  }
 0x159   : > { %v869_v21 = vpop.permute.xlu2 %868 }
 0x15a   : > { %961 = vst.msk [vmem:[#allocation3 + $0x20] sm:$0xff] %vm956_vm4, %v869_v21  ;;  %v7035_v21 = vld [vmem:[#allocation10_spill] sm:$0xff] }
 0x15b   : > { %1073 = vrot.lane.b32.xlu1 %v4684_v32, %s4441_s27 }
 0x15c   : > { %1077 = vrot.lane.b32.xlu0 %v4728_v46, %s4441_s27 }
 0x15d   : > { %v861_v26 = vpop.permute.xlu1 %860 }
 0x15e   : > { %957 = vst.msk [vmem:[#allocation3] sm:$0xff] %vm956_vm4, %v861_v26  ;;  %v865_v40 = vpop.permute.xlu0 %864 }
 0x15f   : > { %959 = vst.msk [vmem:[#allocation3 + $0x10] sm:$0xff] %vm956_vm4, %v865_v40  ;;  %1069 = vrot.lane.b32.xlu2 %v4682_v31, %s4441_s27  ;;  %v7036_v40 = vld [vmem:[#allocation14_spill] sm:$0xff] }
 0x161   : > { %v875_v41 = vpop.permute.xlu2 %874 }
 0x162   : > { %964 = vst.msk [vmem:[#allocation3 + $0x38] sm:$0xff] %vm956_vm4, %v875_v41  ;;  %v7037_v41 = vld [vmem:[#allocation21_spill] sm:$0xff] }
 0x163   : > { %1079 = vrot.lane.b32.xlu1 %v4702_v38, %s4441_s27 }
 0x164   : > { %1083 = vrot.lane.b32.xlu0 %v4742_v50, %s4441_s27 }
 0x165   : > { %v867_v24 = vpop.permute.xlu1 %866 }
 0x166   : > { %960 = vst.msk [vmem:[#allocation3 + $0x18] sm:$0xff] %vm956_vm4, %v867_v24  ;;  %v871_v32 = vpop.permute.xlu0 %870 }
 0x167   : > { %962 = vst.msk [vmem:[#allocation3 + $0x28] sm:$0xff] %vm956_vm4, %v871_v32  ;;  %1075 = vrot.lane.b32.xlu2 %v4700_v37, %s4441_s27 }
 0x169   : > { %v881_v46 = vpop.permute.xlu2 %880 }
 0x16a   : > { %967 = vst.msk [vmem:[#allocation3 + $0x50] sm:$0xff] %vm956_vm4, %v881_v46  ;;  %v7038_v46 = vld [vmem:[#allocation13_spill] sm:$0xff] }
 0x16b   : > { %1085 = vrot.lane.b32.xlu1 %v4720_v44, %s4441_s27 }
 0x16c   : > { %1089 = vrot.lane.b32.xlu0 %v4756_v54, %s4441_s27 }
 0x16d   : > { %v873_v31 = vpop.permute.xlu1 %872 }
 0x16e   : > { %963 = vst.msk [vmem:[#allocation3 + $0x30] sm:$0xff] %vm956_vm4, %v873_v31  ;;  %v877_v38 = vpop.permute.xlu0 %876 }
 0x16f   : > { %965 = vst.msk [vmem:[#allocation3 + $0x40] sm:$0xff] %vm956_vm4, %v877_v38  ;;  %1081 = vrot.lane.b32.xlu2 %v4718_v43, %s4441_s27  ;;  %v7039_v38 = vld [vmem:[#allocation17_spill] sm:$0xff] }
 0x171   : > { %v887_v50 = vpop.permute.xlu2 %886 }
 0x172   : > { %970 = vst.msk [vmem:[#allocation3 + $0x68] sm:$0xff] %vm956_vm4, %v887_v50  ;;  %v7040_v50 = vld [vmem:[#allocation24_spill] sm:$0xff] }
 0x173   : > { %1091 = vrot.lane.b32.xlu1 %v4736_v49, %s4441_s27 }
 0x174   : > { %1095 = vrot.lane.b32.xlu0 %v4768_v57, %s4441_s27 }
 0x175   : > { %v879_v37 = vpop.permute.xlu1 %878 }
 0x176   : > { %966 = vst.msk [vmem:[#allocation3 + $0x48] sm:$0xff] %vm956_vm4, %v879_v37  ;;  %v883_v44 = vpop.permute.xlu0 %882 }
 0x177   : > { %968 = vst.msk [vmem:[#allocation3 + $0x58] sm:$0xff] %vm956_vm4, %v883_v44  ;;  %1087 = vrot.lane.b32.xlu2 %v4734_v48, %s4441_s27 }
 0x179   : > { %v893_v54 = vpop.permute.xlu2 %892 }
 0x17a   : > { %973 = vst.msk [vmem:[#allocation3 + $0x80] sm:$0xff] %vm956_vm4, %v893_v54  ;;  %v7041_v54 = vld [vmem:[#allocation16_spill] sm:$0xff] }
 0x17b   : > { %1097 = vrot.lane.b32.xlu1 %v4750_v53, %s4441_s27 }
 0x17c   : > { %1101 = vrot.lane.b32.xlu0 %v4780_v60, %s4441_s27  ;;  %v5245_v60 = vld [vmem:[#allocation2 + $0x181] sm:$0xff] }
 0x17d   : > { %v885_v43 = vpop.permute.xlu1 %884 }
 0x17e   : > { %969 = vst.msk [vmem:[#allocation3 + $0x60] sm:$0xff] %vm956_vm4, %v885_v43  ;;  %v889_v49 = vpop.permute.xlu0 %888 }
 0x17f   : > { %971 = vst.msk [vmem:[#allocation3 + $0x70] sm:$0xff] %vm956_vm4, %v889_v49  ;;  %1093 = vrot.lane.b32.xlu2 %v4748_v52, %s4441_s27  ;;  %v7042_v49 = vld [vmem:[#allocation20_spill] sm:$0xff] }
 0x181   : > { %v899_v57 = vpop.permute.xlu2 %898 }
 0x182   : > { %976 = vst.msk [vmem:[#allocation3 + $0x98] sm:$0xff] %vm956_vm4, %v899_v57  ;;  %v7043_v57 = vld [vmem:[#allocation27_spill] sm:$0xff] }
 0x183   : > { %1103 = vrot.lane.b32.xlu1 %v4762_v56, %s4441_s27 }
 0x184   : > { %1107 = vrot.lane.b32.xlu0 %v4795_v4, %s4441_s27 }
 0x185   : > { %v891_v48 = vpop.permute.xlu1 %890 }
 0x186   : > { %972 = vst.msk [vmem:[#allocation3 + $0x78] sm:$0xff] %vm956_vm4, %v891_v48  ;;  %v895_v53 = vpop.permute.xlu0 %894 }
 0x187   : > { %974 = vst.msk [vmem:[#allocation3 + $0x88] sm:$0xff] %vm956_vm4, %v895_v53  ;;  %1099 = vrot.lane.b32.xlu2 %v4760_v55, %s4441_s27  ;;  %v5256_v55 = vld [vmem:[#allocation2 + $0x189] sm:$0xff] }
 0x189   : > { %v905_v52 = vpop.permute.xlu2 %904 }
 0x18a   : > { %979 = vst.msk [vmem:[#allocation3 + $0xb0] sm:$0xff] %vm956_vm4, %v905_v52  ;;  %v7044_v52 = vld [vmem:[#allocation19_spill] sm:$0xff] }
 0x18b   : > { %1109 = vrot.lane.b32.xlu1 %v4774_v59, %s4441_s27  ;;  %v7028_v59 = vld [vmem:[#allocation12_spill] sm:$0xff] }
 0x18c   : > { %1113 = vrot.lane.b32.xlu0 %v5245_v60, %s4441_s27 }
 0x18d   : > { %v897_v56 = vpop.permute.xlu1 %896 }
 0x18e   : > { %975 = vst.msk [vmem:[#allocation3 + $0x90] sm:$0xff] %vm956_vm4, %v897_v56  ;;  %v901_v4 = vpop.permute.xlu0 %900 }
 0x18f   : > { %977 = vst.msk [vmem:[#allocation3 + $0xa0] sm:$0xff] %vm956_vm4, %v901_v4  ;;  %1105 = vrot.lane.b32.xlu2 %v7027_v63, %s4441_s27  ;;  %v7045_v4 = vld [vmem:[#allocation23_spill] sm:$0xff]  ;;  %v7046_v63 = vld [vmem:[#allocation30_spill] sm:$0xff] }
 0x191   : > { %v911_v5 = vpop.permute.xlu2 %910 }
 0x192   : > { %982 = vst.msk [vmem:[#allocation3 + $0xc8] sm:$0xff] %vm956_vm4, %v911_v5 }
 0x193   : > { %1115 = vrot.lane.b32.xlu1 %v5256_v55, %s4441_s27 }
 0x194   : > { %1248 = vrot.lane.b32.xlu0 %v7028_v59, %s4442_s28 }
 0x195   : > { %v903_v2 = vpop.permute.xlu1 %902 }
 0x196   : > { %978 = vst.msk [vmem:[#allocation3 + $0xa8] sm:$0xff] %vm956_vm4, %v903_v2  ;;  %v907_v39 = vpop.permute.xlu0 %906  ;;  %v7047_v2 = vld [vmem:[#allocation22_spill] sm:$0xff] }
 0x197   : > { %980 = vst.msk [vmem:[#allocation3 + $0xb8] sm:$0xff] %vm956_vm4, %v907_v39  ;;  %1111 = vrot.lane.b32.xlu2 %v7029_v6, %s4441_s27  ;;  %v7048_v6 = vld [vmem:[#allocation26_spill] sm:$0xff] }
 0x199   : > { %v917_v62 = vpop.permute.xlu2 %916 }
 0x19a   : > { %985 = vst.msk [vmem:[#allocation3 + $0xe0] sm:$0xff] %vm956_vm4, %v917_v62  ;;  %v7049_v62 = vld [vmem:[#allocation33_spill] sm:$0xff] }
 0x19b   : > { %1250 = vrot.lane.b32.xlu1 %v7030_v11, %s4442_s28 }
 0x19c   : > { %1254 = vrot.lane.b32.xlu0 %v7031_v13, %s4442_s28 }
 0x19d   : > { %v909_v3 = vpop.permute.xlu1 %908 }
 0x19e   : > { %981 = vst.msk [vmem:[#allocation3 + $0xc0] sm:$0xff] %vm956_vm4, %v909_v3  ;;  %v913_v8 = vpop.permute.xlu0 %912  ;;  %v7050_v3 = vld [vmem:[#allocation25_spill] sm:$0xff] }
 0x19f   : > { %983 = vst.msk [vmem:[#allocation3 + $0xd0] sm:$0xff] %vm956_vm4, %v913_v8  ;;  %1246 = vrot.lane.b32.xlu2 %v7032_v58, %s4442_s28  ;;  %v7051_v58 = vld [vmem:[#allocation29_spill] sm:$0xff] }
 0x1a1   : > { %v923_v15 = vpop.permute.xlu2 %922 }
 0x1a2   : > { %988 = vst.msk [vmem:[#allocation3 + $0xf8] sm:$0xff] %vm956_vm4, %v923_v15 }
 0x1a3   : > { %1256 = vrot.lane.b32.xlu1 %v7033_v28, %s4442_s28 }
 0x1a4   : > { %1260 = vrot.lane.b32.xlu0 %v7034_v22, %s4442_s28  ;;  %v7052_v22 = vld [vmem:[#allocation28_spill] sm:$0xff] }
 0x1a5   : > { %v915_v17 = vpop.permute.xlu1 %914 }
 0x1a6   : > { %984 = vst.msk [vmem:[#allocation3 + $0xd8] sm:$0xff] %vm956_vm4, %v915_v17  ;;  %v919_v34 = vpop.permute.xlu0 %918 }
 0x1a7   : > { %986 = vst.msk [vmem:[#allocation3 + $0xe8] sm:$0xff] %vm956_vm4, %v919_v34  ;;  %1252 = vrot.lane.b32.xlu2 %v7035_v21, %s4442_s28  ;;  %v7053_v34 = vld [vmem:[#allocation32_spill] sm:$0xff] }
 0x1a9   : > { %v1058_v26 = vpop.permute.xlu2 %1057 }
 0x1aa   : > { %1152 = vst.msk [vmem:[#allocation3 + $0x10] sm:$0xff] %vm1149_vm5, %v1058_v26  ;;  %v7054_v26 = vld [vmem:[#allocation31_spill] sm:$0xff] }
 0x1ab   : > { %1262 = vrot.lane.b32.xlu1 %v7036_v40, %s4442_s28  ;;  %v5348_v40 = vld [vmem:[#allocation2 + $0x18a] sm:$0xff] }
 0x1ac   : > { %1266 = vrot.lane.b32.xlu0 %v7037_v41, %s4442_s28 }
 0x1ad   : > { %v921_v24 = vpop.permute.xlu1 %920 }
 0x1ae   : > { %987 = vst.msk [vmem:[#allocation3 + $0xf0] sm:$0xff] %vm956_vm4, %v921_v24  ;;  %v1054_v32 = vpop.permute.xlu0 %1053  ;;  %v7055_v24 = vld [vmem:[#allocation35_spill] sm:$0xff]  ;;  %vm3714_vm4 = vcmask 523712  }
 0x1af   : > { %1150 = vst.msk [vmem:[#allocation3] sm:$0xff] %vm1149_vm5, %v1054_v32  ;;  %1258 = vrot.lane.b32.xlu2 %v7038_v46, %s4442_s28  ;;  %v7056_v46 = vld [vmem:[#allocation34_spill] sm:$0xff] }
 0x1b1   : > { %v1064_v31 = vpop.permute.xlu2 %1063 }
 0x1b2   : > { %1155 = vst.msk [vmem:[#allocation3 + $0x28] sm:$0xff] %vm1149_vm5, %v1064_v31  ;;  %v1376_v31 = vld [vmem:[#allocation2 + $0x30] sm:$0xff] }
 0x1b3   : > { %1268 = vrot.lane.b32.xlu1 %v7039_v38, %s4442_s28 }
 0x1b4   : > { %1272 = vrot.lane.b32.xlu0 %v7040_v50, %s4442_s28  ;;  %v5363_v50 = vld [vmem:[#allocation2 + $0x182] sm:$0xff] }
 0x1b5   : > { %v1056_v37 = vpop.permute.xlu1 %1055 }
 0x1b6   : > { %1151 = vst.msk [vmem:[#allocation3 + $0x8] sm:$0xff] %vm1149_vm5, %v1056_v37  ;;  %v1060_v44 = vpop.permute.xlu0 %1059 }
 0x1b7   : > { %1153 = vst.msk [vmem:[#allocation3 + $0x18] sm:$0xff] %vm1149_vm5, %v1060_v44  ;;  %1264 = vrot.lane.b32.xlu2 %v7041_v54, %s4442_s28 }
 0x1b9   : > { %v1070_v43 = vpop.permute.xlu2 %1069 }
 0x1ba   : > { %1158 = vst.msk [vmem:[#allocation3 + $0x40] sm:$0xff] %vm1149_vm5, %v1070_v43 }
 0x1bb   : > { %1274 = vrot.lane.b32.xlu1 %v7042_v49, %s4442_s28 }
 0x1bc   : > { %1278 = vrot.lane.b32.xlu0 %v7043_v57, %s4442_s28 }
 0x1bd   : > { %v1062_v48 = vpop.permute.xlu1 %1061 }
 0x1be   : > { %1154 = vst.msk [vmem:[#allocation3 + $0x20] sm:$0xff] %vm1149_vm5, %v1062_v48  ;;  %v1066_v53 = vpop.permute.xlu0 %1065 }
 0x1bf   : > { %1156 = vst.msk [vmem:[#allocation3 + $0x30] sm:$0xff] %vm1149_vm5, %v1066_v53  ;;  %1270 = vrot.lane.b32.xlu2 %v7044_v52, %s4442_s28 }
 0x1c1   : > { %v1076_v56 = vpop.permute.xlu2 %1075 }
 0x1c2   : > { %1161 = vst.msk [vmem:[#allocation3 + $0x58] sm:$0xff] %vm1149_vm5, %v1076_v56 }
 0x1c3   : > { %1280 = vrot.lane.b32.xlu1 %v7045_v4, %s4442_s28 }
 0x1c4   : > { %1284 = vrot.lane.b32.xlu0 %v7046_v63, %s4442_s28 }
 0x1c5   : > { %v1068_v5 = vpop.permute.xlu1 %1067 }
 0x1c6   : > { %1157 = vst.msk [vmem:[#allocation3 + $0x38] sm:$0xff] %vm1149_vm5, %v1068_v5  ;;  %v1072_v59 = vpop.permute.xlu0 %1071 }
 0x1c7   : > { %1159 = vst.msk [vmem:[#allocation3 + $0x48] sm:$0xff] %vm1149_vm5, %v1072_v59  ;;  %1276 = vrot.lane.b32.xlu2 %v7047_v2, %s4442_s28 }
 0x1c9   : > { %v1082_v39 = vpop.permute.xlu2 %1081 }
 0x1ca   : > { %1164 = vst.msk [vmem:[#allocation3 + $0x70] sm:$0xff] %vm1149_vm5, %v1082_v39 }
 0x1cb   : > { %1286 = vrot.lane.b32.xlu1 %v7048_v6, %s4442_s28 }
 0x1cc   : > { %1290 = vrot.lane.b32.xlu0 %v7049_v62, %s4442_s28 }
 0x1cd   : > { %v1074_v11 = vpop.permute.xlu1 %1073 }
 0x1ce   : > { %1160 = vst.msk [vmem:[#allocation3 + $0x50] sm:$0xff] %vm1149_vm5, %v1074_v11  ;;  %v1078_v13 = vpop.permute.xlu0 %1077 }
 0x1cf   : > { %1162 = vst.msk [vmem:[#allocation3 + $0x60] sm:$0xff] %vm1149_vm5, %v1078_v13  ;;  %1282 = vrot.lane.b32.xlu2 %v7050_v3, %s4442_s28  ;;  %v1406_v13 = vld [vmem:[#allocation2 + $0x198] sm:$0xff] }
 0x1d1   : > { %v1088_v8 = vpop.permute.xlu2 %1087 }
 0x1d2   : > { %1167 = vst.msk [vmem:[#allocation3 + $0x88] sm:$0xff] %vm1149_vm5, %v1088_v8  ;;  %v1572_v8 = vld [vmem:[#allocation2 + $0x51] sm:$0xff] }
 0x1d3   : > { %1292 = vrot.lane.b32.xlu1 %v7051_v58, %s4442_s28 }
 0x1d4   : > { %1296 = vrot.lane.b32.xlu0 %v5045_v1, %s4442_s28 }
 0x1d5   : > { %v1080_v15 = vpop.permute.xlu1 %1079 }
 0x1d6   : > { %1163 = vst.msk [vmem:[#allocation3 + $0x68] sm:$0xff] %vm1149_vm5, %v1080_v15  ;;  %v1084_v28 = vpop.permute.xlu0 %1083  ;;  %v1407_v15 = vld [vmem:[#allocation2 + $0x1a0] sm:$0xff] }
 0x1d7   : > { %1165 = vst.msk [vmem:[#allocation3 + $0x78] sm:$0xff] %vm1149_vm5, %v1084_v28  ;;  %1288 = vrot.lane.b32.xlu2 %v7052_v22, %s4442_s28 }
 0x1d9   : > { %v1094_v17 = vpop.permute.xlu2 %1093 }
 0x1da   : > { %1170 = vst.msk [vmem:[#allocation3 + $0xa0] sm:$0xff] %vm1149_vm5, %v1094_v17  ;;  %v1573_v17 = vld [vmem:[#allocation2 + $0x61] sm:$0xff] }
 0x1db   : > { %1298 = vrot.lane.b32.xlu1 %v7053_v34, %s4442_s28 }
 0x1dc   : > { %1302 = vrot.lane.b32.xlu0 %v5060_v9, %s4442_s28 }
 0x1dd   : > { %v1086_v21 = vpop.permute.xlu1 %1085 }
 0x1de   : > { %1166 = vst.msk [vmem:[#allocation3 + $0x80] sm:$0xff] %vm1149_vm5, %v1086_v21  ;;  %v1090_v1 = vpop.permute.xlu0 %1089  ;;  %v1571_v21 = vld [vmem:[#allocation2 + $0x49] sm:$0xff] }
 0x1df   : > { %1168 = vst.msk [vmem:[#allocation3 + $0x90] sm:$0xff] %vm1149_vm5, %v1090_v1  ;;  %1294 = vrot.lane.b32.xlu2 %v7054_v26, %s4442_s28 }
 0x1e1   : > { %v1100_v41 = vpop.permute.xlu2 %1099 }
 0x1e2   : > { %1173 = vst.msk [vmem:[#allocation3 + $0xb8] sm:$0xff] %vm1149_vm5, %v1100_v41  ;;  %v1576_v41 = vld [vmem:[#allocation2 + $0x81] sm:$0xff] }
 0x1e3   : > { %1304 = vrot.lane.b32.xlu1 %v7055_v24, %s4442_s28  ;;  %v1578_v24 = vld [vmem:[#allocation2 + $0x99] sm:$0xff] }
 0x1e4   : > { %1308 = vrot.lane.b32.xlu0 %v5348_v40, %s4442_s28 }
 0x1e5   : > { %v1092_v9 = vpop.permute.xlu1 %1091 }
 0x1e6   : > { %1169 = vst.msk [vmem:[#allocation3 + $0x98] sm:$0xff] %vm1149_vm5, %v1092_v9  ;;  %v1096_v32 = vpop.permute.xlu0 %1095 }
 0x1e7   : > { %1171 = vst.msk [vmem:[#allocation3 + $0xa8] sm:$0xff] %vm1149_vm5, %v1096_v32  ;;  %1300 = vrot.lane.b32.xlu2 %v7056_v46, %s4442_s28  ;;  %v1574_v32 = vld [vmem:[#allocation2 + $0x69] sm:$0xff] }
 0x1e9   : > { %v1106_v38 = vpop.permute.xlu2 %1105 }
 0x1ea   : > { %1176 = vst.msk [vmem:[#allocation3 + $0xd0] sm:$0xff] %vm1149_vm5, %v1106_v38  ;;  %v1579_v38 = vld [vmem:[#allocation2 + $0xa9] sm:$0xff] }
 0x1eb   : > { %1440 = vrot.lane.b32.xlu1 %v1376_v31, %s4443_s29 }
 0x1ec   : > { %1444 = vrot.lane.b32.xlu0 %v4820_v12, %s4443_s29  ;;  %v1377_v12 = vld [vmem:[#allocation2 + $0x38] sm:$0xff] }
 0x1ed   : > { %v1098_v37 = vpop.permute.xlu1 %1097 }
 0x1ee   : > { %1172 = vst.msk [vmem:[#allocation3 + $0xb0] sm:$0xff] %vm1149_vm5, %v1098_v37  ;;  %v1102_v44 = vpop.permute.xlu0 %1101  ;;  %v1581_v37 = vld [vmem:[#allocation2 + $0xc1] sm:$0xff] }
 0x1ef   : > { %1174 = vst.msk [vmem:[#allocation3 + $0xc0] sm:$0xff] %vm1149_vm5, %v1102_v44  ;;  %1306 = vrot.lane.b32.xlu2 %v5363_v50, %s4442_s28 }
 0x1f1   : > { %v1112_v54 = vpop.permute.xlu2 %1111 }
 0x1f2   : > { %1179 = vst.msk [vmem:[#allocation3 + $0xe8] sm:$0xff] %vm1149_vm5, %v1112_v54  ;;  %v1577_v54 = vld [vmem:[#allocation2 + $0x91] sm:$0xff] }
 0x1f3   : > { %1446 = vrot.lane.b32.xlu1 %v4839_v19, %s4443_s29  ;;  %v1380_v19 = vld [vmem:[#allocation2 + $0x60] sm:$0xff] }
 0x1f4   : > { %1450 = vrot.lane.b32.xlu0 %v4843_v20, %s4443_s29 }
 0x1f5   : > { %v1104_v43 = vpop.permute.xlu1 %1103 }
 0x1f6   : > { %1175 = vst.msk [vmem:[#allocation3 + $0xc8] sm:$0xff] %vm1149_vm5, %v1104_v43  ;;  %v1108_v49 = vpop.permute.xlu0 %1107 }
 0x1f7   : > { %1177 = vst.msk [vmem:[#allocation3 + $0xd8] sm:$0xff] %vm1149_vm5, %v1108_v49  ;;  %1442 = vrot.lane.b32.xlu2 %v1377_v12, %s4443_s29  ;;  %v1582_v49 = vld [vmem:[#allocation2 + $0xc9] sm:$0xff] }
 0x1f9   : > { %v1247_v57 = vpop.permute.xlu2 %1246 }
 0x1fa   : > { %1343 = vst.msk [vmem:[#allocation3] sm:$0xff] %vm1342_vm6, %v1247_v57  ;;  %v1584_v57 = vld [vmem:[#allocation2 + $0xe1] sm:$0xff] }
 0x1fb   : > { %1452 = vrot.lane.b32.xlu1 %v4866_v35, %s4443_s29  ;;  %v1383_v35 = vld [vmem:[#allocation2 + $0x80] sm:$0xff] }
 0x1fc   : > { %1456 = vrot.lane.b32.xlu0 %v4870_v36, %s4443_s29 }
 0x1fd   : > { %v1110_v20 = vpop.permute.xlu1 %1109 }
 0x1fe   : > { %1178 = vst.msk [vmem:[#allocation3 + $0xe0] sm:$0xff] %vm1149_vm5, %v1110_v20  ;;  %v1114_v48 = vpop.permute.xlu0 %1113  ;;  %v1580_v20 = vld [vmem:[#allocation2 + $0xb1] sm:$0xff] }
 0x1ff   : > { %1180 = vst.msk [vmem:[#allocation3 + $0xf0] sm:$0xff] %vm1149_vm5, %v1114_v48  ;;  %1448 = vrot.lane.b32.xlu2 %v1380_v19, %s4443_s29 }
 0x201   : > { %v1253_v53 = vpop.permute.xlu2 %1252 }
 0x202   : > { %1346 = vst.msk [vmem:[#allocation3 + $0x18] sm:$0xff] %vm1342_vm6, %v1253_v53 }
 0x203   : > { %1458 = vrot.lane.b32.xlu1 %v4891_v51, %s4443_s29  ;;  %v1386_v51 = vld [vmem:[#allocation2 + $0xa8] sm:$0xff] }
 0x204   : > { %1462 = vrot.lane.b32.xlu0 %v4895_v61, %s4443_s29 }
 0x205   : > { %v1116_v36 = vpop.permute.xlu1 %1115 }
 0x206   : > { %1181 = vst.msk [vmem:[#allocation3 + $0xf8] sm:$0xff] %vm1149_vm5, %v1116_v36  ;;  %v1249_v52 = vpop.permute.xlu0 %1248  ;;  %v1587_v36 = vld [vmem:[#allocation2 + $0x109] sm:$0xff]  ;;  %vm3907_vm5 = vcmask 589312  }
 0x207   : > { %1344 = vst.msk [vmem:[#allocation3 + $0x8] sm:$0xff] %vm1342_vm6, %v1249_v52  ;;  %1454 = vrot.lane.b32.xlu2 %v1383_v35, %s4443_s29  ;;  %v1585_v35 = vld [vmem:[#allocation2 + $0xf1] sm:$0xff] }
 0x209   : > { %v1259_v56 = vpop.permute.xlu2 %1258 }
 0x20a   : > { %1349 = vst.msk [vmem:[#allocation3 + $0x30] sm:$0xff] %vm1342_vm6, %v1259_v56  ;;  %v1583_v56 = vld [vmem:[#allocation2 + $0xd9] sm:$0xff] }
 0x20b   : > { %1464 = vrot.lane.b32.xlu1 %v4916_v29, %s4443_s29  ;;  %v1389_v29 = vld [vmem:[#allocation2 + $0xc8] sm:$0xff] }
 0x20c   : > { %1468 = vrot.lane.b32.xlu0 %v4921_v0, %s4443_s29 }
 0x20d   : > { %v1251_v61 = vpop.permute.xlu1 %1250 }
 0x20e   : > { %1345 = vst.msk [vmem:[#allocation3 + $0x10] sm:$0xff] %vm1342_vm6, %v1251_v61  ;;  %v1255_v4 = vpop.permute.xlu0 %1254 }
 0x20f   : > { %1347 = vst.msk [vmem:[#allocation3 + $0x20] sm:$0xff] %vm1342_vm6, %v1255_v4  ;;  %1460 = vrot.lane.b32.xlu2 %v1386_v51, %s4443_s29  ;;  %v1588_v4 = vld [vmem:[#allocation2 + $0x111] sm:$0xff] }
 0x211   : > { %v1265_v63 = vpop.permute.xlu2 %1264 }
 0x212   : > { %1352 = vst.msk [vmem:[#allocation3 + $0x48] sm:$0xff] %vm1342_vm6, %v1265_v63  ;;  %v1590_v63 = vld [vmem:[#allocation2 + $0x129] sm:$0xff] }
 0x213   : > { %1470 = vrot.lane.b32.xlu1 %v4943_v45, %s4443_s29  ;;  %v1392_v45 = vld [vmem:[#allocation2 + $0xf0] sm:$0xff] }
 0x214   : > { %1474 = vrot.lane.b32.xlu0 %v4948_v27, %s4443_s29 }
 0x215   : > { %v1257_v0 = vpop.permute.xlu1 %1256 }
 0x216   : > { %1348 = vst.msk [vmem:[#allocation3 + $0x28] sm:$0xff] %vm1342_vm6, %v1257_v0  ;;  %v1261_v5 = vpop.permute.xlu0 %1260  ;;  %v1586_v0 = vld [vmem:[#allocation2 + $0xf9] sm:$0xff] }
 0x217   : > { %1350 = vst.msk [vmem:[#allocation3 + $0x38] sm:$0xff] %vm1342_vm6, %v1261_v5  ;;  %1466 = vrot.lane.b32.xlu2 %v1389_v29, %s4443_s29 }
 0x219   : > { %v1271_v59 = vpop.permute.xlu2 %1270 }
 0x21a   : > { %1355 = vst.msk [vmem:[#allocation3 + $0x60] sm:$0xff] %vm1342_vm6, %v1271_v59 }
 0x21b   : > { %1476 = vrot.lane.b32.xlu1 %v4970_v42, %s4443_s29  ;;  %v1395_v42 = vld [vmem:[#allocation2 + $0x110] sm:$0xff] }
 0x21c   : > { %1480 = vrot.lane.b32.xlu0 %v4975_v47, %s4443_s29 }
 0x21d   : > { %v1263_v27 = vpop.permute.xlu1 %1262 }
 0x21e   : > { %1351 = vst.msk [vmem:[#allocation3 + $0x40] sm:$0xff] %vm1342_vm6, %v1263_v27  ;;  %v1267_v2 = vpop.permute.xlu0 %1266  ;;  %v1593_v27 = vld [vmem:[#allocation2 + $0x151] sm:$0xff] }
 0x21f   : > { %1353 = vst.msk [vmem:[#allocation3 + $0x50] sm:$0xff] %vm1342_vm6, %v1267_v2  ;;  %1472 = vrot.lane.b32.xlu2 %v1392_v45, %s4443_s29  ;;  %v1591_v45 = vld [vmem:[#allocation2 + $0x139] sm:$0xff] }
 0x221   : > { %v1277_v39 = vpop.permute.xlu2 %1276 }
 0x222   : > { %1358 = vst.msk [vmem:[#allocation3 + $0x78] sm:$0xff] %vm1342_vm6, %v1277_v39  ;;  %v1589_v39 = vld [vmem:[#allocation2 + $0x121] sm:$0xff] }
 0x223   : > { %1482 = vrot.lane.b32.xlu1 %v4997_v30, %s4443_s29 }
 0x224   : > { %1486 = vrot.lane.b32.xlu0 %v5002_v33, %s4443_s29 }
 0x225   : > { %v1269_v47 = vpop.permute.xlu1 %1268 }
 0x226   : > { %1354 = vst.msk [vmem:[#allocation3 + $0x58] sm:$0xff] %vm1342_vm6, %v1269_v47  ;;  %v1273_v6 = vpop.permute.xlu0 %1272 }
 0x227   : > { %1356 = vst.msk [vmem:[#allocation3 + $0x68] sm:$0xff] %vm1342_vm6, %v1273_v6  ;;  %1478 = vrot.lane.b32.xlu2 %v1395_v42, %s4443_s29  ;;  %v1594_v6 = vld [vmem:[#allocation2 + $0x159] sm:$0xff] }
 0x229   : > { %v1283_v62 = vpop.permute.xlu2 %1282 }
 0x22a   : > { %1361 = vst.msk [vmem:[#allocation3 + $0x90] sm:$0xff] %vm1342_vm6, %v1283_v62  ;;  %v1596_v62 = vld [vmem:[#allocation2 + $0x171] sm:$0xff] }
 0x22b   : > { %1488 = vrot.lane.b32.xlu1 %v5024_v23, %s4443_s29 }
 0x22c   : > { %1492 = vrot.lane.b32.xlu0 %v5029_v18, %s4443_s29 }
 0x22d   : > { %v1275_v30 = vpop.permute.xlu1 %1274 }
 0x22e   : > { %1357 = vst.msk [vmem:[#allocation3 + $0x70] sm:$0xff] %vm1342_vm6, %v1275_v30  ;;  %v1279_v33 = vpop.permute.xlu0 %1278 }
 0x22f   : > { %1359 = vst.msk [vmem:[#allocation3 + $0x80] sm:$0xff] %vm1342_vm6, %v1279_v33  ;;  %1484 = vrot.lane.b32.xlu2 %v4977_v25, %s4443_s29  ;;  %v1569_v25 = vld [vmem:[#allocation2 + $0x31] sm:$0xff]  ;;  %v1592_v33 = vld [vmem:[#allocation2 + $0x141] sm:$0xff] }
 0x231   : > { %v1289_v11 = vpop.permute.xlu2 %1288 }
 0x232   : > { %1364 = vst.msk [vmem:[#allocation3 + $0xa8] sm:$0xff] %vm1342_vm6, %v1289_v11 }
 0x233   : > { %1494 = vrot.lane.b32.xlu1 %v5047_v14, %s4443_s29 }
 0x234   : > { %1498 = vrot.lane.b32.xlu0 %v5167_v10, %s4443_s29 }
 0x235   : > { %v1281_v23 = vpop.permute.xlu1 %1280 }
 0x236   : > { %1360 = vst.msk [vmem:[#allocation3 + $0x88] sm:$0xff] %vm1342_vm6, %v1281_v23  ;;  %v1285_v18 = vpop.permute.xlu0 %1284 }
 0x237   : > { %1362 = vst.msk [vmem:[#allocation3 + $0x98] sm:$0xff] %vm1342_vm6, %v1285_v18  ;;  %1490 = vrot.lane.b32.xlu2 %v5004_v16, %s4443_s29  ;;  %v1570_v16 = vld [vmem:[#allocation2 + $0x39] sm:$0xff] }
 0x238   : > { %v1599_v18 = vld [vmem:[#allocation2 + $0x199] sm:$0xff] }
 0x239   : > { %v1295_v3 = vpop.permute.xlu2 %1294 }
 0x23a   : > { %1367 = vst.msk [vmem:[#allocation3 + $0xc0] sm:$0xff] %vm1342_vm6, %v1295_v3 }
 0x23b   : > { %1500 = vrot.lane.b32.xlu1 %v1406_v13, %s4443_s29 }
 0x23c   : > { %1633 = vrot.lane.b32.xlu0 %v1569_v25, %s4444_s30  ;;  %v1595_v25 = vld [vmem:[#allocation2 + $0x169] sm:$0xff] }
 0x23d   : > { %v1287_v14 = vpop.permute.xlu1 %1286 }
 0x23e   : > { %1363 = vst.msk [vmem:[#allocation3 + $0xa0] sm:$0xff] %vm1342_vm6, %v1287_v14  ;;  %v1291_v10 = vpop.permute.xlu0 %1290 }
 0x23f   : > { %1365 = vst.msk [vmem:[#allocation3 + $0xb0] sm:$0xff] %vm1342_vm6, %v1291_v10  ;;  %1496 = vrot.lane.b32.xlu2 %v5151_v7, %s4443_s29  ;;  %v1575_v7 = vld [vmem:[#allocation2 + $0x79] sm:$0xff]  ;;  %v1600_v10 = vld [vmem:[#allocation2 + $0x1a1] sm:$0xff] }
 0x241   : > { %v1301_v58 = vpop.permute.xlu2 %1300 }
 0x242   : > { %1370 = vst.msk [vmem:[#allocation3 + $0xd8] sm:$0xff] %vm1342_vm6, %v1301_v58 }
 0x243   : > { %1635 = vrot.lane.b32.xlu1 %v1570_v16, %s4444_s30  ;;  %v1763_v16 = vld [vmem:[#allocation2 + $0x3a] sm:$0xff] }
 0x244   : > { %1639 = vrot.lane.b32.xlu0 %v1572_v8, %s4444_s30 }
 0x245   : > { %v1293_v28 = vpop.permute.xlu1 %1292 }
 0x246   : > { %1366 = vst.msk [vmem:[#allocation3 + $0xb8] sm:$0xff] %vm1342_vm6, %v1293_v28  ;;  %v1297_v22 = vpop.permute.xlu0 %1296 }
 0x247   : > { %1368 = vst.msk [vmem:[#allocation3 + $0xc8] sm:$0xff] %vm1342_vm6, %v1297_v22  ;;  %1502 = vrot.lane.b32.xlu2 %v1407_v15, %s4443_s29  ;;  %v1764_v15 = vld [vmem:[#allocation2 + $0x4a] sm:$0xff]  ;;  %v1766_v22 = vld [vmem:[#allocation2 + $0x62] sm:$0xff] }
 0x249   : > { %v1307_v34 = vpop.permute.xlu2 %1306 }
 0x24a   : > { %1373 = vst.msk [vmem:[#allocation3 + $0xf0] sm:$0xff] %vm1342_vm6, %v1307_v34 }
 0x24b   : > { %1641 = vrot.lane.b32.xlu1 %v1573_v17, %s4444_s30  ;;  %v1762_v17 = vld [vmem:[#allocation2 + $0x32] sm:$0xff] }
 0x24c   : > { %1645 = vrot.lane.b32.xlu0 %v1575_v7, %s4444_s30 }
 0x24d   : > { %v1299_v1 = vpop.permute.xlu1 %1298 }
 0x24e   : > { %1369 = vst.msk [vmem:[#allocation3 + $0xd0] sm:$0xff] %vm1342_vm6, %v1299_v1  ;;  %v1303_v26 = vpop.permute.xlu0 %1302  ;;  %v1769_v1 = vld [vmem:[#allocation2 + $0x82] sm:$0xff] }
 0x24f   : > { %1371 = vst.msk [vmem:[#allocation3 + $0xe0] sm:$0xff] %vm1342_vm6, %v1303_v26  ;;  %1637 = vrot.lane.b32.xlu2 %v1571_v21, %s4444_s30  ;;  %v1767_v21 = vld [vmem:[#allocation2 + $0x6a] sm:$0xff]  ;;  %v1765_v26 = vld [vmem:[#allocation2 + $0x52] sm:$0xff] }
 0x251   : > { %v1443_v9 = vpop.permute.xlu2 %1442 }
 0x252   : > { %1538 = vst.msk [vmem:[#allocation3 + $0x8] sm:$0xff] %vm1536_vm7, %v1443_v9  ;;  %v1770_v9 = vld [vmem:[#allocation2 + $0x92] sm:$0xff] }
 0x253   : > { %1647 = vrot.lane.b32.xlu1 %v1576_v41, %s4444_s30 }
 0x254   : > { %1651 = vrot.lane.b32.xlu0 %v1578_v24, %s4444_s30 }
 0x255   : > { %v1305_v46 = vpop.permute.xlu1 %1304 }
 0x256   : > { %1372 = vst.msk [vmem:[#allocation3 + $0xe8] sm:$0xff] %vm1342_vm6, %v1305_v46  ;;  %v1309_v31 = vpop.permute.xlu0 %1308  ;;  %v1772_v46 = vld [vmem:[#allocation2 + $0xaa] sm:$0xff] }
 0x257   : > { %1374 = vst.msk [vmem:[#allocation3 + $0xf8] sm:$0xff] %vm1342_vm6, %v1309_v31  ;;  %1643 = vrot.lane.b32.xlu2 %v1574_v32, %s4444_s30  ;;  %v1768_v31 = vld [vmem:[#allocation2 + $0x7a] sm:$0xff]  ;;  %vm3985_vm6 = vcmask 588800  }
 0x259   : > { %v1449_v44 = vpop.permute.xlu2 %1448 }
 0x25a   : > { %1541 = vst.msk [vmem:[#allocation3 + $0x20] sm:$0xff] %vm1536_vm7, %v1449_v44  ;;  %v1773_v44 = vld [vmem:[#allocation2 + $0xb2] sm:$0xff] }
 0x25b   : > { %1653 = vrot.lane.b32.xlu1 %v1579_v38, %s4444_s30 }
 0x25c   : > { %1657 = vrot.lane.b32.xlu0 %v1581_v37, %s4444_s30 }
 0x25d   : > { %v1441_v12 = vpop.permute.xlu1 %1440 }
 0x25e   : > { %1537 = vst.msk [vmem:[#allocation3] sm:$0xff] %vm1536_vm7, %v1441_v12  ;;  %v1445_v43 = vpop.permute.xlu0 %1444  ;;  %v1775_v12 = vld [vmem:[#allocation2 + $0xca] sm:$0xff] }
 0x25f   : > { %1539 = vst.msk [vmem:[#allocation3 + $0x10] sm:$0xff] %vm1536_vm7, %v1445_v43  ;;  %1649 = vrot.lane.b32.xlu2 %v1577_v54, %s4444_s30  ;;  %v1771_v43 = vld [vmem:[#allocation2 + $0x9a] sm:$0xff] }
 0x261   : > { %v1455_v19 = vpop.permute.xlu2 %1454 }
 0x262   : > { %1544 = vst.msk [vmem:[#allocation3 + $0x38] sm:$0xff] %vm1536_vm7, %v1455_v19  ;;  %v1776_v19 = vld [vmem:[#allocation2 + $0xda] sm:$0xff] }
 0x263   : > { %1659 = vrot.lane.b32.xlu1 %v1582_v49, %s4444_s30 }
 0x264   : > { %1663 = vrot.lane.b32.xlu0 %v1584_v57, %s4444_s30 }
 0x265   : > { %v1447_v48 = vpop.permute.xlu1 %1446 }
 0x266   : > { %1540 = vst.msk [vmem:[#allocation3 + $0x18] sm:$0xff] %vm1536_vm7, %v1447_v48  ;;  %v1451_v53 = vpop.permute.xlu0 %1450  ;;  %v1778_v48 = vld [vmem:[#allocation2 + $0xf2] sm:$0xff] }
 0x267   : > { %1542 = vst.msk [vmem:[#allocation3 + $0x28] sm:$0xff] %vm1536_vm7, %v1451_v53  ;;  %1655 = vrot.lane.b32.xlu2 %v1580_v20, %s4444_s30  ;;  %v1774_v53 = vld [vmem:[#allocation2 + $0xc2] sm:$0xff] }
 0x269   : > { %v1461_v52 = vpop.permute.xlu2 %1460 }
 0x26a   : > { %1547 = vst.msk [vmem:[#allocation3 + $0x50] sm:$0xff] %vm1536_vm7, %v1461_v52  ;;  %v1779_v52 = vld [vmem:[#allocation2 + $0xfa] sm:$0xff] }
 0x26b   : > { %1665 = vrot.lane.b32.xlu1 %v1585_v35, %s4444_s30 }
 0x26c   : > { %1669 = vrot.lane.b32.xlu0 %v1587_v36, %s4444_s30 }
 0x26d   : > { %v1453_v51 = vpop.permute.xlu1 %1452 }
 0x26e   : > { %1543 = vst.msk [vmem:[#allocation3 + $0x30] sm:$0xff] %vm1536_vm7, %v1453_v51  ;;  %v1457_v61 = vpop.permute.xlu0 %1456  ;;  %v1781_v51 = vld [vmem:[#allocation2 + $0x112] sm:$0xff] }
 0x26f   : > { %1545 = vst.msk [vmem:[#allocation3 + $0x40] sm:$0xff] %vm1536_vm7, %v1457_v61  ;;  %1661 = vrot.lane.b32.xlu2 %v1583_v56, %s4444_s30  ;;  %v1777_v61 = vld [vmem:[#allocation2 + $0xe2] sm:$0xff] }
 0x271   : > { %v1467_v29 = vpop.permute.xlu2 %1466 }
 0x272   : > { %1550 = vst.msk [vmem:[#allocation3 + $0x68] sm:$0xff] %vm1536_vm7, %v1467_v29  ;;  %v1782_v29 = vld [vmem:[#allocation2 + $0x122] sm:$0xff] }
 0x273   : > { %1671 = vrot.lane.b32.xlu1 %v1588_v4, %s4444_s30 }
 0x274   : > { %1675 = vrot.lane.b32.xlu0 %v1590_v63, %s4444_s30 }
 0x275   : > { %v1459_v5 = vpop.permute.xlu1 %1458 }
 0x276   : > { %1546 = vst.msk [vmem:[#allocation3 + $0x48] sm:$0xff] %vm1536_vm7, %v1459_v5  ;;  %v1463_v59 = vpop.permute.xlu0 %1462  ;;  %v1784_v5 = vld [vmem:[#allocation2 + $0x13a] sm:$0xff] }
 0x277   : > { %1548 = vst.msk [vmem:[#allocation3 + $0x58] sm:$0xff] %vm1536_vm7, %v1463_v59  ;;  %1667 = vrot.lane.b32.xlu2 %v1586_v0, %s4444_s30  ;;  %v1780_v59 = vld [vmem:[#allocation2 + $0x10a] sm:$0xff] }
 0x279   : > { %v1473_v2 = vpop.permute.xlu2 %1472 }
 0x27a   : > { %1553 = vst.msk [vmem:[#allocation3 + $0x80] sm:$0xff] %vm1536_vm7, %v1473_v2  ;;  %v1785_v2 = vld [vmem:[#allocation2 + $0x142] sm:$0xff] }
 0x27b   : > { %1677 = vrot.lane.b32.xlu1 %v1591_v45, %s4444_s30 }
 0x27c   : > { %1681 = vrot.lane.b32.xlu0 %v1593_v27, %s4444_s30 }
 0x27d   : > { %v1465_v42 = vpop.permute.xlu1 %1464 }
 0x27e   : > { %1549 = vst.msk [vmem:[#allocation3 + $0x60] sm:$0xff] %vm1536_vm7, %v1465_v42  ;;  %v1469_v47 = vpop.permute.xlu0 %1468 }
 0x27f   : > { %1551 = vst.msk [vmem:[#allocation3 + $0x70] sm:$0xff] %vm1536_vm7, %v1469_v47  ;;  %1673 = vrot.lane.b32.xlu2 %v1589_v39, %s4444_s30 }
 0x281   : > { %v1479_v30 = vpop.permute.xlu2 %1478 }
 0x282   : > { %1556 = vst.msk [vmem:[#allocation3 + $0x98] sm:$0xff] %vm1536_vm7, %v1479_v30 }
 0x283   : > { %1683 = vrot.lane.b32.xlu1 %v1594_v6, %s4444_s30  ;;  %v1783_v6 = vld [vmem:[#allocation2 + $0x12a] sm:$0xff] }
 0x284   : > { %1687 = vrot.lane.b32.xlu0 %v1596_v62, %s4444_s30 }
 0x285   : > { %v1471_v11 = vpop.permute.xlu1 %1470 }
 0x286   : > { %1552 = vst.msk [vmem:[#allocation3 + $0x78] sm:$0xff] %vm1536_vm7, %v1471_v11  ;;  %v1475_v23 = vpop.permute.xlu0 %1474  ;;  %v1991_v11 = vld [vmem:[%s6926_s1 + $0x20] sm:$0xf] }
 0x287   : > { %1554 = vst.msk [vmem:[#allocation3 + $0x88] sm:$0xff] %vm1536_vm7, %v1475_v23  ;;  %1679 = vrot.lane.b32.xlu2 %v1592_v33, %s4444_s30  ;;  %4323 = vmatpush.msk.msra.mxu0 %vm2093_vm9, %v1991_v11  ;;  %v1990_v23 = vld [vmem:[%s6926_s1 + $0x18] sm:$0xff] }
 0x288   : > { %4392 = vmatpush.msk.msra.mxu3 %vm2093_vm9, %v1991_v11 }
 0x289   : > { %v1485_v13 = vpop.permute.xlu2 %1484  ;;  %2109 = vmatpush.msra.mxu0 %v1990_v23 }
 0x28a   : > { %1559 = vst.msk [vmem:[#allocation3 + $0xb0] sm:$0xff] %vm1536_vm7, %v1485_v13  ;;  %v1989_v13 = vld [vmem:[%s6926_s1 + $0x10] sm:$0xff]  ;;  %4393 = vmatpush.msra.mxu3 %v1990_v23 }
 0x28b   : > { %1689 = vrot.lane.b32.xlu1 %v5245_v60, %s4444_s30  ;;  %2110 = vmatpush.msra.mxu0 %v1989_v13 }
 0x28c   : > { %1693 = vrot.lane.b32.xlu0 %v1599_v18, %s4444_s30  ;;  %v1787_v18 = vld [vmem:[#allocation2 + $0x15a] sm:$0xff]  ;;  %4394 = vmatpush.msra.mxu3 %v1989_v13  ;;  %v7057_v13 = vmov 0.0  }
 0x28d   : > { %v1477_v3 = vpop.permute.xlu1 %1476  ;;  %2247 = vst.msk [vmem:[#allocation4 + $0x18] sm:$0xff] %vm2242_vm12, %v7057_v13 }
 0x28e   : > { %1555 = vst.msk [vmem:[#allocation3 + $0x90] sm:$0xff] %vm1536_vm7, %v1477_v3  ;;  %v1481_v14 = vpop.permute.xlu0 %1480  ;;  %v1988_v3 = vld [vmem:[%s6926_s1 + $0x8] sm:$0xff] }
 0x28f   : > { %1557 = vst.msk [vmem:[#allocation3 + $0xa0] sm:$0xff] %vm1536_vm7, %v1481_v14  ;;  %1685 = vrot.lane.b32.xlu2 %v1595_v25, %s4444_s30  ;;  %2111 = vmatpush.msra.mxu0 %v1988_v3 }
 0x290   : > { %4395 = vmatpush.msra.mxu3 %v1988_v3  ;;  %2248 = vst.msk [vmem:[#allocation4 + $0x20] sm:$0xff] %vm2242_vm12, %v7057_v13  ;;  %v1793_v3 = vld [vmem:[#allocation2 + $0x1a2] sm:$0xff] }
 0x291   : > { %v1491_v8 = vpop.permute.xlu2 %1490  ;;  %2243 = vst.msk [vmem:[#allocation4] sm:$0xff] %vm2242_vm12, %v7057_v13 }
 0x292   : > { %1562 = vst.msk [vmem:[#allocation3 + $0xc8] sm:$0xff] %vm1536_vm7, %v1491_v8  ;;  %v1788_v8 = vld [vmem:[#allocation2 + $0x16a] sm:$0xff] }
 0x293   : > { %1695 = vrot.lane.b32.xlu1 %v1600_v10, %s4444_s30  ;;  %2244 = vst.msk [vmem:[#allocation4 + $0x8] sm:$0xff] %vm2242_vm12, %v7057_v13 }
 0x294   : > { %1828 = vrot.lane.b32.xlu0 %v1763_v16, %s4445_s6  ;;  %v1987_v16 = vld [vmem:[%s6926_s1] sm:$0xff]  ;;  %2250 = vst.msk [vmem:[#allocation4 + $0x30] sm:$0xff] %vm2242_vm12, %v7057_v13 }
 0x295   : > { %v1483_v60 = vpop.permute.xlu1 %1482  ;;  %2112 = vmatpush.msra.mxu0 %v1987_v16  ;;  %4396 = vmatpush.msra.mxu3 %v1987_v16  ;;  %2251 = vst.msk [vmem:[#allocation4 + $0x38] sm:$0xff] %vm2242_vm12, %v7057_v13  ;;  %v1792_v16 = vld [vmem:[#allocation2 + $0x19a] sm:$0xff] }
 0x296   : > { %1558 = vst.msk [vmem:[#allocation3 + $0xa8] sm:$0xff] %vm1536_vm7, %v1483_v60  ;;  %v1487_v58 = vpop.permute.xlu0 %1486 }
 0x297   : > { %1560 = vst.msk [vmem:[#allocation3 + $0xb8] sm:$0xff] %vm1536_vm7, %v1487_v58  ;;  %1691 = vrot.lane.b32.xlu2 %v5256_v55, %s4444_s30 }
 0x298   : > { %2253 = vst.msk [vmem:[#allocation4 + $0x48] sm:$0xff] %vm2242_vm12, %v7057_v13 }
 0x299   : > { %v1497_v28 = vpop.permute.xlu2 %1496  ;;  %2254 = vst.msk [vmem:[#allocation4 + $0x50] sm:$0xff] %vm2242_vm12, %v7057_v13 }
 0x29a   : > { %1565 = vst.msk [vmem:[#allocation3 + $0xe0] sm:$0xff] %vm1536_vm7, %v1497_v28  ;;  %v1786_v28 = vld [vmem:[#allocation2 + $0x152] sm:$0xff] }
 0x29b   : > { %1830 = vrot.lane.b32.xlu1 %v1764_v15, %s4445_s6  ;;  %2256 = vst.msk [vmem:[#allocation4 + $0x60] sm:$0xff] %vm2242_vm12, %v7057_v13 }
 0x29c   : > { %1834 = vrot.lane.b32.xlu0 %v1766_v22, %s4445_s6  ;;  %2257 = vst.msk [vmem:[#allocation4 + $0x68] sm:$0xff] %vm2242_vm12, %v7057_v13 }
 0x29d   : > { %v1489_v7 = vpop.permute.xlu1 %1488  ;;  %2259 = vst.msk [vmem:[#allocation4 + $0x78] sm:$0xff] %vm2242_vm12, %v7057_v13 }
 0x29e   : > { %1561 = vst.msk [vmem:[#allocation3 + $0xc0] sm:$0xff] %vm1536_vm7, %v1489_v7  ;;  %v1493_v34 = vpop.permute.xlu0 %1492 }
 0x29f   : > { %1563 = vst.msk [vmem:[#allocation3 + $0xd0] sm:$0xff] %vm1536_vm7, %v1493_v34  ;;  %1826 = vrot.lane.b32.xlu2 %v1762_v17, %s4445_s6 }
 0x2a0   : > { %2260 = vst.msk [vmem:[#allocation4 + $0x80] sm:$0xff] %vm2242_vm12, %v7057_v13 }
 0x2a1   : > { %v1503_v55 = vpop.permute.xlu2 %1502  ;;  %2262 = vst.msk [vmem:[#allocation4 + $0x90] sm:$0xff] %vm2242_vm12, %v7057_v13 }
 0x2a2   : > { %1568 = vst.msk [vmem:[#allocation3 + $0xf8] sm:$0xff] %vm1536_vm7, %v1503_v55 }
 0x2a3   : > { %1836 = vrot.lane.b32.xlu1 %v1767_v21, %s4445_s6  ;;  %2263 = vst.msk [vmem:[#allocation4 + $0x98] sm:$0xff] %vm2242_vm12, %v7057_v13 }
 0x2a4   : > { %1840 = vrot.lane.b32.xlu0 %v1769_v1, %s4445_s6  ;;  %2265 = vst.msk [vmem:[#allocation4 + $0xa8] sm:$0xff] %vm2242_vm12, %v7057_v13 }
 0x2a5   : > { %v1495_v41 = vpop.permute.xlu1 %1494  ;;  %2266 = vst.msk [vmem:[#allocation4 + $0xb0] sm:$0xff] %vm2242_vm12, %v7057_v13 }
 0x2a6   : > { %1564 = vst.msk [vmem:[#allocation3 + $0xd8] sm:$0xff] %vm1536_vm7, %v1495_v41  ;;  %v1499_v24 = vpop.permute.xlu0 %1498  ;;  %v1789_v41 = vld [vmem:[#allocation2 + $0x172] sm:$0xff] }
 0x2a7   : > { %1566 = vst.msk [vmem:[#allocation3 + $0xe8] sm:$0xff] %vm1536_vm7, %v1499_v24  ;;  %1832 = vrot.lane.b32.xlu2 %v1765_v26, %s4445_s6 }
 0x2a8   : > { %2268 = vst.msk [vmem:[#allocation4 + $0xc0] sm:$0xff] %vm2242_vm12, %v7057_v13 }
 0x2a9   : > { %v1638_v32 = vpop.permute.xlu2 %1637  ;;  %2269 = vst.msk [vmem:[#allocation4 + $0xc8] sm:$0xff] %vm2242_vm12, %v7057_v13 }
 0x2aa   : > { %1732 = vst.msk [vmem:[#allocation3 + $0x10] sm:$0xff] %vm1729_vm8, %v1638_v32 }
 0x2ab   : > { %1842 = vrot.lane.b32.xlu1 %v1770_v9, %s4445_s6  ;;  %2271 = vst.msk [vmem:[#allocation4 + $0xd8] sm:$0xff] %vm2242_vm12, %v7057_v13 }
 0x2ac   : > { %1846 = vrot.lane.b32.xlu0 %v1772_v46, %s4445_s6  ;;  %2272 = vst.msk [vmem:[#allocation4 + $0xe0] sm:$0xff] %vm2242_vm12, %v7057_v13 }
 0x2ad   : > { %v1501_v38 = vpop.permute.xlu1 %1500  ;;  %2274 = vst.msk [vmem:[#allocation4 + $0xf0] sm:$0xff] %vm2242_vm12, %v7057_v13 }
 0x2ae   : > { %1567 = vst.msk [vmem:[#allocation3 + $0xf0] sm:$0xff] %vm1536_vm7, %v1501_v38  ;;  %v1634_v37 = vpop.permute.xlu0 %1633 }
 0x2af   : > { %1730 = vst.msk [vmem:[#allocation3] sm:$0xff] %vm1729_vm8, %v1634_v37  ;;  %1838 = vrot.lane.b32.xlu2 %v1768_v31, %s4445_s6 }
 0x2b0   : > { %2275 = vst.msk [vmem:[#allocation4 + $0xf8] sm:$0xff] %vm2242_vm12, %v7057_v13 }
 0x2b1   : > { %v1644_v54 = vpop.permute.xlu2 %1643  ;;  %2277 = vst.msk [vmem:[#allocation4 + $0x108] sm:$0xff] %vm2242_vm12, %v7057_v13 }
 0x2b2   : > { %1735 = vst.msk [vmem:[#allocation3 + $0x28] sm:$0xff] %vm1729_vm8, %v1644_v54 }
 0x2b3   : > { %1848 = vrot.lane.b32.xlu1 %v1773_v44, %s4445_s6  ;;  %2278 = vst.msk [vmem:[#allocation4 + $0x110] sm:$0xff] %vm2242_vm12, %v7057_v13 }
 0x2b4   : > { %1852 = vrot.lane.b32.xlu0 %v1775_v12, %s4445_s6  ;;  %2280 = vst.msk [vmem:[#allocation4 + $0x120] sm:$0xff] %vm2242_vm12, %v7057_v13 }
 0x2b5   : > { %v1636_v49 = vpop.permute.xlu1 %1635  ;;  %2281 = vst.msk [vmem:[#allocation4 + $0x128] sm:$0xff] %vm2242_vm12, %v7057_v13 }
 0x2b6   : > { %1731 = vst.msk [vmem:[#allocation3 + $0x8] sm:$0xff] %vm1729_vm8, %v1636_v49  ;;  %v1640_v57 = vpop.permute.xlu0 %1639 }
 0x2b7   : > { %1733 = vst.msk [vmem:[#allocation3 + $0x18] sm:$0xff] %vm1729_vm8, %v1640_v57  ;;  %1844 = vrot.lane.b32.xlu2 %v1771_v43, %s4445_s6 }
 0x2b8   : > { %2283 = vst.msk [vmem:[#allocation4 + $0x138] sm:$0xff] %vm2242_vm12, %v7057_v13 }
 0x2b9   : > { %v1650_v20 = vpop.permute.xlu2 %1649  ;;  %2284 = vst.msk [vmem:[#allocation4 + $0x140] sm:$0xff] %vm2242_vm12, %v7057_v13 }
 0x2ba   : > { %1738 = vst.msk [vmem:[#allocation3 + $0x40] sm:$0xff] %vm1729_vm8, %v1650_v20 }
 0x2bb   : > { %1854 = vrot.lane.b32.xlu1 %v1776_v19, %s4445_s6  ;;  %2286 = vst.msk [vmem:[#allocation4 + $0x150] sm:$0xff] %vm2242_vm12, %v7057_v13 }
 0x2bc   : > { %1858 = vrot.lane.b32.xlu0 %v1778_v48, %s4445_s6  ;;  %2287 = vst.msk [vmem:[#allocation4 + $0x158] sm:$0xff] %vm2242_vm12, %v7057_v13 }
 0x2bd   : > { %v1642_v35 = vpop.permute.xlu1 %1641  ;;  %2289 = vst.msk [vmem:[#allocation4 + $0x168] sm:$0xff] %vm2242_vm12, %v7057_v13 }
 0x2be   : > { %1734 = vst.msk [vmem:[#allocation3 + $0x20] sm:$0xff] %vm1729_vm8, %v1642_v35  ;;  %v1646_v36 = vpop.permute.xlu0 %1645 }
 0x2bf   : > { %1736 = vst.msk [vmem:[#allocation3 + $0x30] sm:$0xff] %vm1729_vm8, %v1646_v36  ;;  %1850 = vrot.lane.b32.xlu2 %v1774_v53, %s4445_s6 }
 0x2c0   : > { %2290 = vst.msk [vmem:[#allocation4 + $0x170] sm:$0xff] %vm2242_vm12, %v7057_v13 }
 0x2c1   : > { %v1656_v56 = vpop.permute.xlu2 %1655  ;;  %2292 = vst.msk [vmem:[#allocation4 + $0x180] sm:$0xff] %vm2242_vm12, %v7057_v13 }
 0x2c2   : > { %1741 = vst.msk [vmem:[#allocation3 + $0x58] sm:$0xff] %vm1729_vm8, %v1656_v56 }
 0x2c3   : > { %1860 = vrot.lane.b32.xlu1 %v1779_v52, %s4445_s6  ;;  %2293 = vst.msk [vmem:[#allocation4 + $0x188] sm:$0xff] %vm2242_vm12, %v7057_v13 }
 0x2c4   : > { %1864 = vrot.lane.b32.xlu0 %v1781_v51, %s4445_s6  ;;  %2295 = vst.msk [vmem:[#allocation4 + $0x198] sm:$0xff] %vm2242_vm12, %v7057_v13 }
 0x2c5   : > { %v1648_v4 = vpop.permute.xlu1 %1647  ;;  %2296 = vst.msk [vmem:[#allocation4 + $0x1a0] sm:$0xff] %vm2242_vm12, %v7057_v13 }
 0x2c6   : > { %1737 = vst.msk [vmem:[#allocation3 + $0x38] sm:$0xff] %vm1729_vm8, %v1648_v4  ;;  %v1652_v63 = vpop.permute.xlu0 %1651 }
 0x2c7   : > { %1739 = vst.msk [vmem:[#allocation3 + $0x48] sm:$0xff] %vm1729_vm8, %v1652_v63  ;;  %1856 = vrot.lane.b32.xlu2 %v1777_v61, %s4445_s6 }
 0x2c8   : > { %2249 = vst.msk [vmem:[#allocation4 + $0x28] sm:$0x3] %vm2245_vm13, %v7057_v13 }
 0x2c9   : > { %v1662_v0 = vpop.permute.xlu2 %1661  ;;  %2246 = vst.msk [vmem:[#allocation4 + $0x10] sm:$0x3] %vm2245_vm13, %v7057_v13 }
 0x2ca   : > { %1744 = vst.msk [vmem:[#allocation3 + $0x70] sm:$0xff] %vm1729_vm8, %v1662_v0 }
 0x2cb   : > { %1866 = vrot.lane.b32.xlu1 %v1782_v29, %s4445_s6  ;;  %2252 = vst.msk [vmem:[#allocation4 + $0x40] sm:$0x3] %vm2245_vm13, %v7057_v13 }
 0x2cc   : > { %1870 = vrot.lane.b32.xlu0 %v1784_v5, %s4445_s6  ;;  %2255 = vst.msk [vmem:[#allocation4 + $0x58] sm:$0x3] %vm2245_vm13, %v7057_v13 }
 0x2cd   : > { %v1654_v45 = vpop.permute.xlu1 %1653  ;;  %2258 = vst.msk [vmem:[#allocation4 + $0x70] sm:$0x3] %vm2245_vm13, %v7057_v13 }
 0x2ce   : > { %1740 = vst.msk [vmem:[#allocation3 + $0x50] sm:$0xff] %vm1729_vm8, %v1654_v45  ;;  %v1658_v27 = vpop.permute.xlu0 %1657 }
 0x2cf   : > { %1742 = vst.msk [vmem:[#allocation3 + $0x60] sm:$0xff] %vm1729_vm8, %v1658_v27  ;;  %1862 = vrot.lane.b32.xlu2 %v1780_v59, %s4445_s6 }
 0x2d0   : > { %2261 = vst.msk [vmem:[#allocation4 + $0x88] sm:$0x3] %vm2245_vm13, %v7057_v13 }
 0x2d1   : > { %v1668_v39 = vpop.permute.xlu2 %1667  ;;  %2264 = vst.msk [vmem:[#allocation4 + $0xa0] sm:$0x3] %vm2245_vm13, %v7057_v13 }
 0x2d2   : > { %1747 = vst.msk [vmem:[#allocation3 + $0x88] sm:$0xff] %vm1729_vm8, %v1668_v39 }
 0x2d3   : > { %1872 = vrot.lane.b32.xlu1 %v1785_v2, %s4445_s6  ;;  %2267 = vst.msk [vmem:[#allocation4 + $0xb8] sm:$0x3] %vm2245_vm13, %v7057_v13 }
 0x2d4   : > { %1876 = vrot.lane.b32.xlu0 %v1787_v18, %s4445_s6  ;;  %2270 = vst.msk [vmem:[#allocation4 + $0xd0] sm:$0x3] %vm2245_vm13, %v7057_v13 }
 0x2d5   : > { %v1660_v42 = vpop.permute.xlu1 %1659  ;;  %2273 = vst.msk [vmem:[#allocation4 + $0xe8] sm:$0x3] %vm2245_vm13, %v7057_v13 }
 0x2d6   : > { %1743 = vst.msk [vmem:[#allocation3 + $0x68] sm:$0xff] %vm1729_vm8, %v1660_v42  ;;  %v1664_v47 = vpop.permute.xlu0 %1663 }
 0x2d7   : > { %1745 = vst.msk [vmem:[#allocation3 + $0x78] sm:$0xff] %vm1729_vm8, %v1664_v47  ;;  %1868 = vrot.lane.b32.xlu2 %v1783_v6, %s4445_s6 }
 0x2d8   : > { %2276 = vst.msk [vmem:[#allocation4 + $0x100] sm:$0x3] %vm2245_vm13, %v7057_v13 }
 0x2d9   : > { %v1674_v62 = vpop.permute.xlu2 %1673  ;;  %2279 = vst.msk [vmem:[#allocation4 + $0x118] sm:$0x3] %vm2245_vm13, %v7057_v13 }
 0x2da   : > { %1750 = vst.msk [vmem:[#allocation3 + $0xa0] sm:$0xff] %vm1729_vm8, %v1674_v62 }
 0x2db   : > { %1878 = vrot.lane.b32.xlu1 %v1788_v8, %s4445_s6  ;;  %v2395_v8 = vld [vmem:[#allocation4 + $0x1] sm:$0xff]  ;;  %2282 = vst.msk [vmem:[#allocation4 + $0x130] sm:$0x3] %vm2245_vm13, %v7057_v13 }
 0x2dc   : > { %1882 = vrot.lane.b32.xlu0 %v5363_v50, %s4445_s6  ;;  %2285 = vst.msk [vmem:[#allocation4 + $0x148] sm:$0x3] %vm2245_vm13, %v7057_v13 }
 0x2dd   : > { %v1666_v30 = vpop.permute.xlu1 %1665  ;;  %2288 = vst.msk [vmem:[#allocation4 + $0x160] sm:$0x3] %vm2245_vm13, %v7057_v13 }
 0x2de   : > { %1746 = vst.msk [vmem:[#allocation3 + $0x80] sm:$0xff] %vm1729_vm8, %v1666_v30  ;;  %v1670_v33 = vpop.permute.xlu0 %1669 }
 0x2df   : > { %1748 = vst.msk [vmem:[#allocation3 + $0x90] sm:$0xff] %vm1729_vm8, %v1670_v33  ;;  %1874 = vrot.lane.b32.xlu2 %v1786_v28, %s4445_s6  ;;  %v5708_v28 = vld [vmem:[%s6927_s2] ss:$0 sm:$0xff] }
 0x2e0   : > { %2291 = vst.msk [vmem:[#allocation4 + $0x178] sm:$0x3] %vm2245_vm13, %v7057_v13 }
 0x2e1   : > { %v1680_v25 = vpop.permute.xlu2 %1679  ;;  %2294 = vst.msk [vmem:[#allocation4 + $0x190] sm:$0x3] %vm2245_vm13, %v7057_v13 }
 0x2e2   : > { %1753 = vst.msk [vmem:[#allocation3 + $0xb8] sm:$0xff] %vm1729_vm8, %v1680_v25 }
 0x2e3   : > { %1884 = vrot.lane.b32.xlu1 %v5348_v40, %s4445_s6  ;;  %2297 = vst.msk [vmem:[#allocation4 + $0x1a8] sm:$0x3] %vm2245_vm13, %v7057_v13 }
 0x2e4   : > { %1888 = vrot.lane.b32.xlu0 %v1793_v3, %s4445_s6 }
 0x2e5   : > { %v1672_v14 = vpop.permute.xlu1 %1671 }
 0x2e6   : > { %1749 = vst.msk [vmem:[#allocation3 + $0x98] sm:$0xff] %vm1729_vm8, %v1672_v14  ;;  %v1676_v10 = vpop.permute.xlu0 %1675 }
 0x2e7   : > { %1751 = vst.msk [vmem:[#allocation3 + $0xa8] sm:$0xff] %vm1729_vm8, %v1676_v10  ;;  %1880 = vrot.lane.b32.xlu2 %v1789_v41, %s4445_s6 }
 0x2e9   : > { %v1686_v60 = vpop.permute.xlu2 %1685 }
 0x2ea   : > { %1756 = vst.msk [vmem:[#allocation3 + $0xd0] sm:$0xff] %vm1729_vm8, %v1686_v60 }
 0x2eb   : > { %2459 = vrot.lane.b32.xlu1 %v2395_v8, %s4439_s25 }
 0x2ed   : > { %v1678_v58 = vpop.permute.xlu1 %1677 }
 0x2ee   : > { %1752 = vst.msk [vmem:[#allocation3 + $0xb0] sm:$0xff] %vm1729_vm8, %v1678_v58  ;;  %v1682_v15 = vpop.permute.xlu0 %1681 }
 0x2ef   : > { %1754 = vst.msk [vmem:[#allocation3 + $0xc0] sm:$0xff] %vm1729_vm8, %v1682_v15  ;;  %1886 = vrot.lane.b32.xlu2 %v1792_v16, %s4445_s6 }
 0x2f1   : > { %v1692_v22 = vpop.permute.xlu2 %1691 }
 0x2f2   : > { %1759 = vst.msk [vmem:[#allocation3 + $0xe8] sm:$0xff] %vm1729_vm8, %v1692_v22 }
 0x2f5   : > { %v1684_v17 = vpop.permute.xlu1 %1683 }
 0x2f6   : > { %1755 = vst.msk [vmem:[#allocation3 + $0xc8] sm:$0xff] %vm1729_vm8, %v1684_v17  ;;  %v1688_v50 = vpop.permute.xlu0 %1687 }
 0x2f7   : > { %1757 = vst.msk [vmem:[#allocation3 + $0xd8] sm:$0xff] %vm1729_vm8, %v1688_v50 }
 0x2f9   : > { %v1827_v7 = vpop.permute.xlu2 %1826 }
 0x2fa   : > { %1923 = vst.msk [vmem:[#allocation3] sm:$0xff] %vm1922_vm10, %v1827_v7 }
 0x2fd   : > { %v1690_v34 = vpop.permute.xlu1 %1689 }
 0x2fe   : > { %1758 = vst.msk [vmem:[#allocation3 + $0xe0] sm:$0xff] %vm1729_vm8, %v1690_v34  ;;  %v1694_v21 = vpop.permute.xlu0 %1693 }
 0x2ff   : > { %1760 = vst.msk [vmem:[#allocation3 + $0xf0] sm:$0xff] %vm1729_vm8, %v1694_v21 }
 0x301   : > { %v1955_v40 = vld [vmem:[#allocation3] sm:$0xff]  ;;  %v1833_v55 = vpop.permute.xlu2 %1832 }
 0x302   : > { %4324 = vmatmul.msk.f32.vlgmr.msra.gmra.mxu0 %vm1996_vm11, %v1955_v40  ;;  %1926 = vst.msk [vmem:[#allocation3 + $0x18] sm:$0xff] %vm1922_vm10, %v1833_v55 }
 0x305   : > { %v1696_v1 = vpop.permute.xlu1 %1695 }
 0x306   : > { %1761 = vst.msk [vmem:[#allocation3 + $0xf8] sm:$0xff] %vm1729_vm8, %v1696_v1  ;;  %v1829_v26 = vpop.permute.xlu0 %1828 }
 0x307   : > { %1924 = vst.msk [vmem:[#allocation3 + $0x8] sm:$0xff] %vm1922_vm10, %v1829_v26 }
 0x309   : > { %v1839_v24 = vpop.permute.xlu2 %1838  ;;  %v1958_v12 = vld [vmem:[#allocation3 + $0x18] sm:$0xff] }
 0x30a   : > { %1929 = vst.msk [vmem:[#allocation3 + $0x30] sm:$0xff] %vm1922_vm10, %v1839_v24 }
 0x30d   : > { %v1831_v9 = vpop.permute.xlu1 %1830 }
 0x30e   : > { %1925 = vst.msk [vmem:[#allocation3 + $0x10] sm:$0xff] %vm1922_vm10, %v1831_v9  ;;  %v1956_v32 = vld [vmem:[#allocation3 + $0x8] sm:$0xff]  ;;  %v1835_v46 = vpop.permute.xlu0 %1834 }
 0x30f   : > { %4325 = vmatmul.msk.f32.gmra.mxu0 %vm1996_vm11, %v1956_v32  ;;  %1927 = vst.msk [vmem:[#allocation3 + $0x20] sm:$0xff] %vm1922_vm10, %v1835_v46  ;;  %v2396_v9 = vld [vmem:[#allocation4 + $0x9] sm:$0xff] }
 0x310   : > { %2461 = vrot.lane.b32.xlu2 %v2396_v9, %s4439_s25 }
 0x311   : > { %v1845_v31 = vpop.permute.xlu2 %1844  ;;  %v1961_v61 = vld [vmem:[#allocation3 + $0x30] sm:$0xff] }
 0x312   : > { %1932 = vst.msk [vmem:[#allocation3 + $0x48] sm:$0xff] %vm1922_vm10, %v1845_v31 }
 0x315   : > { %v1837_v38 = vpop.permute.xlu1 %1836  ;;  %v1957_v37 = vld [vmem:[#allocation3 + $0x10] sm:$0xff] }
 0x316   : > { %1928 = vst.msk [vmem:[#allocation3 + $0x28] sm:$0xff] %vm1922_vm10, %v1837_v38  ;;  %v1841_v44 = vpop.permute.xlu0 %1840  ;;  %v1959_v19 = vld [vmem:[#allocation3 + $0x20] sm:$0xff] }
 0x317   : > { %4326 = vmatmul.msk.f32.gmra.mxu0 %vm1996_vm11, %v1957_v37  ;;  %1930 = vst.msk [vmem:[#allocation3 + $0x38] sm:$0xff] %vm1922_vm10, %v1841_v44 }
 0x319   : > { %v1851_v54 = vpop.permute.xlu2 %1850  ;;  %v1964_v42 = vld [vmem:[#allocation3 + $0x48] sm:$0xff] }
 0x31a   : > { %1935 = vst.msk [vmem:[#allocation3 + $0x60] sm:$0xff] %vm1922_vm10, %v1851_v54 }
 0x31d   : > { %v1843_v43 = vpop.permute.xlu1 %1842  ;;  %v1960_v36 = vld [vmem:[#allocation3 + $0x28] sm:$0xff] }
 0x31e   : > { %1931 = vst.msk [vmem:[#allocation3 + $0x40] sm:$0xff] %vm1922_vm10, %v1843_v43  ;;  %v1847_v49 = vpop.permute.xlu0 %1846  ;;  %v1962_v0 = vld [vmem:[#allocation3 + $0x38] sm:$0xff] }
 0x31f   : > { %4327 = vmatmul.msk.f32.gmra.mxu0 %vm1996_vm11, %v1958_v12  ;;  %1933 = vst.msk [vmem:[#allocation3 + $0x50] sm:$0xff] %vm1922_vm10, %v1847_v49 }
 0x321   : > { %v1857_v57 = vpop.permute.xlu2 %1856  ;;  %v1967_v25 = vld [vmem:[#allocation3 + $0x60] sm:$0xff] }
 0x322   : > { %1938 = vst.msk [vmem:[#allocation3 + $0x78] sm:$0xff] %vm1922_vm10, %v1857_v57 }
 0x325   : > { %v1849_v20 = vpop.permute.xlu1 %1848  ;;  %v1963_v27 = vld [vmem:[#allocation3 + $0x40] sm:$0xff] }
 0x326   : > { %1934 = vst.msk [vmem:[#allocation3 + $0x58] sm:$0xff] %vm1922_vm10, %v1849_v20  ;;  %v1853_v48 = vpop.permute.xlu0 %1852  ;;  %v1965_v62 = vld [vmem:[#allocation3 + $0x50] sm:$0xff] }
 0x327   : > { %4328 = vmatmul.msk.f32.gmra.mxu0 %vm1996_vm11, %v1959_v19  ;;  %1936 = vst.msk [vmem:[#allocation3 + $0x68] sm:$0xff] %vm1922_vm10, %v1853_v48 }
 0x329   : > { %v1863_v53 = vpop.permute.xlu2 %1862  ;;  %v1970_v22 = vld [vmem:[#allocation3 + $0x78] sm:$0xff] }
 0x32a   : > { %1941 = vst.msk [vmem:[#allocation3 + $0x90] sm:$0xff] %vm1922_vm10, %v1863_v53 }
 0x32d   : > { %v1855_v35 = vpop.permute.xlu1 %1854  ;;  %v1966_v11 = vld [vmem:[#allocation3 + $0x58] sm:$0xff] }
 0x32e   : > { %1937 = vst.msk [vmem:[#allocation3 + $0x70] sm:$0xff] %vm1922_vm10, %v1855_v35  ;;  %v1859_v52 = vpop.permute.xlu0 %1858  ;;  %v1968_v10 = vld [vmem:[#allocation3 + $0x68] sm:$0xff] }
 0x32f   : > { %4329 = vmatmul.msk.f32.gmra.mxu0 %vm1996_vm11, %v1960_v36  ;;  %1939 = vst.msk [vmem:[#allocation3 + $0x80] sm:$0xff] %vm1922_vm10, %v1859_v52 }
 0x331   : > { %v1869_v56 = vpop.permute.xlu2 %1868  ;;  %v1973_v59 = vld [vmem:[#allocation3 + $0x90] sm:$0xff] }
 0x332   : > { %1944 = vst.msk [vmem:[#allocation3 + $0xa8] sm:$0xff] %vm1922_vm10, %v1869_v56 }
 0x335   : > { %v1861_v51 = vpop.permute.xlu1 %1860  ;;  %v1969_v58 = vld [vmem:[#allocation3 + $0x70] sm:$0xff] }
 0x336   : > { %1940 = vst.msk [vmem:[#allocation3 + $0x88] sm:$0xff] %vm1922_vm10, %v1861_v51  ;;  %v1865_v4 = vpop.permute.xlu0 %1864  ;;  %v1971_v21 = vld [vmem:[#allocation3 + $0x80] sm:$0xff] }
 0x337   : > { %4330 = vmatmul.msk.f32.gmra.mxu0 %vm1996_vm11, %v1961_v61  ;;  %1942 = vst.msk [vmem:[#allocation3 + $0x98] sm:$0xff] %vm1922_vm10, %v1865_v4 }
 0x339   : > { %v1875_v2 = vpop.permute.xlu2 %1874  ;;  %v1976_v33 = vld [vmem:[#allocation3 + $0xa8] sm:$0xff] }
 0x33a   : > { %1947 = vst.msk [vmem:[#allocation3 + $0xc0] sm:$0xff] %vm1922_vm10, %v1875_v2 }
 0x33d   : > { %v1972_v63 = vld [vmem:[#allocation3 + $0x88] sm:$0xff]  ;;  %v1867_v29 = vpop.permute.xlu1 %1866 }
 0x33e   : > { %4341 = vmatmul.msk.f32.vlgmr.msra.gmra.mxu3 %vm1996_vm11, %v1972_v63  ;;  %1943 = vst.msk [vmem:[#allocation3 + $0xa0] sm:$0xff] %vm1922_vm10, %v1867_v29  ;;  %v1871_v5 = vpop.permute.xlu0 %1870  ;;  %v1974_v39 = vld [vmem:[#allocation3 + $0x98] sm:$0xff] }
 0x33f   : > { %4331 = vmatmul.msk.f32.gmra.mxu0 %vm1996_vm11, %v1962_v0  ;;  %1945 = vst.msk [vmem:[#allocation3 + $0xb0] sm:$0xff] %vm1922_vm10, %v1871_v5 }
 0x341   : > { %v1881_v23 = vpop.permute.xlu2 %1880  ;;  %v1979_v60 = vld [vmem:[#allocation3 + $0xc0] sm:$0xff] }
 0x342   : > { %1950 = vst.msk [vmem:[#allocation3 + $0xd8] sm:$0xff] %vm1922_vm10, %v1881_v23 }
 0x345   : > { %v1873_v45 = vpop.permute.xlu1 %1872  ;;  %v1975_v6 = vld [vmem:[#allocation3 + $0xa0] sm:$0xff] }
 0x346   : > { %4342 = vmatmul.msk.f32.gmra.mxu3 %vm1996_vm11, %v1973_v59  ;;  %1946 = vst.msk [vmem:[#allocation3 + $0xb8] sm:$0xff] %vm1922_vm10, %v1873_v45  ;;  %v1877_v47 = vpop.permute.xlu0 %1876  ;;  %v1977_v18 = vld [vmem:[#allocation3 + $0xb0] sm:$0xff] }
 0x347   : > { %4332 = vmatmul.msk.f32.gmra.mxu0 %vm1996_vm11, %v1963_v27  ;;  %1948 = vst.msk [vmem:[#allocation3 + $0xc8] sm:$0xff] %vm1922_vm10, %v1877_v47 }
 0x349   : > { %v1982_v55 = vld [vmem:[#allocation3 + $0xd8] sm:$0xff] }
 0x34d   : > { %v1879_v30 = vpop.permute.xlu1 %1878  ;;  %v1978_v14 = vld [vmem:[#allocation3 + $0xb8] sm:$0xff] }
 0x34e   : > { %4343 = vmatmul.msk.f32.gmra.mxu3 %vm1996_vm11, %v1974_v39  ;;  %1949 = vst.msk [vmem:[#allocation3 + $0xd0] sm:$0xff] %vm1922_vm10, %v1879_v30  ;;  %v1980_v15 = vld [vmem:[#allocation3 + $0xc8] sm:$0xff]  ;;  %v1883_v40 = vpop.permute.xlu0 %1882 }
 0x34f   : > { %4333 = vmatmul.msk.f32.gmra.mxu0 %vm1996_vm11, %v1964_v42  ;;  %1951 = vst.msk [vmem:[#allocation3 + $0xe0] sm:$0xff] %vm1922_vm10, %v1883_v40 }
 0x355   : > { %v1981_v34 = vld [vmem:[#allocation3 + $0xd0] sm:$0xff]  ;;  %v1885_v37 = vpop.permute.xlu1 %1884 }
 0x356   : > { %4344 = vmatmul.msk.f32.gmra.mxu3 %vm1996_vm11, %v1975_v6  ;;  %v1983_v32 = vld [vmem:[#allocation3 + $0xe0] sm:$0xff]  ;;  %1952 = vst.msk [vmem:[#allocation3 + $0xe8] sm:$0xff] %vm1922_vm10, %v1885_v37 }
 0x357   : > { %4334 = vmatmul.msk.f32.gmra.mxu0 %vm1996_vm11, %v1965_v62 }
 0x35d   : > { %v1984_v19 = vld [vmem:[#allocation3 + $0xe8] sm:$0xff] }
 0x35e   : > { %4345 = vmatmul.msk.f32.gmra.mxu3 %vm1996_vm11, %v1976_v33 }
 0x35f   : > { %4335 = vmatmul.msk.f32.gmra.mxu0 %vm1996_vm11, %v1966_v11 }
 0x366   : > { %4346 = vmatmul.msk.f32.gmra.mxu3 %vm1996_vm11, %v1977_v18 }
 0x367   : > { %4336 = vmatmul.msk.f32.gmra.mxu0 %vm1996_vm11, %v1967_v25 }
 0x36e   : > { %4347 = vmatmul.msk.f32.gmra.mxu3 %vm1996_vm11, %v1978_v14 }
 0x36f   : > { %4337 = vmatmul.msk.f32.gmra.mxu0 %vm1996_vm11, %v1968_v10 }
 0x376   : > { %4348 = vmatmul.msk.f32.gmra.mxu3 %vm1996_vm11, %v1979_v60  ;;  %v1887_v60 = vpop.permute.xlu2 %1886 }
 0x377   : > { %4338 = vmatmul.msk.f32.gmra.mxu0 %vm1996_vm11, %v1969_v58  ;;  %1953 = vst.msk [vmem:[#allocation3 + $0xf0] sm:$0xff] %vm1922_vm10, %v1887_v60 }
 0x37e   : > { %4349 = vmatmul.msk.f32.gmra.mxu3 %vm1996_vm11, %v1980_v15 }
 0x37f   : > { %4339 = vmatmul.msk.f32.gmra.mxu0 %vm1996_vm11, %v1970_v22  ;;  %v2114_v17 = vpop.f32.mrf.mxu0 }
 0x380   : > { %v2115_v50 = vadd.f32 %v5708_v28, %v2114_v17 }
 0x382   : > { %v2210_v7 = vmax.f32 %v2115_v50, 0.0 }
 0x384   : > { %2299 = vst.msk [vmem:[#allocation4 + $0x19] sm:$0xff] %vm2242_vm12, %v2210_v7 }
 0x386   : > { %4350 = vmatmul.msk.f32.gmra.mxu3 %vm1996_vm11, %v1981_v34 }
 0x387   : > { %4340 = vmatmul.msk.f32.gmra.mxu0 %vm1996_vm11, %v1971_v21 }
 0x38b   : > { %v5745_v1 = vld [vmem:[#allocation4 + $0x19] sm:$0xff] }
 0x38c   : > { %v2117_v26 = vpop.f32.mrf.mxu0  ;;  %2463 = vrot.lane.b32.xlu0 %v5745_v1, %s4439_s25  ;;  %v5791_v12 = vld [vmem:[#allocation4 + $0x18] sm:$0xff] }
 0x38d   : > { %v2118_v41 = vadd.f32 %v5708_v28, %v2117_v26  ;;  %2365 = vst.msk [vmem:[#allocation5 + $0x10] sm:$0xff] %vm2242_vm12, %v5791_v12 }
 0x38e   : > { %4351 = vmatmul.msk.f32.gmra.mxu3 %vm1996_vm11, %v1982_v55  ;;  %v2332_v55 = vld [vmem:[#allocation4 + $0x8] sm:$0xff] }
 0x38f   : > { %v2211_v24 = vmax.f32 %v2118_v41, 0.0  ;;  %2364 = vst.msk [vmem:[#allocation5 + $0x8] sm:$0xff] %vm2242_vm12, %v2332_v55 }
 0x391   : > { %2300 = vst.msk [vmem:[#allocation4 + $0x21] sm:$0xff] %vm2242_vm12, %v2211_v24 }
 0x394   : > { %v2120_v46 = vpop.f32.mrf.mxu0 }
 0x395   : > { %v2121_v31 = vadd.f32 %v5708_v28, %v2120_v46 }
 0x396   : > { %4352 = vmatmul.msk.f32.gmra.mxu3 %vm1996_vm11, %v1983_v32 }
 0x397   : > { %v2212_v44 = vmax.f32 %v2121_v31, 0.0 }
 0x398   : > { %v5779_v38 = vld [vmem:[#allocation4 + $0x21] sm:$0xff] }
 0x399   : > { %2465 = vrot.lane.b32.xlu1 %v5779_v38, %s4439_s25  ;;  %v5795_v49 = vld [vmem:[#allocation4 + $0x20] sm:$0xff]  ;;  %2301 = vst.msk [vmem:[#allocation4 + $0x31] sm:$0xff] %vm2242_vm12, %v2212_v44  ;;  %v1889_v44 = vpop.permute.xlu0 %1888 }
 0x39a   : > { %2366 = vst.msk [vmem:[#allocation5 + $0x18] sm:$0xff] %vm2242_vm12, %v5795_v49 }
 0x39b   : > { %1954 = vst.msk [vmem:[#allocation3 + $0xf8] sm:$0xff] %vm1922_vm10, %v1889_v44 }
 0x39c   : > { %v2123_v54 = vpop.f32.mrf.mxu0 }
 0x39d   : > { %v2124_v43 = vadd.f32 %v5708_v28, %v2123_v54 }
 0x39e   : > { %4353 = vmatmul.msk.f32.gmra.mxu3 %vm1996_vm11, %v1984_v19 }
 0x39f   : > { %v2213_v57 = vmax.f32 %v2124_v43, 0.0 }
 0x3a0   : > { %v5804_v48 = vld [vmem:[#allocation4 + $0x31] sm:$0xff] }
 0x3a1   : > { %2302 = vst.msk [vmem:[#allocation4 + $0x39] sm:$0xff] %vm2242_vm12, %v2213_v57  ;;  %v5807_v35 = vld [vmem:[#allocation4 + $0x30] sm:$0xff]  ;;  %2467 = vrot.lane.b32.xlu2 %v5804_v48, %s4439_s25 }
 0x3a2   : > { %2367 = vst.msk [vmem:[#allocation5 + $0x20] sm:$0xff] %vm2242_vm12, %v5807_v35 }
 0x3a4   : > { %v2126_v20 = vpop.f32.mrf.mxu0 }
 0x3a5   : > { %v2127_v53 = vadd.f32 %v5708_v28, %v2126_v20 }
 0x3a7   : > { %v2214_v36 = vmax.f32 %v2127_v53, 0.0 }
 0x3a8   : > { %v5813_v52 = vld [vmem:[#allocation4 + $0x39] sm:$0xff] }
 0x3a9   : > { %v5815_v56 = vld [vmem:[#allocation4 + $0x38] sm:$0xff]  ;;  %2303 = vst.msk [vmem:[#allocation4 + $0x49] sm:$0xff] %vm2242_vm12, %v2214_v36  ;;  %2469 = vrot.lane.b32.xlu0 %v5813_v52, %s4439_s25 }
 0x3aa   : > { %2368 = vst.msk [vmem:[#allocation5 + $0x28] sm:$0xff] %vm2242_vm12, %v5815_v56 }
 0x3ac   : > { %v2129_v51 = vpop.f32.mrf.mxu0 }
 0x3ad   : > { %v2130_v61 = vadd.f32 %v5708_v28, %v2129_v51 }
 0x3af   : > { %v2215_v4 = vmax.f32 %v2130_v61, 0.0 }
 0x3b0   : > { %v5823_v63 = vld [vmem:[#allocation4 + $0x49] sm:$0xff] }
 0x3b1   : > { %v5825_v29 = vld [vmem:[#allocation4 + $0x48] sm:$0xff]  ;;  %2304 = vst.msk [vmem:[#allocation4 + $0x51] sm:$0xff] %vm2242_vm12, %v2215_v4  ;;  %2471 = vrot.lane.b32.xlu1 %v5823_v63, %s4439_s25  ;;  %v2331_v4 = vld [vmem:[#allocation4] sm:$0xff] }
 0x3b2   : > { %2369 = vst.msk [vmem:[#allocation5 + $0x30] sm:$0xff] %vm2242_vm12, %v5825_v29 }
 0x3b3   : > { %2363 = vst.msk [vmem:[#allocation5] sm:$0xff] %vm2242_vm12, %v2331_v4 }
 0x3b4   : > { %v2132_v0 = vpop.f32.mrf.mxu0 }
 0x3b5   : > { %v2133_v5 = vadd.f32 %v5708_v28, %v2132_v0 }
 0x3b7   : > { %v2216_v59 = vmax.f32 %v2133_v5, 0.0  ;;  %v2460_v5 = vpop.permute.xlu1 %2459 }
 0x3b8   : > { %v5833_v45 = vld [vmem:[#allocation4 + $0x51] sm:$0xff]  ;;  %2556 = vst.msk [vmem:[#allocation5] sm:$0xff] %vm2555_vm14, %v2460_v5 }
 0x3b9   : > { %v5835_v27 = vld [vmem:[#allocation4 + $0x50] sm:$0xff]  ;;  %2305 = vst.msk [vmem:[#allocation4 + $0x61] sm:$0xff] %vm2242_vm12, %v2216_v59  ;;  %2473 = vrot.lane.b32.xlu2 %v5833_v45, %s4439_s25 }
 0x3ba   : > { %2370 = vst.msk [vmem:[#allocation5 + $0x38] sm:$0xff] %vm2242_vm12, %v5835_v27 }
 0x3bc   : > { %v2135_v2 = vpop.f32.mrf.mxu0 }
 0x3bd   : > { %v2136_v39 = vadd.f32 %v5708_v28, %v2135_v2 }
 0x3bf   : > { %v2217_v42 = vmax.f32 %v2136_v39, 0.0 }
 0x3c0   : > { %v5843_v47 = vld [vmem:[#allocation4 + $0x61] sm:$0xff] }
 0x3c1   : > { %v5845_v6 = vld [vmem:[#allocation4 + $0x60] sm:$0xff]  ;;  %2306 = vst.msk [vmem:[#allocation4 + $0x69] sm:$0xff] %vm2242_vm12, %v2217_v42  ;;  %v2165_v62 = vpop.f32.mrf.mxu3  ;;  %2475 = vrot.lane.b32.xlu0 %v5843_v47, %s4439_s25 }
 0x3c2   : > { %v2166_v30 = vadd.f32 %v5708_v28, %v2165_v62  ;;  %2371 = vst.msk [vmem:[#allocation5 + $0x40] sm:$0xff] %vm2242_vm12, %v5845_v6 }
 0x3c4   : > { %v2227_v33 = vmax.f32 %v2166_v30, 0.0  ;;  %v2138_v11 = vpop.f32.mrf.mxu0 }
 0x3c5   : > { %v2139_v23 = vadd.f32 %v5708_v28, %v2138_v11 }
 0x3c6   : > { %2316 = vst.msk [vmem:[#allocation4 + $0xe1] sm:$0xff] %vm2242_vm12, %v2227_v33 }
 0x3c7   : > { %v2218_v18 = vmax.f32 %v2139_v23, 0.0  ;;  %v2462_v23 = vpop.permute.xlu2 %2461 }
 0x3c8   : > { %v5855_v13 = vld [vmem:[#allocation4 + $0x69] sm:$0xff]  ;;  %2557 = vst.msk [vmem:[#allocation5 + $0x8] sm:$0xff] %vm2555_vm14, %v2462_v23 }
 0x3c9   : > { %v5857_v25 = vld [vmem:[#allocation4 + $0x68] sm:$0xff]  ;;  %2307 = vst.msk [vmem:[#allocation4 + $0x79] sm:$0xff] %vm2242_vm12, %v2218_v18  ;;  %v2168_v3 = vpop.f32.mrf.mxu3  ;;  %2477 = vrot.lane.b32.xlu1 %v5855_v13, %s4439_s25 }
 0x3ca   : > { %v2169_v14 = vadd.f32 %v5708_v28, %v2168_v3  ;;  %2372 = vst.msk [vmem:[#allocation5 + $0x48] sm:$0xff] %vm2242_vm12, %v5857_v25 }
 0x3cc   : > { %v2228_v10 = vmax.f32 %v2169_v14, 0.0  ;;  %v2141_v16 = vpop.f32.mrf.mxu0 }
 0x3cd   : > { %v2142_v8 = vadd.f32 %v5708_v28, %v2141_v16 }
 0x3ce   : > { %2317 = vst.msk [vmem:[#allocation4 + $0xf1] sm:$0xff] %vm2242_vm12, %v2228_v10 }
 0x3cf   : > { %v2219_v58 = vmax.f32 %v2142_v8, 0.0 }
 0x3d0   : > { %v5868_v15 = vld [vmem:[#allocation4 + $0x79] sm:$0xff] }
 0x3d1   : > { %v5870_v22 = vld [vmem:[#allocation4 + $0x78] sm:$0xff]  ;;  %2308 = vst.msk [vmem:[#allocation4 + $0x81] sm:$0xff] %vm2242_vm12, %v2219_v58  ;;  %v2171_v17 = vpop.f32.mrf.mxu3  ;;  %2479 = vrot.lane.b32.xlu2 %v5868_v15, %s4439_s25 }
 0x3d2   : > { %v2172_v50 = vadd.f32 %v5708_v28, %v2171_v17  ;;  %2373 = vst.msk [vmem:[#allocation5 + $0x50] sm:$0xff] %vm2242_vm12, %v5870_v22 }
 0x3d4   : > { %v2229_v7 = vmax.f32 %v2172_v50, 0.0  ;;  %v2144_v34 = vpop.f32.mrf.mxu0 }
 0x3d5   : > { %v2145_v21 = vadd.f32 %v5708_v28, %v2144_v34  ;;  %v5879_v40 = vld [vmem:[#allocation4 + $0xf0] sm:$0xff] }
 0x3d6   : > { %2318 = vst.msk [vmem:[#allocation4 + $0xf9] sm:$0xff] %vm2242_vm12, %v2229_v7 }
 0x3d7   : > { %v2220_v26 = vmax.f32 %v2145_v21, 0.0  ;;  %2383 = vst.msk [vmem:[#allocation5 + $0xa0] sm:$0xff] %vm2242_vm12, %v5879_v40 }
 0x3d8   : > { %v5883_v41 = vld [vmem:[#allocation4 + $0x81] sm:$0xff] }
 0x3d9   : > { %v5885_v24 = vld [vmem:[#allocation4 + $0x80] sm:$0xff]  ;;  %2309 = vst.msk [vmem:[#allocation4 + $0x91] sm:$0xff] %vm2242_vm12, %v2220_v26  ;;  %v2174_v9 = vpop.f32.mrf.mxu3  ;;  %2481 = vrot.lane.b32.xlu0 %v5883_v41, %s4439_s25 }
 0x3da   : > { %v2175_v32 = vadd.f32 %v5708_v28, %v2174_v9  ;;  %2374 = vst.msk [vmem:[#allocation5 + $0x58] sm:$0xff] %vm2242_vm12, %v5885_v24 }
 0x3dc   : > { %v2230_v46 = vmax.f32 %v2175_v32, 0.0  ;;  %v2147_v31 = vpop.f32.mrf.mxu0 }
 0x3dd   : > { %v2148_v37 = vadd.f32 %v5708_v28, %v2147_v31  ;;  %v5897_v54 = vld [vmem:[#allocation4 + $0xf8] sm:$0xff] }
 0x3de   : > { %2319 = vst.msk [vmem:[#allocation4 + $0x109] sm:$0xff] %vm2242_vm12, %v2230_v46 }
 0x3df   : > { %v2221_v43 = vmax.f32 %v2148_v37, 0.0  ;;  %2384 = vst.msk [vmem:[#allocation5 + $0xa8] sm:$0xff] %vm2242_vm12, %v5897_v54 }
 0x3e0   : > { %v5900_v57 = vld [vmem:[#allocation4 + $0x91] sm:$0xff] }
 0x3e1   : > { %v5902_v19 = vld [vmem:[#allocation4 + $0x90] sm:$0xff]  ;;  %2310 = vst.msk [vmem:[#allocation4 + $0x99] sm:$0xff] %vm2242_vm12, %v2221_v43  ;;  %v2177_v20 = vpop.f32.mrf.mxu3  ;;  %2483 = vrot.lane.b32.xlu1 %v5900_v57, %s4439_s25 }
 0x3e2   : > { %v2178_v53 = vadd.f32 %v5708_v28, %v2177_v20  ;;  %2375 = vst.msk [vmem:[#allocation5 + $0x60] sm:$0xff] %vm2242_vm12, %v5902_v19 }
 0x3e4   : > { %v2231_v36 = vmax.f32 %v2178_v53, 0.0  ;;  %v2150_v51 = vpop.f32.mrf.mxu0 }
 0x3e5   : > { %v2151_v61 = vadd.f32 %v5708_v28, %v2150_v51  ;;  %v5920_v39 = vld [vmem:[#allocation4 + $0x108] sm:$0xff] }
 0x3e6   : > { %2320 = vst.msk [vmem:[#allocation4 + $0x111] sm:$0xff] %vm2242_vm12, %v2231_v36 }
 0x3e7   : > { %v2222_v0 = vmax.f32 %v2151_v61, 0.0  ;;  %2385 = vst.msk [vmem:[#allocation5 + $0xb0] sm:$0xff] %vm2242_vm12, %v5920_v39 }
 0x3e8   : > { %v5915_v59 = vld [vmem:[#allocation4 + $0x99] sm:$0xff] }
 0x3e9   : > { %v5918_v2 = vld [vmem:[#allocation4 + $0x98] sm:$0xff]  ;;  %2311 = vst.msk [vmem:[#allocation4 + $0xa9] sm:$0xff] %vm2242_vm12, %v2222_v0  ;;  %v2180_v42 = vpop.f32.mrf.mxu3  ;;  %2485 = vrot.lane.b32.xlu2 %v5915_v59, %s4439_s25 }
 0x3ea   : > { %v2181_v62 = vadd.f32 %v5708_v28, %v2180_v42  ;;  %2376 = vst.msk [vmem:[#allocation5 + $0x68] sm:$0xff] %vm2242_vm12, %v5918_v2 }
 0x3ec   : > { %v2232_v30 = vmax.f32 %v2181_v62, 0.0  ;;  %v2153_v33 = vpop.f32.mrf.mxu0  ;;  %v5987_v62 = vld [vmem:[#allocation4 + $0xe1] sm:$0xff] }
 0x3ed   : > { %v2154_v11 = vadd.f32 %v5708_v28, %v2153_v33  ;;  %v5932_v18 = vld [vmem:[#allocation4 + $0x110] sm:$0xff] }
 0x3ee   : > { %2321 = vst.msk [vmem:[#allocation4 + $0x121] sm:$0xff] %vm2242_vm12, %v2232_v30 }
 0x3ef   : > { %v2223_v3 = vmax.f32 %v2154_v11, 0.0  ;;  %2386 = vst.msk [vmem:[#allocation5 + $0xb8] sm:$0xff] %vm2242_vm12, %v5932_v18 }
 0x3f0   : > { %v5935_v14 = vld [vmem:[#allocation4 + $0xa9] sm:$0xff] }
 0x3f1   : > { %v5937_v10 = vld [vmem:[#allocation4 + $0xa8] sm:$0xff]  ;;  %2312 = vst.msk [vmem:[#allocation4 + $0xb1] sm:$0xff] %vm2242_vm12, %v2223_v3  ;;  %v2183_v16 = vpop.f32.mrf.mxu3  ;;  %2487 = vrot.lane.b32.xlu0 %v5935_v14, %s4439_s25 }
 0x3f2   : > { %v2184_v8 = vadd.f32 %v5708_v28, %v2183_v16  ;;  %2377 = vst.msk [vmem:[#allocation5 + $0x70] sm:$0xff] %vm2242_vm12, %v5937_v10 }
 0x3f4   : > { %v2233_v60 = vmax.f32 %v2184_v8, 0.0  ;;  %v2156_v58 = vpop.f32.mrf.mxu0 }
 0x3f5   : > { %v2157_v17 = vadd.f32 %v5708_v28, %v2156_v58  ;;  %v5948_v50 = vld [vmem:[#allocation4 + $0x120] sm:$0xff]  ;;  %v6009_v58 = vld [vmem:[#allocation4 + $0x109] sm:$0xff] }
 0x3f6   : > { %2322 = vst.msk [vmem:[#allocation4 + $0x129] sm:$0xff] %vm2242_vm12, %v2233_v60 }
 0x3f7   : > { %v2224_v7 = vmax.f32 %v2157_v17, 0.0  ;;  %2387 = vst.msk [vmem:[#allocation5 + $0xc0] sm:$0xff] %vm2242_vm12, %v5948_v50 }
 0x3f8   : > { %v5953_v34 = vld [vmem:[#allocation4 + $0xb1] sm:$0xff] }
 0x3f9   : > { %2313 = vst.msk [vmem:[#allocation4 + $0xc1] sm:$0xff] %vm2242_vm12, %v2224_v7  ;;  %v2186_v21 = vpop.f32.mrf.mxu3  ;;  %2489 = vrot.lane.b32.xlu1 %v5953_v34, %s4439_s25  ;;  %v5958_v55 = vld [vmem:[#allocation4 + $0xb0] sm:$0xff] }
 0x3fa   : > { %v2187_v26 = vadd.f32 %v5708_v28, %v2186_v21  ;;  %2378 = vst.msk [vmem:[#allocation5 + $0x78] sm:$0xff] %vm2242_vm12, %v5958_v55  ;;  %v6015_v21 = vld [vmem:[#allocation4 + $0xf1] sm:$0xff] }
 0x3fb   : > { %v2468_v43 = vpop.permute.xlu2 %2467 }
 0x3fc   : > { %v2234_v9 = vmax.f32 %v2187_v26, 0.0  ;;  %v2159_v32 = vpop.f32.mrf.mxu0  ;;  %2560 = vst.msk [vmem:[#allocation5 + $0x20] sm:$0xff] %vm2555_vm14, %v2468_v43 }
 0x3fd   : > { %v2160_v46 = vadd.f32 %v5708_v28, %v2159_v32  ;;  %v5964_v31 = vld [vmem:[#allocation4 + $0x128] sm:$0xff] }
 0x3fe   : > { %2323 = vst.msk [vmem:[#allocation4 + $0x139] sm:$0xff] %vm2242_vm12, %v2234_v9  ;;  %v2464_v37 = vpop.permute.xlu0 %2463  ;;  %v6036_v43 = vld [vmem:[#allocation4 + $0x129] sm:$0xff] }
 0x3ff   : > { %v2225_v44 = vmax.f32 %v2160_v46, 0.0  ;;  %2558 = vst.msk [vmem:[#allocation5 + $0x10] sm:$0xff] %vm2555_vm14, %v2464_v37 }
 0x400   : > { %v5968_v20 = vld [vmem:[#allocation4 + $0xc1] sm:$0xff]  ;;  %2388 = vst.msk [vmem:[#allocation5 + $0xc8] sm:$0xff] %vm2242_vm12, %v5964_v31 }
 0x401   : > { %v5970_v53 = vld [vmem:[#allocation4 + $0xc0] sm:$0xff]  ;;  %v2189_v36 = vpop.f32.mrf.mxu3  ;;  %2491 = vrot.lane.b32.xlu2 %v5968_v20, %s4439_s25  ;;  %2314 = vst.msk [vmem:[#allocation4 + $0xc9] sm:$0xff] %vm2242_vm12, %v2225_v44 }
 0x402   : > { %v2190_v51 = vadd.f32 %v5708_v28, %v2189_v36  ;;  %2379 = vst.msk [vmem:[#allocation5 + $0x80] sm:$0xff] %vm2242_vm12, %v5970_v53  ;;  %v6034_v44 = vld [vmem:[#allocation4 + $0xf9] sm:$0xff] }
 0x404   : > { %v2235_v61 = vmax.f32 %v2190_v51, 0.0  ;;  %v2162_v4 = vpop.f32.mrf.mxu0  ;;  %v6040_v51 = vld [vmem:[#allocation4 + $0x111] sm:$0xff] }
 0x405   : > { %v2163_v0 = vadd.f32 %v5708_v28, %v2162_v4  ;;  %v5982_v5 = vld [vmem:[#allocation4 + $0x138] sm:$0xff] }
 0x406   : > { %2324 = vst.msk [vmem:[#allocation4 + $0x141] sm:$0xff] %vm2242_vm12, %v2235_v61 }
 0x407   : > { %v2226_v42 = vmax.f32 %v2163_v0, 0.0  ;;  %2389 = vst.msk [vmem:[#allocation5 + $0xd0] sm:$0xff] %vm2242_vm12, %v5982_v5 }
 0x408   : > { %v5990_v33 = vld [vmem:[#allocation4 + $0xc9] sm:$0xff] }
 0x409   : > { %2315 = vst.msk [vmem:[#allocation4 + $0xd9] sm:$0xff] %vm2242_vm12, %v2226_v42  ;;  %v2192_v30 = vpop.f32.mrf.mxu3  ;;  %2497 = vrot.lane.b32.xlu2 %v5987_v62, %s4439_s25  ;;  %2493 = vrot.lane.b32.xlu0 %v5990_v33, %s4439_s25  ;;  %v5997_v23 = vld [vmem:[#allocation4 + $0xc8] sm:$0xff] }
 0x40a   : > { %v2193_v11 = vadd.f32 %v5708_v28, %v2192_v30  ;;  %2380 = vst.msk [vmem:[#allocation5 + $0x88] sm:$0xff] %vm2242_vm12, %v5997_v23 }
 0x40b   : > { %v2466_v3 = vpop.permute.xlu1 %2465 }
 0x40c   : > { %v2236_v16 = vmax.f32 %v2193_v11, 0.0  ;;  %2559 = vst.msk [vmem:[#allocation5 + $0x18] sm:$0xff] %vm2555_vm14, %v2466_v3  ;;  %v6055_v11 = vld [vmem:[#allocation4 + $0x121] sm:$0xff]  ;;  %v6059_v3 = vld [vmem:[#allocation4 + $0x139] sm:$0xff] }
 0x40d   : > { %v6003_v8 = vld [vmem:[#allocation4 + $0x140] sm:$0xff] }
 0x40e   : > { %2325 = vst.msk [vmem:[#allocation4 + $0x151] sm:$0xff] %vm2242_vm12, %v2236_v16 }
 0x40f   : > { %2390 = vst.msk [vmem:[#allocation5 + $0xd8] sm:$0xff] %vm2242_vm12, %v6003_v8 }
 0x410   : > { %v6007_v60 = vld [vmem:[#allocation4 + $0xd9] sm:$0xff] }
 0x411   : > { %v6011_v17 = vld [vmem:[#allocation4 + $0xe0] sm:$0xff]  ;;  %v2195_v7 = vpop.f32.mrf.mxu3  ;;  %2495 = vrot.lane.b32.xlu1 %v6007_v60, %s4439_s25  ;;  %2503 = vrot.lane.b32.xlu2 %v6009_v58, %s4439_s25  ;;  %v6021_v26 = vld [vmem:[#allocation4 + $0xd8] sm:$0xff] }
 0x412   : > { %2382 = vst.msk [vmem:[#allocation5 + $0x98] sm:$0xff] %vm2242_vm12, %v6011_v17  ;;  %v2196_v9 = vadd.f32 %v5708_v28, %v2195_v7  ;;  %2499 = vrot.lane.b32.xlu0 %v6015_v21, %s4439_s25  ;;  %v1985_v7 = vld [vmem:[#allocation3 + $0xf0] sm:$0xff] }
 0x413   : > { %2381 = vst.msk [vmem:[#allocation5 + $0x90] sm:$0xff] %vm2242_vm12, %v6021_v26  ;;  %v2474_v32 = vpop.permute.xlu2 %2473  ;;  %4354 = vmatmul.msk.f32.gmra.mxu3 %vm1996_vm11, %v1985_v7 }
 0x414   : > { %v2237_v46 = vmax.f32 %v2196_v9, 0.0  ;;  %2563 = vst.msk [vmem:[#allocation5 + $0x38] sm:$0xff] %vm2555_vm14, %v2474_v32 }
 0x415   : > { %v6029_v37 = vld [vmem:[#allocation4 + $0x150] sm:$0xff] }
 0x416   : > { %2326 = vst.msk [vmem:[#allocation4 + $0x159] sm:$0xff] %vm2242_vm12, %v2237_v46  ;;  %v6049_v42 = vld [vmem:[#allocation4 + $0x151] sm:$0xff] }
 0x417   : > { %2391 = vst.msk [vmem:[#allocation5 + $0xe0] sm:$0xff] %vm2242_vm12, %v6029_v37 }
 0x418   : > { %7058 = vst [vmem:[#allocation6_spill] sm:$0xff] %v6049_v42 }
 0x419   : > { %v2198_v36 = vpop.f32.mrf.mxu3  ;;  %2501 = vrot.lane.b32.xlu1 %v6034_v44, %s4439_s25  ;;  %2509 = vrot.lane.b32.xlu2 %v6036_v43, %s4439_s25 }
 0x41a   : > { %v2199_v61 = vadd.f32 %v5708_v28, %v2198_v36  ;;  %2505 = vrot.lane.b32.xlu0 %v6040_v51, %s4439_s25  ;;  %v6073_v36 = vld [vmem:[#allocation4 + $0x141] sm:$0xff] }
 0x41b   : > { %v2470_v4 = vpop.permute.xlu0 %2469  ;;  %7060 = vst [vmem:[#allocation7_spill] sm:$0xff] %v6073_v36 }
 0x41c   : > { %v2238_v0 = vmax.f32 %v2199_v61, 0.0  ;;  %2561 = vst.msk [vmem:[#allocation5 + $0x28] sm:$0xff] %vm2555_vm14, %v2470_v4 }
 0x41d   : > { %v6051_v30 = vld [vmem:[#allocation4 + $0x158] sm:$0xff] }
 0x41e   : > { %2327 = vst.msk [vmem:[#allocation4 + $0x169] sm:$0xff] %vm2242_vm12, %v2238_v0  ;;  %v6071_v32 = vld [vmem:[#allocation4 + $0x159] sm:$0xff] }
 0x41f   : > { %2392 = vst.msk [vmem:[#allocation5 + $0xe8] sm:$0xff] %vm2242_vm12, %v6051_v30 }
 0x420   : > { %7059 = vst [vmem:[#allocation12_spill] sm:$0xff] %v6071_v32 }
 0x421   : > { %2507 = vrot.lane.b32.xlu1 %v6055_v11, %s4439_s25  ;;  %2515 = vrot.lane.b32.xlu2 %v6049_v42, %s4439_s25  ;;  %v2201_v46 = vpop.f32.mrf.mxu3  ;;  %v2588_v42 = vld [vmem:[#allocation4 + $0x2] sm:$0xff] }
 0x422   : > { %2511 = vrot.lane.b32.xlu0 %v6059_v3, %s4439_s25  ;;  %v2202_v61 = vadd.f32 %v5708_v28, %v2201_v46 }
 0x423   : > { %v2472_v16 = vpop.permute.xlu1 %2471 }
 0x424   : > { %2562 = vst.msk [vmem:[#allocation5 + $0x30] sm:$0xff] %vm2555_vm14, %v2472_v16  ;;  %v2239_v4 = vmax.f32 %v2202_v61, 0.0  ;;  %v1986_v16 = vld [vmem:[#allocation3 + $0xf8] sm:$0xff] }
 0x425   : > { %v6066_v9 = vld [vmem:[#allocation4 + $0x168] sm:$0xff]  ;;  %4355 = vmatmul.msk.f32.gmra.mxu3 %vm1996_vm11, %v1986_v16  ;;  %v6102_v16 = vld [vmem:[#allocation4 + $0x1a] sm:$0xff] }
 0x426   : > { %2393 = vst.msk [vmem:[#allocation5 + $0xf0] sm:$0xff] %vm2242_vm12, %v6066_v9  ;;  %v6082_v7 = vld [vmem:[#allocation4 + $0x169] sm:$0xff] }
 0x427   : > { %2328 = vst.msk [vmem:[#allocation4 + $0x171] sm:$0xff] %vm2242_vm12, %v2239_v4  ;;  %v2589_v4 = vld [vmem:[#allocation4 + $0xa] sm:$0xff] }
 0x428   : > { %7061 = vst [vmem:[#allocation9_spill] sm:$0xff] %v6082_v7 }
 0x429   : > { %2513 = vrot.lane.b32.xlu1 %v6073_v36, %s4439_s25  ;;  %7064 = vst [vmem:[#allocation11_spill] sm:$0xff] %v6102_v16 }
 0x42a   : > { %2517 = vrot.lane.b32.xlu0 %v6071_v32, %s4439_s25  ;;  %v6181_v32 = vld [vmem:[#allocation4 + $0xf2] sm:$0xff] }
 0x42b   : > { %v2480_v0 = vpop.permute.xlu2 %2479  ;;  %7082 = vst [vmem:[#allocation29_spill] sm:$0xff] %v6181_v32 }
 0x42c   : > { %2566 = vst.msk [vmem:[#allocation5 + $0x50] sm:$0xff] %vm2555_vm14, %v2480_v0  ;;  %v6098_v0 = vld [vmem:[#allocation4 + $0x22] sm:$0xff] }
 0x42d   : > { %7063 = vst [vmem:[#allocation8_spill] sm:$0xff] %v6098_v0 }
 0x42e   : > { %v6088_v36 = vld [vmem:[#allocation4 + $0x171] sm:$0xff] }
 0x42f   : > { %7062 = vst [vmem:[#allocation15_spill] sm:$0xff] %v6088_v36  ;;  %v6091_v61 = vld [vmem:[#allocation4 + $0x170] sm:$0xff]  ;;  %2521 = vrot.lane.b32.xlu2 %v6088_v36, %s4439_s25 }
 0x430   : > { %2394 = vst.msk [vmem:[#allocation5 + $0xf8] sm:$0xff] %vm2242_vm12, %v6091_v61  ;;  %v6167_v36 = vld [vmem:[#allocation4 + $0xca] sm:$0xff] }
 0x431   : > { %2519 = vrot.lane.b32.xlu1 %v6082_v7, %s4439_s25  ;;  %v6109_v7 = vld [vmem:[#allocation4 + $0x4a] sm:$0xff]  ;;  %7079 = vst [vmem:[#allocation26_spill] sm:$0xff] %v6167_v36  ;;  %s4449_s25 = smov 64  }
 0x432   : > { %2652 = vrot.lane.b32.xlu0 %v2588_v42, %s4441_s27  ;;  %7066 = vst [vmem:[#allocation10_spill] sm:$0xff] %v6109_v7 }
 0x433   : > { %v2476_v46 = vpop.permute.xlu0 %2475 }
 0x434   : > { %2564 = vst.msk [vmem:[#allocation5 + $0x40] sm:$0xff] %vm2555_vm14, %v2476_v46  ;;  %v6107_v46 = vld [vmem:[#allocation4 + $0x32] sm:$0xff] }
 0x435   : > { %7065 = vst [vmem:[#allocation18_spill] sm:$0xff] %v6107_v46 }
 0x437   : > { %2656 = vrot.lane.b32.xlu2 %v6102_v16, %s4441_s27  ;;  %v6122_v16 = vld [vmem:[#allocation4 + $0x6a] sm:$0xff] }
 0x438   : > { %7069 = vst [vmem:[#allocation13_spill] sm:$0xff] %v6122_v16 }
 0x439   : > { %2654 = vrot.lane.b32.xlu1 %v2589_v4, %s4441_s27 }
 0x43a   : > { %2658 = vrot.lane.b32.xlu0 %v6098_v0, %s4441_s27  ;;  %v6115_v0 = vld [vmem:[#allocation4 + $0x3a] sm:$0xff] }
 0x43b   : > { %v2478_v42 = vpop.permute.xlu1 %2477  ;;  %7067 = vst [vmem:[#allocation14_spill] sm:$0xff] %v6115_v0 }
 0x43c   : > { %2565 = vst.msk [vmem:[#allocation5 + $0x48] sm:$0xff] %vm2555_vm14, %v2478_v42  ;;  %v6120_v42 = vld [vmem:[#allocation4 + $0x52] sm:$0xff] }
 0x43d   : > { %7068 = vst [vmem:[#allocation21_spill] sm:$0xff] %v6120_v42 }
 0x43f   : > { %2662 = vrot.lane.b32.xlu2 %v6115_v0, %s4441_s27  ;;  %v6135_v0 = vld [vmem:[#allocation4 + $0x92] sm:$0xff] }
 0x440   : > { %7072 = vst [vmem:[#allocation16_spill] sm:$0xff] %v6135_v0 }
 0x441   : > { %2660 = vrot.lane.b32.xlu1 %v6107_v46, %s4441_s27 }
 0x442   : > { %2664 = vrot.lane.b32.xlu0 %v6109_v7, %s4441_s27  ;;  %v6128_v7 = vld [vmem:[#allocation4 + $0x62] sm:$0xff] }
 0x443   : > { %v2486_v4 = vpop.permute.xlu2 %2485  ;;  %7070 = vst [vmem:[#allocation17_spill] sm:$0xff] %v6128_v7 }
 0x444   : > { %2569 = vst.msk [vmem:[#allocation5 + $0x68] sm:$0xff] %vm2555_vm14, %v2486_v4  ;;  %v6133_v4 = vld [vmem:[#allocation4 + $0x7a] sm:$0xff] }
 0x445   : > { %7071 = vst [vmem:[#allocation24_spill] sm:$0xff] %v6133_v4 }
 0x447   : > { %2668 = vrot.lane.b32.xlu2 %v6128_v7, %s4441_s27  ;;  %v6148_v7 = vld [vmem:[#allocation4 + $0xb2] sm:$0xff] }
 0x448   : > { %7075 = vst [vmem:[#allocation19_spill] sm:$0xff] %v6148_v7 }
 0x449   : > { %2666 = vrot.lane.b32.xlu1 %v6120_v42, %s4441_s27 }
 0x44a   : > { %2670 = vrot.lane.b32.xlu0 %v6122_v16, %s4441_s27  ;;  %v6141_v16 = vld [vmem:[#allocation4 + $0x82] sm:$0xff] }
 0x44b   : > { %v2482_v46 = vpop.permute.xlu0 %2481  ;;  %7073 = vst [vmem:[#allocation20_spill] sm:$0xff] %v6141_v16 }
 0x44c   : > { %2567 = vst.msk [vmem:[#allocation5 + $0x58] sm:$0xff] %vm2555_vm14, %v2482_v46  ;;  %v6146_v46 = vld [vmem:[#allocation4 + $0x9a] sm:$0xff] }
 0x44d   : > { %7074 = vst [vmem:[#allocation27_spill] sm:$0xff] %v6146_v46 }
 0x44f   : > { %2674 = vrot.lane.b32.xlu2 %v6141_v16, %s4441_s27  ;;  %v6161_v16 = vld [vmem:[#allocation4 + $0xda] sm:$0xff] }
 0x450   : > { %7078 = vst [vmem:[#allocation22_spill] sm:$0xff] %v6161_v16 }
 0x451   : > { %2672 = vrot.lane.b32.xlu1 %v6133_v4, %s4441_s27 }
 0x452   : > { %2676 = vrot.lane.b32.xlu0 %v6135_v0, %s4441_s27  ;;  %v6154_v0 = vld [vmem:[#allocation4 + $0xaa] sm:$0xff] }
 0x453   : > { %v2484_v42 = vpop.permute.xlu1 %2483  ;;  %7076 = vst [vmem:[#allocation23_spill] sm:$0xff] %v6154_v0 }
 0x454   : > { %2568 = vst.msk [vmem:[#allocation5 + $0x60] sm:$0xff] %vm2555_vm14, %v2484_v42  ;;  %v6159_v42 = vld [vmem:[#allocation4 + $0xc2] sm:$0xff] }
 0x455   : > { %7077 = vst [vmem:[#allocation30_spill] sm:$0xff] %v6159_v42 }
 0x457   : > { %2680 = vrot.lane.b32.xlu2 %v6154_v0, %s4441_s27  ;;  %v6175_v0 = vld [vmem:[#allocation4 + $0xfa] sm:$0xff] }
 0x458   : > { %7081 = vst [vmem:[#allocation25_spill] sm:$0xff] %v6175_v0 }
 0x459   : > { %2678 = vrot.lane.b32.xlu1 %v6146_v46, %s4441_s27 }
 0x45a   : > { %2682 = vrot.lane.b32.xlu0 %v6148_v7, %s4441_s27 }
 0x45b   : > { %v2492_v4 = vpop.permute.xlu2 %2491 }
 0x45c   : > { %2572 = vst.msk [vmem:[#allocation5 + $0x80] sm:$0xff] %vm2555_vm14, %v2492_v4  ;;  %v6173_v4 = vld [vmem:[#allocation4 + $0xe2] sm:$0xff] }
 0x45d   : > { %7080 = vst [vmem:[#allocation33_spill] sm:$0xff] %v6173_v4 }
 0x45f   : > { %2686 = vrot.lane.b32.xlu2 %v6167_v36, %s4441_s27 }
 0x461   : > { %2684 = vrot.lane.b32.xlu1 %v6159_v42, %s4441_s27 }
 0x462   : > { %2688 = vrot.lane.b32.xlu0 %v6161_v16, %s4441_s27 }
 0x463   : > { %v2488_v46 = vpop.permute.xlu0 %2487  ;;  %v2498_v7 = vpop.permute.xlu2 %2497 }
 0x464   : > { %2570 = vst.msk [vmem:[#allocation5 + $0x70] sm:$0xff] %vm2555_vm14, %v2488_v46  ;;  %v6189_v46 = vld [vmem:[#allocation4 + $0x122] sm:$0xff] }
 0x465   : > { %2575 = vst.msk [vmem:[#allocation5 + $0x98] sm:$0xff] %vm2555_vm14, %v2498_v7  ;;  %v6187_v7 = vld [vmem:[#allocation4 + $0x10a] sm:$0xff] }
 0x466   : > { %7083 = vst [vmem:[#allocation28_spill] sm:$0xff] %v6187_v7 }
 0x467   : > { %2692 = vrot.lane.b32.xlu2 %v6181_v32, %s4441_s27  ;;  %7084 = vst [vmem:[#allocation32_spill] sm:$0xff] %v6189_v46 }
 0x469   : > { %2690 = vrot.lane.b32.xlu1 %v6173_v4, %s4441_s27  ;;  %v6195_v4 = vld [vmem:[#allocation4 + $0x112] sm:$0xff] }
 0x46a   : > { %2694 = vrot.lane.b32.xlu0 %v6175_v0, %s4441_s27  ;;  %7085 = vst [vmem:[#allocation31_spill] sm:$0xff] %v6195_v4 }
 0x46b   : > { %v2490_v16 = vpop.permute.xlu1 %2489  ;;  %v2504_v42 = vpop.permute.xlu2 %2503 }
 0x46c   : > { %2571 = vst.msk [vmem:[#allocation5 + $0x78] sm:$0xff] %vm2555_vm14, %v2490_v16  ;;  %v6200_v16 = vld [vmem:[#allocation4 + $0x12a] sm:$0xff] }
 0x46d   : > { %2578 = vst.msk [vmem:[#allocation5 + $0xb0] sm:$0xff] %vm2555_vm14, %v2504_v42  ;;  %v6202_v42 = vld [vmem:[#allocation4 + $0x142] sm:$0xff] }
 0x46e   : > { %7086 = vst [vmem:[#allocation35_spill] sm:$0xff] %v6200_v16 }
 0x46f   : > { %2698 = vrot.lane.b32.xlu2 %v6195_v4, %s4441_s27  ;;  %7087 = vst [vmem:[#allocation34_spill] sm:$0xff] %v6202_v42  ;;  %v2618_v4 = vld [vmem:[#allocation4 + $0x16a] sm:$0xff] }
 0x471   : > { %2696 = vrot.lane.b32.xlu1 %v6187_v7, %s4441_s27 }
 0x472   : > { %2700 = vrot.lane.b32.xlu0 %v6189_v46, %s4441_s27  ;;  %v6208_v46 = vld [vmem:[#allocation4 + $0x13a] sm:$0xff] }
 0x473   : > { %v2510_v0 = vpop.permute.xlu2 %2509 }
 0x474   : > { %2581 = vst.msk [vmem:[#allocation5 + $0xc8] sm:$0xff] %vm2555_vm14, %v2510_v0  ;;  %v6214_v0 = vld [vmem:[#allocation4 + $0x152] sm:$0xff] }
 0x475   : > { %7088 = vst [vmem:[#allocation36_spill] sm:$0xff] %v6214_v0 }
 0x477   : > { %2704 = vrot.lane.b32.xlu2 %v6208_v46, %s4441_s27 }
 0x479   : > { %2702 = vrot.lane.b32.xlu1 %v6200_v16, %s4441_s27  ;;  %v2617_v16 = vld [vmem:[#allocation4 + $0x15a] sm:$0xff] }
 0x47a   : > { %2706 = vrot.lane.b32.xlu0 %v6202_v42, %s4441_s27 }
 0x47b   : > { %v2516_v7 = vpop.permute.xlu2 %2515  ;;  %v2494_v32 = vpop.permute.xlu0 %2493 }
 0x47c   : > { %2584 = vst.msk [vmem:[#allocation5 + $0xe0] sm:$0xff] %vm2555_vm14, %v2516_v7  ;;  %v2619_v7 = vld [vmem:[#allocation4 + $0x172] sm:$0xff] }
 0x47d   : > { %2573 = vst.msk [vmem:[#allocation5 + $0x88] sm:$0xff] %vm2555_vm14, %v2494_v32 }
 0x47f   : > { %2710 = vrot.lane.b32.xlu2 %v2617_v16, %s4441_s27 }
 0x481   : > { %2708 = vrot.lane.b32.xlu1 %v6214_v0, %s4441_s27 }
 0x482   : > { %2712 = vrot.lane.b32.xlu0 %v2618_v4, %s4441_s27 }
 0x483   : > { %v2496_v42 = vpop.permute.xlu1 %2495 }
 0x484   : > { %2574 = vst.msk [vmem:[#allocation5 + $0x90] sm:$0xff] %vm2555_vm14, %v2496_v42  ;;  %v2500_v36 = vpop.permute.xlu0 %2499 }
 0x485   : > { %2576 = vst.msk [vmem:[#allocation5 + $0xa0] sm:$0xff] %vm2555_vm14, %v2500_v36 }
 0x487   : > { %2845 = vrot.lane.b32.xlu2 %v5791_v12, %s4443_s29 }
 0x489   : > { %2714 = vrot.lane.b32.xlu1 %v2619_v7, %s4441_s27  ;;  %v2522_v4 = vpop.permute.xlu2 %2521 }
 0x48a   : > { %2847 = vrot.lane.b32.xlu0 %v5795_v49, %s4443_s29  ;;  %2587 = vst.msk [vmem:[#allocation5 + $0xf8] sm:$0xff] %vm2555_vm14, %v2522_v4 }
 0x48b   : > { %v2502_v32 = vpop.permute.xlu1 %2501 }
 0x48c   : > { %2577 = vst.msk [vmem:[#allocation5 + $0xa8] sm:$0xff] %vm2555_vm14, %v2502_v32  ;;  %v2506_v0 = vpop.permute.xlu0 %2505 }
 0x48d   : > { %2579 = vst.msk [vmem:[#allocation5 + $0xb8] sm:$0xff] %vm2555_vm14, %v2506_v0 }
 0x48f   : > { %2851 = vrot.lane.b32.xlu2 %v5815_v56, %s4443_s29 }
 0x491   : > { %2849 = vrot.lane.b32.xlu1 %v5807_v35, %s4443_s29  ;;  %v2657_v12 = vpop.permute.xlu2 %2656 }
 0x492   : > { %2853 = vrot.lane.b32.xlu0 %v5825_v29, %s4443_s29  ;;  %2751 = vst.msk [vmem:[#allocation5 + $0x10] sm:$0xff] %vm2748_vm15, %v2657_v12 }
 0x493   : > { %v2508_v36 = vpop.permute.xlu1 %2507 }
 0x494   : > { %2580 = vst.msk [vmem:[#allocation5 + $0xc0] sm:$0xff] %vm2555_vm14, %v2508_v36  ;;  %v2512_v49 = vpop.permute.xlu0 %2511 }
 0x495   : > { %2582 = vst.msk [vmem:[#allocation5 + $0xd0] sm:$0xff] %vm2555_vm14, %v2512_v49 }
 0x496   : > { %v2204_v16 = vpop.f32.mrf.mxu3 }
 0x497   : > { %2857 = vrot.lane.b32.xlu2 %v5845_v6, %s4443_s29 }
 0x499   : > { %2855 = vrot.lane.b32.xlu1 %v5835_v27, %s4443_s29  ;;  %v2663_v56 = vpop.permute.xlu2 %2662 }
 0x49a   : > { %2859 = vrot.lane.b32.xlu0 %v5857_v25, %s4443_s29  ;;  %2754 = vst.msk [vmem:[#allocation5 + $0x28] sm:$0xff] %vm2748_vm15, %v2663_v56 }
 0x49b   : > { %v2514_v35 = vpop.permute.xlu1 %2513 }
 0x49c   : > { %2583 = vst.msk [vmem:[#allocation5 + $0xd8] sm:$0xff] %vm2555_vm14, %v2514_v35  ;;  %v2518_v29 = vpop.permute.xlu0 %2517 }
 0x49d   : > { %2585 = vst.msk [vmem:[#allocation5 + $0xe8] sm:$0xff] %vm2555_vm14, %v2518_v29 }
 0x49f   : > { %2863 = vrot.lane.b32.xlu2 %v5885_v24, %s4443_s29 }
 0x4a1   : > { %2861 = vrot.lane.b32.xlu1 %v5870_v22, %s4443_s29  ;;  %v2669_v6 = vpop.permute.xlu2 %2668  ;;  %v2205_v22 = vadd.f32 %v5708_v28, %v2204_v16 }
 0x4a2   : > { %2865 = vrot.lane.b32.xlu0 %v5902_v19, %s4443_s29  ;;  %2757 = vst.msk [vmem:[#allocation5 + $0x40] sm:$0xff] %vm2748_vm15, %v2669_v6 }
 0x4a3   : > { %v2520_v27 = vpop.permute.xlu1 %2519  ;;  %v2240_v0 = vmax.f32 %v2205_v22, 0.0  ;;  %v7090_v22 = vld [vmem:[#allocation7_spill] sm:$0xff] }
 0x4a4   : > { %2586 = vst.msk [vmem:[#allocation5 + $0xf0] sm:$0xff] %vm2555_vm14, %v2520_v27  ;;  %v2653_v25 = vpop.permute.xlu0 %2652 }
 0x4a5   : > { %2749 = vst.msk [vmem:[#allocation5] sm:$0xff] %vm2748_vm15, %v2653_v25 }
 0x4a6   : > { %2329 = vst.msk [vmem:[#allocation4 + $0x181] sm:$0xff] %vm2242_vm12, %v2240_v0 }
 0x4a7   : > { %2869 = vrot.lane.b32.xlu2 %v5937_v10, %s4443_s29 }
 0x4a9   : > { %2867 = vrot.lane.b32.xlu1 %v5918_v2, %s4443_s29  ;;  %v2675_v24 = vpop.permute.xlu2 %2674  ;;  %v2207_v2 = vpop.f32.mrf.mxu3 }
 0x4aa   : > { %2871 = vrot.lane.b32.xlu0 %v5958_v55, %s4443_s29  ;;  %2760 = vst.msk [vmem:[#allocation5 + $0x58] sm:$0xff] %vm2748_vm15, %v2675_v24  ;;  %v2208_v55 = vadd.f32 %v5708_v28, %v2207_v2  ;;  %v7093_v24 = vld [vmem:[#allocation9_spill] sm:$0xff] }
 0x4ab   : > { %v2655_v19 = vpop.permute.xlu1 %2654 }
 0x4ac   : > { %2750 = vst.msk [vmem:[#allocation5 + $0x8] sm:$0xff] %vm2748_vm15, %v2655_v19  ;;  %v2659_v42 = vpop.permute.xlu0 %2658  ;;  %v2241_v10 = vmax.f32 %v2208_v55, 0.0  ;;  %v7091_v19 = vld [vmem:[#allocation12_spill] sm:$0xff] }
 0x4ad   : > { %2752 = vst.msk [vmem:[#allocation5 + $0x18] sm:$0xff] %vm2748_vm15, %v2659_v42  ;;  %v6412_v55 = vld [vmem:[#allocation4 + $0x181] sm:$0xff] }
 0x4ae   : > { %2330 = vst.msk [vmem:[#allocation4 + $0x189] sm:$0xff] %vm2242_vm12, %v2241_v10 }
 0x4af   : > { %2875 = vrot.lane.b32.xlu2 %v5997_v23, %s4443_s29 }
 0x4b1   : > { %2873 = vrot.lane.b32.xlu1 %v5970_v53, %s4443_s29  ;;  %v2681_v4 = vpop.permute.xlu2 %2680 }
 0x4b2   : > { %2877 = vrot.lane.b32.xlu0 %v6021_v26, %s4443_s29  ;;  %2763 = vst.msk [vmem:[#allocation5 + $0x70] sm:$0xff] %vm2748_vm15, %v2681_v4 }
 0x4b3   : > { %v2661_v7 = vpop.permute.xlu1 %2660 }
 0x4b4   : > { %v2665_v32 = vpop.permute.xlu0 %2664  ;;  %2753 = vst.msk [vmem:[#allocation5 + $0x20] sm:$0xff] %vm2748_vm15, %v2661_v7  ;;  %v7094_v7 = vld [vmem:[#allocation11_spill] sm:$0xff] }
 0x4b5   : > { %2755 = vst.msk [vmem:[#allocation5 + $0x30] sm:$0xff] %vm2748_vm15, %v2665_v32  ;;  %v2812_v56 = vld [vmem:[#allocation4 + $0x188] sm:$0xff] }
 0x4b6   : > { %v6418_v10 = vld [vmem:[#allocation4 + $0x189] sm:$0xff] }
 0x4b7   : > { %2881 = vrot.lane.b32.xlu2 %v5879_v40, %s4443_s29 }
 0x4b9   : > { %2879 = vrot.lane.b32.xlu1 %v6011_v17, %s4443_s29  ;;  %v2687_v23 = vpop.permute.xlu2 %2686 }
 0x4ba   : > { %2883 = vrot.lane.b32.xlu0 %v5897_v54, %s4443_s29  ;;  %2766 = vst.msk [vmem:[#allocation5 + $0x88] sm:$0xff] %vm2748_vm15, %v2687_v23  ;;  %v7096_v23 = vld [vmem:[#allocation14_spill] sm:$0xff] }
 0x4bb   : > { %v2667_v28 = vpop.permute.xlu1 %2666 }
 0x4bc   : > { %v2671_v53 = vpop.permute.xlu0 %2670  ;;  %2756 = vst.msk [vmem:[#allocation5 + $0x38] sm:$0xff] %vm2748_vm15, %v2667_v28 }
 0x4bd   : > { %2758 = vst.msk [vmem:[#allocation5 + $0x48] sm:$0xff] %vm2748_vm15, %v2671_v53  ;;  %v7095_v53 = vld [vmem:[#allocation8_spill] sm:$0xff] }
 0x4bf   : > { %2887 = vrot.lane.b32.xlu2 %v5932_v18, %s4443_s29 }
 0x4c1   : > { %2885 = vrot.lane.b32.xlu1 %v5920_v39, %s4443_s29  ;;  %v2693_v36 = vpop.permute.xlu2 %2692 }
 0x4c2   : > { %2889 = vrot.lane.b32.xlu0 %v5948_v50, %s4443_s29  ;;  %2769 = vst.msk [vmem:[#allocation5 + $0xa0] sm:$0xff] %vm2748_vm15, %v2693_v36  ;;  %v7097_v36 = vld [vmem:[#allocation18_spill] sm:$0xff] }
 0x4c3   : > { %v2673_v17 = vpop.permute.xlu1 %2672 }
 0x4c4   : > { %v2677_v26 = vpop.permute.xlu0 %2676  ;;  %2759 = vst.msk [vmem:[#allocation5 + $0x50] sm:$0xff] %vm2748_vm15, %v2673_v17 }
 0x4c5   : > { %2761 = vst.msk [vmem:[#allocation5 + $0x60] sm:$0xff] %vm2748_vm15, %v2677_v26 }
 0x4c7   : > { %2893 = vrot.lane.b32.xlu2 %v5982_v5, %s4443_s29 }
 0x4c9   : > { %2891 = vrot.lane.b32.xlu1 %v5964_v31, %s4443_s29  ;;  %v2699_v35 = vpop.permute.xlu2 %2698 }
 0x4ca   : > { %2895 = vrot.lane.b32.xlu0 %v6003_v8, %s4443_s29  ;;  %2772 = vst.msk [vmem:[#allocation5 + $0xb8] sm:$0xff] %vm2748_vm15, %v2699_v35  ;;  %v7099_v35 = vld [vmem:[#allocation17_spill] sm:$0xff] }
 0x4cb   : > { %v2679_v49 = vpop.permute.xlu1 %2678 }
 0x4cc   : > { %v2683_v12 = vpop.permute.xlu0 %2682  ;;  %2762 = vst.msk [vmem:[#allocation5 + $0x68] sm:$0xff] %vm2748_vm15, %v2679_v49 }
 0x4cd   : > { %2764 = vst.msk [vmem:[#allocation5 + $0x78] sm:$0xff] %vm2748_vm15, %v2683_v12  ;;  %v7098_v12 = vld [vmem:[#allocation10_spill] sm:$0xff] }
 0x4cf   : > { %2899 = vrot.lane.b32.xlu2 %v6051_v30, %s4443_s29 }
 0x4d1   : > { %2897 = vrot.lane.b32.xlu1 %v6029_v37, %s4443_s29  ;;  %v2705_v29 = vpop.permute.xlu2 %2704  ;;  %v2811_v37 = vld [vmem:[#allocation4 + $0x180] sm:$0xff] }
 0x4d2   : > { %2901 = vrot.lane.b32.xlu0 %v6066_v9, %s4443_s29  ;;  %2775 = vst.msk [vmem:[#allocation5 + $0xd0] sm:$0xff] %vm2748_vm15, %v2705_v29  ;;  %v7100_v29 = vld [vmem:[#allocation21_spill] sm:$0xff] }
 0x4d3   : > { %v2685_v31 = vpop.permute.xlu1 %2684 }
 0x4d4   : > { %v2689_v8 = vpop.permute.xlu0 %2688  ;;  %2765 = vst.msk [vmem:[#allocation5 + $0x80] sm:$0xff] %vm2748_vm15, %v2685_v31 }
 0x4d5   : > { %2767 = vst.msk [vmem:[#allocation5 + $0x90] sm:$0xff] %vm2748_vm15, %v2689_v8 }
 0x4d7   : > { %2905 = vrot.lane.b32.xlu2 %v2811_v37, %s4443_s29  ;;  %v7101_v37 = vld [vmem:[#allocation13_spill] sm:$0xff] }
 0x4d9   : > { %2903 = vrot.lane.b32.xlu1 %v6091_v61, %s4443_s29  ;;  %v2711_v30 = vpop.permute.xlu2 %2710 }
 0x4da   : > { %2907 = vrot.lane.b32.xlu0 %v2812_v56, %s4443_s29  ;;  %2778 = vst.msk [vmem:[#allocation5 + $0xe8] sm:$0xff] %vm2748_vm15, %v2711_v30  ;;  %s6763_s29 = scalar_lea.vmem %s6930_s5, %s4390_s21 }
 0x4db   : > { %v2691_v9 = vpop.permute.xlu1 %2690 }
 0x4dc   : > { %v2695_v27 = vpop.permute.xlu0 %2694  ;;  %2768 = vst.msk [vmem:[#allocation5 + $0x98] sm:$0xff] %vm2748_vm15, %v2691_v9  ;;  %v7102_v9 = vld [vmem:[#allocation20_spill] sm:$0xff] }
 0x4dd   : > { %2770 = vst.msk [vmem:[#allocation5 + $0xa8] sm:$0xff] %vm2748_vm15, %v2695_v27 }
 0x4df   : > { %3040 = vrot.lane.b32.xlu2 %v5779_v38, %s4445_s6 }
 0x4e1   : > { %3038 = vrot.lane.b32.xlu1 %v5745_v1, %s4445_s6  ;;  %v2846_v6 = vpop.permute.xlu2 %2845 }
 0x4e2   : > { %3042 = vrot.lane.b32.xlu0 %v5804_v48, %s4445_s6  ;;  %2942 = vst.msk [vmem:[#allocation5] sm:$0xff] %vm2941_vm0, %v2846_v6  ;;  %v7104_v6 = vld [vmem:[#allocation16_spill] sm:$0xff] }
 0x4e3   : > { %v2697_v61 = vpop.permute.xlu1 %2696 }
 0x4e4   : > { %v2701_v25 = vpop.permute.xlu0 %2700  ;;  %2771 = vst.msk [vmem:[#allocation5 + $0xb0] sm:$0xff] %vm2748_vm15, %v2697_v61  ;;  %v7103_v61 = vld [vmem:[#allocation24_spill] sm:$0xff] }
 0x4e5   : > { %2773 = vst.msk [vmem:[#allocation5 + $0xc0] sm:$0xff] %vm2748_vm15, %v2701_v25 }
 0x4e7   : > { %3046 = vrot.lane.b32.xlu2 %v5823_v63, %s4445_s6 }
 0x4e9   : > { %3044 = vrot.lane.b32.xlu1 %v5813_v52, %s4445_s6  ;;  %v2852_v38 = vpop.permute.xlu2 %2851 }
 0x4ea   : > { %3048 = vrot.lane.b32.xlu0 %v5833_v45, %s4445_s6  ;;  %2945 = vst.msk [vmem:[#allocation5 + $0x18] sm:$0xff] %vm2941_vm0, %v2852_v38 }
 0x4eb   : > { %v2703_v1 = vpop.permute.xlu1 %2702 }
 0x4ec   : > { %v2707_v48 = vpop.permute.xlu0 %2706  ;;  %2774 = vst.msk [vmem:[#allocation5 + $0xc8] sm:$0xff] %vm2748_vm15, %v2703_v1  ;;  %v7105_v1 = vld [vmem:[#allocation23_spill] sm:$0xff] }
 0x4ed   : > { %2776 = vst.msk [vmem:[#allocation5 + $0xd8] sm:$0xff] %vm2748_vm15, %v2707_v48 }
 0x4ef   : > { %3052 = vrot.lane.b32.xlu2 %v5855_v13, %s4445_s6 }
 0x4f1   : > { %3050 = vrot.lane.b32.xlu1 %v5843_v47, %s4445_s6  ;;  %v2858_v63 = vpop.permute.xlu2 %2857 }
 0x4f2   : > { %3054 = vrot.lane.b32.xlu0 %v5868_v15, %s4445_s6  ;;  %2948 = vst.msk [vmem:[#allocation5 + $0x30] sm:$0xff] %vm2941_vm0, %v2858_v63  ;;  %v7107_v63 = vld [vmem:[#allocation19_spill] sm:$0xff] }
 0x4f3   : > { %v2709_v52 = vpop.permute.xlu1 %2708 }
 0x4f4   : > { %v2713_v45 = vpop.permute.xlu0 %2712  ;;  %2777 = vst.msk [vmem:[#allocation5 + $0xe0] sm:$0xff] %vm2748_vm15, %v2709_v52  ;;  %v7106_v52 = vld [vmem:[#allocation27_spill] sm:$0xff] }
 0x4f5   : > { %2779 = vst.msk [vmem:[#allocation5 + $0xf0] sm:$0xff] %vm2748_vm15, %v2713_v45 }
 0x4f7   : > { %3058 = vrot.lane.b32.xlu2 %v5900_v57, %s4445_s6 }
 0x4f9   : > { %3056 = vrot.lane.b32.xlu1 %v5883_v41, %s4445_s6  ;;  %v2864_v13 = vpop.permute.xlu2 %2863 }
 0x4fa   : > { %3060 = vrot.lane.b32.xlu0 %v5915_v59, %s4445_s6  ;;  %2951 = vst.msk [vmem:[#allocation5 + $0x48] sm:$0xff] %vm2941_vm0, %v2864_v13 }
 0x4fb   : > { %v2715_v47 = vpop.permute.xlu1 %2714 }
 0x4fc   : > { %v2848_v15 = vpop.permute.xlu0 %2847  ;;  %2780 = vst.msk [vmem:[#allocation5 + $0xf8] sm:$0xff] %vm2748_vm15, %v2715_v47  ;;  %v7108_v47 = vld [vmem:[#allocation26_spill] sm:$0xff] }
 0x4fd   : > { %2943 = vst.msk [vmem:[#allocation5 + $0x8] sm:$0xff] %vm2941_vm0, %v2848_v15 }
 0x4ff   : > { %3064 = vrot.lane.b32.xlu2 %v5953_v34, %s4445_s6 }
 0x501   : > { %3062 = vrot.lane.b32.xlu1 %v5935_v14, %s4445_s6  ;;  %v2870_v57 = vpop.permute.xlu2 %2869 }
 0x502   : > { %3066 = vrot.lane.b32.xlu0 %v5968_v20, %s4445_s6  ;;  %2954 = vst.msk [vmem:[#allocation5 + $0x60] sm:$0xff] %vm2941_vm0, %v2870_v57  ;;  %v7110_v57 = vld [vmem:[#allocation22_spill] sm:$0xff] }
 0x503   : > { %v2850_v41 = vpop.permute.xlu1 %2849 }
 0x504   : > { %v2854_v59 = vpop.permute.xlu0 %2853  ;;  %2944 = vst.msk [vmem:[#allocation5 + $0x10] sm:$0xff] %vm2941_vm0, %v2850_v41  ;;  %v7109_v41 = vld [vmem:[#allocation30_spill] sm:$0xff] }
 0x505   : > { %2946 = vst.msk [vmem:[#allocation5 + $0x20] sm:$0xff] %vm2941_vm0, %v2854_v59 }
 0x507   : > { %3070 = vrot.lane.b32.xlu2 %v6007_v60, %s4445_s6 }
 0x509   : > { %3068 = vrot.lane.b32.xlu1 %v5990_v33, %s4445_s6  ;;  %v2876_v34 = vpop.permute.xlu2 %2875 }
 0x50a   : > { %3072 = vrot.lane.b32.xlu0 %v5987_v62, %s4445_s6  ;;  %2957 = vst.msk [vmem:[#allocation5 + $0x78] sm:$0xff] %vm2941_vm0, %v2876_v34 }
 0x50b   : > { %v2856_v14 = vpop.permute.xlu1 %2855 }
 0x50c   : > { %v2860_v20 = vpop.permute.xlu0 %2859  ;;  %2947 = vst.msk [vmem:[#allocation5 + $0x28] sm:$0xff] %vm2941_vm0, %v2856_v14  ;;  %v7111_v14 = vld [vmem:[#allocation29_spill] sm:$0xff] }
 0x50d   : > { %2949 = vst.msk [vmem:[#allocation5 + $0x38] sm:$0xff] %vm2941_vm0, %v2860_v20 }
 0x50f   : > { %3076 = vrot.lane.b32.xlu2 %v6034_v44, %s4445_s6 }
 0x511   : > { %3074 = vrot.lane.b32.xlu1 %v6015_v21, %s4445_s6  ;;  %v2882_v60 = vpop.permute.xlu2 %2881 }
 0x512   : > { %3078 = vrot.lane.b32.xlu0 %v6009_v58, %s4445_s6  ;;  %2960 = vst.msk [vmem:[#allocation5 + $0x90] sm:$0xff] %vm2941_vm0, %v2882_v60  ;;  %v7113_v60 = vld [vmem:[#allocation25_spill] sm:$0xff] }
 0x513   : > { %v2862_v33 = vpop.permute.xlu1 %2861 }
 0x514   : > { %v2866_v62 = vpop.permute.xlu0 %2865  ;;  %2950 = vst.msk [vmem:[#allocation5 + $0x40] sm:$0xff] %vm2941_vm0, %v2862_v33  ;;  %v7112_v33 = vld [vmem:[#allocation33_spill] sm:$0xff] }
 0x515   : > { %2952 = vst.msk [vmem:[#allocation5 + $0x50] sm:$0xff] %vm2941_vm0, %v2866_v62 }
 0x517   : > { %3082 = vrot.lane.b32.xlu2 %v6055_v11, %s4445_s6 }
 0x519   : > { %3080 = vrot.lane.b32.xlu1 %v6040_v51, %s4445_s6  ;;  %v2888_v44 = vpop.permute.xlu2 %2887  ;;  %v7089_v51 = vld [vmem:[#allocation6_spill] sm:$0xff] }
 0x51a   : > { %3084 = vrot.lane.b32.xlu0 %v6036_v43, %s4445_s6  ;;  %2963 = vst.msk [vmem:[#allocation5 + $0xa8] sm:$0xff] %vm2941_vm0, %v2888_v44 }
 0x51b   : > { %v2868_v21 = vpop.permute.xlu1 %2867 }
 0x51c   : > { %v2872_v58 = vpop.permute.xlu0 %2871  ;;  %2953 = vst.msk [vmem:[#allocation5 + $0x58] sm:$0xff] %vm2941_vm0, %v2868_v21  ;;  %v7114_v21 = vld [vmem:[#allocation31_spill] sm:$0xff] }
 0x51d   : > { %2955 = vst.msk [vmem:[#allocation5 + $0x68] sm:$0xff] %vm2941_vm0, %v2872_v58 }
 0x51f   : > { %3088 = vrot.lane.b32.xlu2 %v7090_v22, %s4445_s6 }
 0x521   : > { %3086 = vrot.lane.b32.xlu1 %v6059_v3, %s4445_s6  ;;  %v2894_v11 = vpop.permute.xlu2 %2893  ;;  %v7092_v3 = vld [vmem:[#allocation15_spill] sm:$0xff] }
 0x522   : > { %3090 = vrot.lane.b32.xlu0 %v7089_v51, %s4445_s6  ;;  %2966 = vst.msk [vmem:[#allocation5 + $0xc0] sm:$0xff] %vm2941_vm0, %v2894_v11  ;;  %v7115_v51 = vld [vmem:[#allocation28_spill] sm:$0xff] }
 0x523   : > { %v2874_v16 = vpop.permute.xlu1 %2873 }
 0x524   : > { %v2878_v43 = vpop.permute.xlu0 %2877  ;;  %2956 = vst.msk [vmem:[#allocation5 + $0x70] sm:$0xff] %vm2941_vm0, %v2874_v16 }
 0x525   : > { %2958 = vst.msk [vmem:[#allocation5 + $0x80] sm:$0xff] %vm2941_vm0, %v2878_v43  ;;  %v7116_v43 = vld [vmem:[#allocation32_spill] sm:$0xff] }
 0x527   : > { %3094 = vrot.lane.b32.xlu2 %v7093_v24, %s4445_s6  ;;  %v7119_v24 = vld [vmem:[#allocation36_spill] sm:$0xff] }
 0x529   : > { %3092 = vrot.lane.b32.xlu1 %v7091_v19, %s4445_s6  ;;  %v2900_v2 = vpop.permute.xlu2 %2899  ;;  %v7117_v19 = vld [vmem:[#allocation35_spill] sm:$0xff] }
 0x52a   : > { %3096 = vrot.lane.b32.xlu0 %v7092_v3, %s4445_s6  ;;  %2969 = vst.msk [vmem:[#allocation5 + $0xd8] sm:$0xff] %vm2941_vm0, %v2900_v2 }
 0x52b   : > { %v2880_v42 = vpop.permute.xlu1 %2879 }
 0x52c   : > { %v2884_v0 = vpop.permute.xlu0 %2883  ;;  %2959 = vst.msk [vmem:[#allocation5 + $0x88] sm:$0xff] %vm2941_vm0, %v2880_v42  ;;  %v7118_v42 = vld [vmem:[#allocation34_spill] sm:$0xff] }
 0x52d   : > { %2961 = vst.msk [vmem:[#allocation5 + $0x98] sm:$0xff] %vm2941_vm0, %v2884_v0 }
 0x52f   : > { %3100 = vrot.lane.b32.xlu2 %v6418_v10, %s4445_s6 }
 0x531   : > { %3098 = vrot.lane.b32.xlu1 %v6412_v55, %s4445_s6  ;;  %v2906_v28 = vpop.permute.xlu2 %2905 }
 0x532   : > { %3231 = vrot.lane.b32.xlu0 %v7094_v7, %s4446_s22  ;;  %2972 = vst.msk [vmem:[#allocation5 + $0xf0] sm:$0xff] %vm2941_vm0, %v2906_v28  ;;  %v3570_v7 = vld [vmem:[#allocation4 + $0xf1] sm:$0xff] }
 0x533   : > { %v2886_v32 = vpop.permute.xlu1 %2885 }
 0x534   : > { %v2890_v4 = vpop.permute.xlu0 %2889  ;;  %2962 = vst.msk [vmem:[#allocation5 + $0xa0] sm:$0xff] %vm2941_vm0, %v2886_v32  ;;  %v3361_v32 = vld [vmem:[#allocation4 + $0x30] sm:$0xff] }
 0x535   : > { %2964 = vst.msk [vmem:[#allocation5 + $0xb0] sm:$0xff] %vm2941_vm0, %v2890_v4 }
 0x537   : > { %3235 = vrot.lane.b32.xlu2 %v7097_v36, %s4446_s22 }
 0x539   : > { %3233 = vrot.lane.b32.xlu1 %v7095_v53, %s4446_s22  ;;  %v3041_v49 = vpop.permute.xlu2 %3040  ;;  %v3554_v53 = vld [vmem:[#allocation4 + $0x31] sm:$0xff] }
 0x53a   : > { %3237 = vrot.lane.b32.xlu0 %v7096_v23, %s4446_s22  ;;  %3136 = vst.msk [vmem:[#allocation5 + $0x8] sm:$0xff] %vm3134_vm1, %v3041_v49  ;;  %v3747_v23 = vld [vmem:[#allocation4 + $0x32] sm:$0xff] }
 0x53b   : > { %v2892_v17 = vpop.permute.xlu1 %2891  ;;  %v3571_v49 = vld [vmem:[#allocation4 + $0xf9] sm:$0xff] }
 0x53c   : > { %v2896_v26 = vpop.permute.xlu0 %2895  ;;  %2965 = vst.msk [vmem:[#allocation5 + $0xb8] sm:$0xff] %vm2941_vm0, %v2892_v17 }
 0x53d   : > { %2967 = vst.msk [vmem:[#allocation5 + $0xc8] sm:$0xff] %vm2941_vm0, %v2896_v26 }
 0x53f   : > { %3241 = vrot.lane.b32.xlu2 %v7100_v29, %s4446_s22  ;;  %v3748_v29 = vld [vmem:[#allocation4 + $0x3a] sm:$0xff] }
 0x541   : > { %3239 = vrot.lane.b32.xlu1 %v7098_v12, %s4446_s22  ;;  %v3047_v56 = vpop.permute.xlu2 %3046  ;;  %v3362_v12 = vld [vmem:[#allocation4 + $0x38] sm:$0xff] }
 0x542   : > { %3243 = vrot.lane.b32.xlu0 %v7099_v35, %s4446_s22  ;;  %3139 = vst.msk [vmem:[#allocation5 + $0x20] sm:$0xff] %vm3134_vm1, %v3047_v56 }
 0x543   : > { %v2898_v31 = vpop.permute.xlu1 %2897 }
 0x544   : > { %v2902_v8 = vpop.permute.xlu0 %2901  ;;  %2968 = vst.msk [vmem:[#allocation5 + $0xd0] sm:$0xff] %vm2941_vm0, %v2898_v31 }
 0x545   : > { %2970 = vst.msk [vmem:[#allocation5 + $0xe0] sm:$0xff] %vm2941_vm0, %v2902_v8  ;;  %v3555_v8 = vld [vmem:[#allocation4 + $0x39] sm:$0xff] }
 0x547   : > { %3247 = vrot.lane.b32.xlu2 %v7103_v61, %s4446_s22 }
 0x549   : > { %3245 = vrot.lane.b32.xlu1 %v7101_v37, %s4446_s22  ;;  %v3053_v25 = vpop.permute.xlu2 %3052 }
 0x54a   : > { %3249 = vrot.lane.b32.xlu0 %v7102_v9, %s4446_s22  ;;  %3142 = vst.msk [vmem:[#allocation5 + $0x38] sm:$0xff] %vm3134_vm1, %v3053_v25 }
 0x54b   : > { %v2904_v27 = vpop.permute.xlu1 %2903 }
 0x54c   : > { %v2908_v30 = vpop.permute.xlu0 %2907  ;;  %2971 = vst.msk [vmem:[#allocation5 + $0xe8] sm:$0xff] %vm2941_vm0, %v2904_v27  ;;  %v3572_v27 = vld [vmem:[#allocation4 + $0x109] sm:$0xff] }
 0x54d   : > { %2973 = vst.msk [vmem:[#allocation5 + $0xf8] sm:$0xff] %vm2941_vm0, %v2908_v30  ;;  %v3363_v30 = vld [vmem:[#allocation4 + $0x48] sm:$0xff] }
 0x54f   : > { %3253 = vrot.lane.b32.xlu2 %v7106_v52, %s4446_s22 }
 0x551   : > { %3251 = vrot.lane.b32.xlu1 %v7104_v6, %s4446_s22  ;;  %v3059_v45 = vpop.permute.xlu2 %3058  ;;  %v3556_v6 = vld [vmem:[#allocation4 + $0x49] sm:$0xff] }
 0x552   : > { %3255 = vrot.lane.b32.xlu0 %v7105_v1, %s4446_s22  ;;  %3145 = vst.msk [vmem:[#allocation5 + $0x50] sm:$0xff] %vm3134_vm1, %v3059_v45  ;;  %v3749_v1 = vld [vmem:[#allocation4 + $0x4a] sm:$0xff] }
 0x553   : > { %v3039_v48 = vpop.permute.xlu1 %3038  ;;  %v3573_v45 = vld [vmem:[#allocation4 + $0x111] sm:$0xff] }
 0x554   : > { %v3043_v38 = vpop.permute.xlu0 %3042  ;;  %3135 = vst.msk [vmem:[#allocation5] sm:$0xff] %vm3134_vm1, %v3039_v48 }
 0x555   : > { %3137 = vst.msk [vmem:[#allocation5 + $0x10] sm:$0xff] %vm3134_vm1, %v3043_v38 }
 0x557   : > { %3259 = vrot.lane.b32.xlu2 %v7109_v41, %s4446_s22  ;;  %v3557_v41 = vld [vmem:[#allocation4 + $0x51] sm:$0xff] }
 0x559   : > { %3257 = vrot.lane.b32.xlu1 %v7107_v63, %s4446_s22  ;;  %v3065_v59 = vpop.permute.xlu2 %3064  ;;  %v3364_v63 = vld [vmem:[#allocation4 + $0x50] sm:$0xff] }
 0x55a   : > { %3261 = vrot.lane.b32.xlu0 %v7108_v47, %s4446_s22  ;;  %3148 = vst.msk [vmem:[#allocation5 + $0x68] sm:$0xff] %vm3134_vm1, %v3065_v59  ;;  %v3750_v59 = vld [vmem:[#allocation4 + $0x52] sm:$0xff] }
 0x55b   : > { %v3045_v15 = vpop.permute.xlu1 %3044 }
 0x55c   : > { %v3049_v13 = vpop.permute.xlu0 %3048  ;;  %3138 = vst.msk [vmem:[#allocation5 + $0x18] sm:$0xff] %vm3134_vm1, %v3045_v15  ;;  %v3766_v15 = vld [vmem:[#allocation4 + $0x112] sm:$0xff] }
 0x55d   : > { %3140 = vst.msk [vmem:[#allocation5 + $0x28] sm:$0xff] %vm3134_vm1, %v3049_v13 }
 0x55f   : > { %3265 = vrot.lane.b32.xlu2 %v7112_v33, %s4446_s22  ;;  %v3365_v33 = vld [vmem:[#allocation4 + $0x60] sm:$0xff] }
 0x561   : > { %3263 = vrot.lane.b32.xlu1 %v7110_v57, %s4446_s22  ;;  %v3071_v62 = vpop.permute.xlu2 %3070 }
 0x562   : > { %3267 = vrot.lane.b32.xlu0 %v7111_v14, %s4446_s22  ;;  %3151 = vst.msk [vmem:[#allocation5 + $0x80] sm:$0xff] %vm3134_vm1, %v3071_v62 }
 0x563   : > { %v3051_v20 = vpop.permute.xlu1 %3050 }
 0x564   : > { %v3055_v34 = vpop.permute.xlu0 %3054  ;;  %3141 = vst.msk [vmem:[#allocation5 + $0x30] sm:$0xff] %vm3134_vm1, %v3051_v20 }
 0x565   : > { %3143 = vst.msk [vmem:[#allocation5 + $0x40] sm:$0xff] %vm3134_vm1, %v3055_v34  ;;  %v3574_v34 = vld [vmem:[#allocation4 + $0x121] sm:$0xff] }
 0x567   : > { %3271 = vrot.lane.b32.xlu2 %v7115_v51, %s4446_s22 }
 0x569   : > { %3269 = vrot.lane.b32.xlu1 %v7113_v60, %s4446_s22  ;;  %v3077_v16 = vpop.permute.xlu2 %3076 }
 0x56a   : > { %3273 = vrot.lane.b32.xlu0 %v7114_v21, %s4446_s22  ;;  %3154 = vst.msk [vmem:[#allocation5 + $0x98] sm:$0xff] %vm3134_vm1, %v3077_v16  ;;  %v3382_v16 = vld [vmem:[#allocation4 + $0x128] sm:$0xff] }
 0x56b   : > { %v3057_v58 = vpop.permute.xlu1 %3056 }
 0x56c   : > { %v3061_v44 = vpop.permute.xlu0 %3060  ;;  %3144 = vst.msk [vmem:[#allocation5 + $0x48] sm:$0xff] %vm3134_vm1, %v3057_v58  ;;  %v3558_v58 = vld [vmem:[#allocation4 + $0x61] sm:$0xff] }
 0x56d   : > { %3146 = vst.msk [vmem:[#allocation5 + $0x58] sm:$0xff] %vm3134_vm1, %v3061_v44  ;;  %v3751_v44 = vld [vmem:[#allocation4 + $0x62] sm:$0xff] }
 0x56f   : > { %3277 = vrot.lane.b32.xlu2 %v7117_v19, %s4446_s22  ;;  %v3575_v19 = vld [vmem:[#allocation4 + $0x129] sm:$0xff] }
 0x571   : > { %3275 = vrot.lane.b32.xlu1 %v7116_v43, %s4446_s22  ;;  %v3083_v3 = vpop.permute.xlu2 %3082 }
 0x572   : > { %3279 = vrot.lane.b32.xlu0 %v6208_v46, %s4446_s22  ;;  %3157 = vst.msk [vmem:[#allocation5 + $0xb0] sm:$0xff] %vm3134_vm1, %v3083_v3  ;;  %v3366_v3 = vld [vmem:[#allocation4 + $0x68] sm:$0xff] }
 0x573   : > { %v3063_v22 = vpop.permute.xlu1 %3062 }
 0x574   : > { %v3067_v11 = vpop.permute.xlu0 %3066  ;;  %3147 = vst.msk [vmem:[#allocation5 + $0x60] sm:$0xff] %vm3134_vm1, %v3063_v22 }
 0x575   : > { %3149 = vst.msk [vmem:[#allocation5 + $0x70] sm:$0xff] %vm3134_vm1, %v3067_v11  ;;  %v3980_v11 = vld [vmem:[%s6928_s3 + $0x40] sm:$0xff] }
 0x576   : > { %4397 = vmatpush.msra.mxu2 %v3980_v11  ;;  %4089 = vmatpush.msra.mxu1 %v3980_v11  ;;  %v3772_v11 = vld [vmem:[#allocation4 + $0x15a] sm:$0xff] }
 0x577   : > { %3283 = vrot.lane.b32.xlu2 %v7119_v24, %s4446_s22  ;;  %v3979_v24 = vld [vmem:[%s6928_s3 + $0x38] sm:$0xff] }
 0x578   : > { %4398 = vmatpush.msra.mxu2 %v3979_v24  ;;  %4090 = vmatpush.msra.mxu1 %v3979_v24 }
 0x579   : > { %3281 = vrot.lane.b32.xlu1 %v7118_v42, %s4446_s22  ;;  %v3089_v2 = vpop.permute.xlu2 %3088 }
 0x57a   : > { %3457 = vrot.lane.b32.xlu0 %v5879_v40, %s4447_s23  ;;  %3160 = vst.msk [vmem:[#allocation5 + $0xc8] sm:$0xff] %vm3134_vm1, %v3089_v2 }
 0x57b   : > { %v3069_v46 = vpop.permute.xlu1 %3068 }
 0x57c   : > { %v3073_v0 = vpop.permute.xlu0 %3072  ;;  %3150 = vst.msk [vmem:[#allocation5 + $0x78] sm:$0xff] %vm3134_vm1, %v3069_v46  ;;  %v3768_v46 = vld [vmem:[#allocation4 + $0x12a] sm:$0xff] }
 0x57d   : > { %3152 = vst.msk [vmem:[#allocation5 + $0x88] sm:$0xff] %vm3134_vm1, %v3073_v0 }
 0x57f   : > { %3843 = vrot.lane.b32.xlu2 %v7111_v14, %s4449_s25 }
 0x581   : > { %3650 = vrot.lane.b32.xlu1 %v3570_v7, %s4448_s24  ;;  %v3095_v28 = vpop.permute.xlu2 %3094  ;;  %v3559_v7 = vld [vmem:[#allocation4 + $0x69] sm:$0xff] }
 0x582   : > { %3425 = vrot.lane.b32.xlu0 %v3361_v32, %s4447_s23  ;;  %3163 = vst.msk [vmem:[#allocation5 + $0xe0] sm:$0xff] %vm3134_vm1, %v3095_v28  ;;  %v3978_v32 = vld [vmem:[%s6928_s3 + $0x30] sm:$0xff]  ;;  %v3976_v28 = vld [vmem:[%s6928_s3 + $0x20] sm:$0xff] }
 0x583   : > { %v3075_v40 = vpop.permute.xlu1 %3074  ;;  %4399 = vmatpush.msra.mxu2 %v3978_v32  ;;  %4091 = vmatpush.msra.mxu1 %v3978_v32 }
 0x584   : > { %v3079_v4 = vpop.permute.xlu0 %3078  ;;  %3153 = vst.msk [vmem:[#allocation5 + $0x90] sm:$0xff] %vm3134_vm1, %v3075_v40  ;;  %v3977_v40 = vld [vmem:[%s6928_s3 + $0x28] sm:$0xff] }
 0x585   : > { %3155 = vst.msk [vmem:[#allocation5 + $0xa0] sm:$0xff] %vm3134_vm1, %v3079_v4  ;;  %v3752_v4 = vld [vmem:[#allocation4 + $0x6a] sm:$0xff]  ;;  %4400 = vmatpush.msra.mxu2 %v3977_v40  ;;  %4092 = vmatpush.msra.mxu1 %v3977_v40 }
 0x587   : > { %3459 = vrot.lane.b32.xlu2 %v5897_v54, %s4447_s23  ;;  %4401 = vmatpush.msra.mxu2 %v3976_v28 }
 0x588   : > { %4093 = vmatpush.msra.mxu1 %v3976_v28  ;;  %v3371_v28 = vld [vmem:[#allocation4 + $0xa8] sm:$0xff] }
 0x589   : > { %3618 = vrot.lane.b32.xlu1 %v3554_v53, %s4448_s24  ;;  %v3101_v36 = vpop.permute.xlu2 %3100 }
 0x58a   : > { %3811 = vrot.lane.b32.xlu0 %v3747_v23, %s4449_s25  ;;  %3166 = vst.msk [vmem:[#allocation5 + $0xf8] sm:$0xff] %vm3134_vm1, %v3101_v36  ;;  %v3974_v36 = vld [vmem:[%s6928_s3 + $0x10] sm:$0xff] }
 0x58b   : > { %v3081_v17 = vpop.permute.xlu1 %3080 }
 0x58c   : > { %v3085_v26 = vpop.permute.xlu0 %3084  ;;  %3156 = vst.msk [vmem:[#allocation5 + $0xa8] sm:$0xff] %vm3134_vm1, %v3081_v17  ;;  %v3975_v17 = vld [vmem:[%s6928_s3 + $0x18] sm:$0xff] }
 0x58d   : > { %3158 = vst.msk [vmem:[#allocation5 + $0xb8] sm:$0xff] %vm3134_vm1, %v3085_v26  ;;  %4402 = vmatpush.msra.mxu2 %v3975_v17  ;;  %4094 = vmatpush.msra.mxu1 %v3975_v17 }
 0x58f   : > { %3845 = vrot.lane.b32.xlu2 %v7113_v60, %s4449_s25  ;;  %v3767_v60 = vld [vmem:[#allocation4 + $0x122] sm:$0xff]  ;;  %4403 = vmatpush.msra.mxu2 %v3974_v36 }
 0x590   : > { %4095 = vmatpush.msra.mxu1 %v3974_v36 }
 0x591   : > { %3652 = vrot.lane.b32.xlu1 %v3571_v49, %s4448_s24  ;;  %v3236_v54 = vpop.permute.xlu2 %3235  ;;  %v3576_v49 = vld [vmem:[#allocation4 + $0x139] sm:$0xff] }
 0x592   : > { %3427 = vrot.lane.b32.xlu0 %v3362_v12, %s4447_s23  ;;  %3330 = vst.msk [vmem:[#allocation5 + $0x10] sm:$0xff] %vm3327_vm2, %v3236_v54  ;;  %v3973_v12 = vld [vmem:[%s6928_s3 + $0x8] sm:$0xff] }
 0x593   : > { %v3087_v35 = vpop.permute.xlu1 %3086  ;;  %4404 = vmatpush.msra.mxu2 %v3973_v12  ;;  %v3769_v54 = vld [vmem:[#allocation4 + $0x13a] sm:$0xff]  ;;  %4096 = vmatpush.msra.mxu1 %v3973_v12 }
 0x594   : > { %v3091_v31 = vpop.permute.xlu0 %3090  ;;  %3159 = vst.msk [vmem:[#allocation5 + $0xc0] sm:$0xff] %vm3134_vm1, %v3087_v35  ;;  %v3972_v35 = vld [vmem:[%s6928_s3] sm:$0xff] }
 0x595   : > { %3161 = vst.msk [vmem:[#allocation5 + $0xd0] sm:$0xff] %vm3134_vm1, %v3091_v31  ;;  %4405 = vmatpush.msra.mxu2 %v3972_v35  ;;  %4097 = vmatpush.msra.mxu1 %v3972_v35 }
 0x597   : > { %3461 = vrot.lane.b32.xlu2 %v5920_v39, %s4447_s23 }
 0x599   : > { %3620 = vrot.lane.b32.xlu1 %v3555_v8, %s4448_s24  ;;  %v3242_v9 = vpop.permute.xlu2 %3241 }
 0x59a   : > { %3813 = vrot.lane.b32.xlu0 %v3748_v29, %s4449_s25  ;;  %3333 = vst.msk [vmem:[#allocation5 + $0x28] sm:$0xff] %vm3327_vm2, %v3242_v9 }
 0x59b   : > { %v3093_v56 = vpop.permute.xlu1 %3092 }
 0x59c   : > { %v3097_v37 = vpop.permute.xlu0 %3096  ;;  %3162 = vst.msk [vmem:[#allocation5 + $0xd8] sm:$0xff] %vm3134_vm1, %v3093_v56  ;;  %v3560_v56 = vld [vmem:[#allocation4 + $0x79] sm:$0xff] }
 0x59d   : > { %3164 = vst.msk [vmem:[#allocation5 + $0xe8] sm:$0xff] %vm3134_vm1, %v3097_v37  ;;  %v3753_v37 = vld [vmem:[#allocation4 + $0x7a] sm:$0xff] }
 0x59f   : > { %3847 = vrot.lane.b32.xlu2 %v7115_v51, %s4449_s25 }
 0x5a1   : > { %3654 = vrot.lane.b32.xlu1 %v3572_v27, %s4448_s24  ;;  %v3248_v39 = vpop.permute.xlu2 %3247  ;;  %v3384_v27 = vld [vmem:[#allocation4 + $0x140] sm:$0xff] }
 0x5a2   : > { %3429 = vrot.lane.b32.xlu0 %v3363_v30, %s4447_s23  ;;  %3336 = vst.msk [vmem:[#allocation5 + $0x40] sm:$0xff] %vm3327_vm2, %v3248_v39  ;;  %v3368_v39 = vld [vmem:[#allocation4 + $0x80] sm:$0xff] }
 0x5a3   : > { %v3099_v61 = vpop.permute.xlu1 %3098 }
 0x5a4   : > { %v3232_v25 = vpop.permute.xlu0 %3231  ;;  %3165 = vst.msk [vmem:[#allocation5 + $0xf0] sm:$0xff] %vm3134_vm1, %v3099_v61 }
 0x5a5   : > { %3328 = vst.msk [vmem:[#allocation5] sm:$0xff] %vm3327_vm2, %v3232_v25  ;;  %v3577_v25 = vld [vmem:[#allocation4 + $0x141] sm:$0xff] }
 0x5a7   : > { %3463 = vrot.lane.b32.xlu2 %v5932_v18, %s4447_s23 }
 0x5a9   : > { %3622 = vrot.lane.b32.xlu1 %v3556_v6, %s4448_s24  ;;  %v3254_v52 = vpop.permute.xlu2 %3253 }
 0x5aa   : > { %3815 = vrot.lane.b32.xlu0 %v3749_v1, %s4449_s25  ;;  %3339 = vst.msk [vmem:[#allocation5 + $0x58] sm:$0xff] %vm3327_vm2, %v3254_v52  ;;  %v3770_v1 = vld [vmem:[#allocation4 + $0x142] sm:$0xff] }
 0x5ab   : > { %v3234_v48 = vpop.permute.xlu1 %3233  ;;  %v3561_v52 = vld [vmem:[#allocation4 + $0x81] sm:$0xff] }
 0x5ac   : > { %v3238_v38 = vpop.permute.xlu0 %3237  ;;  %3329 = vst.msk [vmem:[#allocation5 + $0x8] sm:$0xff] %vm3327_vm2, %v3234_v48 }
 0x5ad   : > { %3331 = vst.msk [vmem:[#allocation5 + $0x18] sm:$0xff] %vm3327_vm2, %v3238_v38 }
 0x5af   : > { %3849 = vrot.lane.b32.xlu2 %v3766_v15, %s4449_s25 }
 0x5b1   : > { %3656 = vrot.lane.b32.xlu1 %v3573_v45, %s4448_s24  ;;  %v3260_v18 = vpop.permute.xlu2 %3259  ;;  %v3754_v45 = vld [vmem:[#allocation4 + $0x82] sm:$0xff] }
 0x5b2   : > { %3431 = vrot.lane.b32.xlu0 %v3364_v63, %s4447_s23  ;;  %3342 = vst.msk [vmem:[#allocation5 + $0x70] sm:$0xff] %vm3327_vm2, %v3260_v18 }
 0x5b3   : > { %v3240_v47 = vpop.permute.xlu1 %3239 }
 0x5b4   : > { %v3244_v13 = vpop.permute.xlu0 %3243  ;;  %3332 = vst.msk [vmem:[#allocation5 + $0x20] sm:$0xff] %vm3327_vm2, %v3240_v47  ;;  %v3385_v47 = vld [vmem:[#allocation4 + $0x150] sm:$0xff] }
 0x5b5   : > { %3334 = vst.msk [vmem:[#allocation5 + $0x30] sm:$0xff] %vm3327_vm2, %v3244_v13 }
 0x5b7   : > { %3465 = vrot.lane.b32.xlu2 %v5948_v50, %s4447_s23 }
 0x5b9   : > { %3624 = vrot.lane.b32.xlu1 %v3557_v41, %s4448_s24  ;;  %v3266_v20 = vpop.permute.xlu2 %3265  ;;  %v3578_v41 = vld [vmem:[#allocation4 + $0x151] sm:$0xff] }
 0x5ba   : > { %3817 = vrot.lane.b32.xlu0 %v3750_v59, %s4449_s25  ;;  %3345 = vst.msk [vmem:[#allocation5 + $0x88] sm:$0xff] %vm3327_vm2, %v3266_v20  ;;  %v3369_v59 = vld [vmem:[#allocation4 + $0x90] sm:$0xff] }
 0x5bb   : > { %v3246_v57 = vpop.permute.xlu1 %3245 }
 0x5bc   : > { %v3250_v14 = vpop.permute.xlu0 %3249  ;;  %3335 = vst.msk [vmem:[#allocation5 + $0x38] sm:$0xff] %vm3327_vm2, %v3246_v57 }
 0x5bd   : > { %3337 = vst.msk [vmem:[#allocation5 + $0x48] sm:$0xff] %vm3327_vm2, %v3250_v14  ;;  %v3771_v14 = vld [vmem:[#allocation4 + $0x152] sm:$0xff] }
 0x5bf   : > { %3851 = vrot.lane.b32.xlu2 %v3767_v60, %s4449_s25  ;;  %v3755_v60 = vld [vmem:[#allocation4 + $0x92] sm:$0xff] }
 0x5c1   : > { %3658 = vrot.lane.b32.xlu1 %v3574_v34, %s4448_s24  ;;  %v3272_v50 = vpop.permute.xlu2 %3271 }
 0x5c2   : > { %3433 = vrot.lane.b32.xlu0 %v3365_v33, %s4447_s23  ;;  %3348 = vst.msk [vmem:[#allocation5 + $0xa0] sm:$0xff] %vm3327_vm2, %v3272_v50  ;;  %v3386_v50 = vld [vmem:[#allocation4 + $0x158] sm:$0xff] }
 0x5c3   : > { %v3252_v62 = vpop.permute.xlu1 %3251 }
 0x5c4   : > { %v3256_v21 = vpop.permute.xlu0 %3255  ;;  %3338 = vst.msk [vmem:[#allocation5 + $0x50] sm:$0xff] %vm3327_vm2, %v3252_v62  ;;  %v3562_v62 = vld [vmem:[#allocation4 + $0x91] sm:$0xff] }
 0x5c5   : > { %3340 = vst.msk [vmem:[#allocation5 + $0x60] sm:$0xff] %vm3327_vm2, %v3256_v21 }
 0x5c7   : > { %3467 = vrot.lane.b32.xlu2 %v3382_v16, %s4447_s23  ;;  %v3579_v16 = vld [vmem:[#allocation4 + $0x159] sm:$0xff] }
 0x5c9   : > { %3626 = vrot.lane.b32.xlu1 %v3558_v58, %s4448_s24  ;;  %v3278_v22 = vpop.permute.xlu2 %3277 }
 0x5ca   : > { %3819 = vrot.lane.b32.xlu0 %v3751_v44, %s4449_s25  ;;  %3351 = vst.msk [vmem:[#allocation5 + $0xb8] sm:$0xff] %vm3327_vm2, %v3278_v22 }
 0x5cb   : > { %v3258_v51 = vpop.permute.xlu1 %3257 }
 0x5cc   : > { %v3262_v43 = vpop.permute.xlu0 %3261  ;;  %3341 = vst.msk [vmem:[#allocation5 + $0x68] sm:$0xff] %vm3327_vm2, %v3258_v51 }
 0x5cd   : > { %3343 = vst.msk [vmem:[#allocation5 + $0x78] sm:$0xff] %vm3327_vm2, %v3262_v43  ;;  %v3370_v43 = vld [vmem:[#allocation4 + $0x98] sm:$0xff] }
 0x5cf   : > { %3853 = vrot.lane.b32.xlu2 %v3768_v46, %s4449_s25  ;;  %v3563_v46 = vld [vmem:[#allocation4 + $0x99] sm:$0xff] }
 0x5d1   : > { %3660 = vrot.lane.b32.xlu1 %v3575_v19, %s4448_s24  ;;  %v3284_v2 = vpop.permute.xlu2 %3283 }
 0x5d2   : > { %3435 = vrot.lane.b32.xlu0 %v3366_v3, %s4447_s23  ;;  %3354 = vst.msk [vmem:[#allocation5 + $0xd0] sm:$0xff] %vm3327_vm2, %v3284_v2  ;;  %v3387_v2 = vld [vmem:[#allocation4 + $0x168] sm:$0xff] }
 0x5d3   : > { %v3264_v42 = vpop.permute.xlu1 %3263 }
 0x5d4   : > { %v3268_v0 = vpop.permute.xlu0 %3267  ;;  %3344 = vst.msk [vmem:[#allocation5 + $0x80] sm:$0xff] %vm3327_vm2, %v3264_v42 }
 0x5d5   : > { %3346 = vst.msk [vmem:[#allocation5 + $0x90] sm:$0xff] %vm3327_vm2, %v3268_v0  ;;  %v3756_v0 = vld [vmem:[#allocation4 + $0x9a] sm:$0xff] }
 0x5d7   : > { %3469 = vrot.lane.b32.xlu2 %v5982_v5, %s4447_s23  ;;  %v3367_v5 = vld [vmem:[#allocation4 + $0x78] sm:$0xff] }
 0x5d9   : > { %3628 = vrot.lane.b32.xlu1 %v3559_v7, %s4448_s24  ;;  %v3844_v26 = vpop.permute.xlu2 %3843 }
 0x5da   : > { %3821 = vrot.lane.b32.xlu0 %v3752_v4, %s4449_s25  ;;  %v3580_v4 = vld [vmem:[#allocation4 + $0x169] sm:$0xff] }
 0x5db   : > { %v3270_v53 = vpop.permute.xlu1 %3269 }
 0x5dc   : > { %v3274_v23 = vpop.permute.xlu0 %3273  ;;  %3347 = vst.msk [vmem:[#allocation5 + $0x98] sm:$0xff] %vm3327_vm2, %v3270_v53 }
 0x5dd   : > { %3349 = vst.msk [vmem:[#allocation5 + $0xa8] sm:$0xff] %vm3327_vm2, %v3274_v23  ;;  %v3773_v23 = vld [vmem:[#allocation4 + $0x16a] sm:$0xff] }
 0x5df   : > { %3855 = vrot.lane.b32.xlu2 %v3769_v54, %s4449_s25 }
 0x5e1   : > { %3662 = vrot.lane.b32.xlu1 %v3576_v49, %s4448_s24  ;;  %v3460_v29 = vpop.permute.xlu2 %3459  ;;  %v3388_v49 = vld [vmem:[#allocation4 + $0x170] sm:$0xff] }
 0x5e2   : > { %3437 = vrot.lane.b32.xlu0 %v3367_v5, %s4447_s23  ;;  %3539 = vst.msk [vmem:[#allocation5 + $0x88] sm:$0xff] %vm3521_vm3, %v3460_v29  ;;  %v3564_v5 = vld [vmem:[#allocation4 + $0xa9] sm:$0xff]  ;;  %v3774_v29 = vld [vmem:[#allocation4 + $0x172] sm:$0xff] }
 0x5e3   : > { %v3276_v31 = vpop.permute.xlu1 %3275 }
 0x5e4   : > { %v3280_v8 = vpop.permute.xlu0 %3279  ;;  %3350 = vst.msk [vmem:[#allocation5 + $0xb0] sm:$0xff] %vm3327_vm2, %v3276_v31 }
 0x5e5   : > { %3352 = vst.msk [vmem:[#allocation5 + $0xc0] sm:$0xff] %vm3327_vm2, %v3280_v8  ;;  %v3757_v8 = vld [vmem:[#allocation4 + $0xaa] sm:$0xff] }
 0x5e7   : > { %3471 = vrot.lane.b32.xlu2 %v3384_v27, %s4447_s23 }
 0x5e9   : > { %3630 = vrot.lane.b32.xlu1 %v3560_v56, %s4448_s24  ;;  %v3846_v61 = vpop.permute.xlu2 %3845 }
 0x5ea   : > { %3823 = vrot.lane.b32.xlu0 %v3753_v37, %s4449_s25  ;;  %v3581_v37 = vld [vmem:[#allocation4 + $0x171] sm:$0xff] }
 0x5eb   : > { %v3282_v9 = vpop.permute.xlu1 %3281 }
 0x5ec   : > { %v3458_v30 = vpop.permute.xlu0 %3457  ;;  %3353 = vst.msk [vmem:[#allocation5 + $0xc8] sm:$0xff] %vm3327_vm2, %v3282_v9 }
 0x5ed   : > { %3538 = vst.msk [vmem:[#allocation5 + $0x80] sm:$0xff] %vm3521_vm3, %v3458_v30 }
 0x5ef   : > { %3857 = vrot.lane.b32.xlu2 %v3770_v1, %s4449_s25 }
 0x5f1   : > { %3664 = vrot.lane.b32.xlu1 %v3577_v25, %s4448_s24  ;;  %v3462_v38 = vpop.permute.xlu2 %3461  ;;  %v3565_v25 = vld [vmem:[#allocation4 + $0xb1] sm:$0xff] }
 0x5f2   : > { %3439 = vrot.lane.b32.xlu0 %v3368_v39, %s4447_s23  ;;  %3540 = vst.msk [vmem:[#allocation5 + $0x90] sm:$0xff] %vm3521_vm3, %v3462_v38  ;;  %v3389_v38 = vld [vmem:[#allocation4 + $0x180] sm:$0xff] }
 0x5f3   : > { %v3651_v6 = vpop.permute.xlu1 %3650 }
 0x5f4   : > { %v3426_v48 = vpop.permute.xlu0 %3425  ;;  %3731 = vst.msk [vmem:[#allocation5 + $0x80] sm:$0xff] %vm3714_vm4, %v3651_v6 }
 0x5f5   : > { %3522 = vst.msk [vmem:[#allocation5] sm:$0xff] %vm3521_vm3, %v3426_v48 }
 0x5f6   : > { %3924 = vst.msk [vmem:[#allocation5 + $0x80] sm:$0xff] %vm3907_vm5, %v3844_v26 }
 0x5f7   : > { %3473 = vrot.lane.b32.xlu2 %v3385_v47, %s4447_s23 }
 0x5f9   : > { %3632 = vrot.lane.b32.xlu1 %v3561_v52, %s4448_s24  ;;  %v3848_v18 = vpop.permute.xlu2 %3847 }
 0x5fa   : > { %3825 = vrot.lane.b32.xlu0 %v3754_v45, %s4449_s25  ;;  %v3758_v45 = vld [vmem:[#allocation4 + $0xb2] sm:$0xff] }
 0x5fb   : > { %v3619_v63 = vpop.permute.xlu1 %3618 }
 0x5fc   : > { %v3812_v15 = vpop.permute.xlu0 %3811  ;;  %3715 = vst.msk [vmem:[#allocation5] sm:$0xff] %vm3714_vm4, %v3619_v63 }
 0x5fd   : > { %3908 = vst.msk [vmem:[#allocation5] sm:$0xff] %vm3907_vm5, %v3812_v15  ;;  %v3956_v13 = vld [vmem:[#allocation5 + $0x80] sm:$0xff] }
 0x5fe   : > { %4372 = vmatmul.msk.f32.vlgmr.msra.gmra.mxu2 %vm3985_vm6, %v3956_v13  ;;  %v3775_v13 = vld [vmem:[#allocation4 + $0x182] sm:$0xff] }
 0x5ff   : > { %3859 = vrot.lane.b32.xlu2 %v3771_v14, %s4449_s25  ;;  %v3566_v14 = vld [vmem:[#allocation4 + $0xc1] sm:$0xff] }
 0x601   : > { %3666 = vrot.lane.b32.xlu1 %v3578_v41, %s4448_s24  ;;  %v3464_v33 = vpop.permute.xlu2 %3463 }
 0x602   : > { %3441 = vrot.lane.b32.xlu0 %v3369_v59, %s4447_s23  ;;  %3541 = vst.msk [vmem:[#allocation5 + $0x98] sm:$0xff] %vm3521_vm3, %v3464_v33  ;;  %v3390_v33 = vld [vmem:[#allocation4 + $0x188] sm:$0xff] }
 0x603   : > { %v3653_v57 = vpop.permute.xlu1 %3652 }
 0x604   : > { %v3428_v20 = vpop.permute.xlu0 %3427  ;;  %3732 = vst.msk [vmem:[#allocation5 + $0x88] sm:$0xff] %vm3714_vm4, %v3653_v57  ;;  %v3940_v34 = vld [vmem:[#allocation5] sm:$0xff] }
 0x605   : > { %3523 = vst.msk [vmem:[#allocation5 + $0x8] sm:$0xff] %vm3521_vm3, %v3428_v20  ;;  %4356 = vmatmul.msk.f32.vlgmr.msra.gmra.mxu1 %vm3985_vm6, %v3940_v34  ;;  %v3759_v20 = vld [vmem:[#allocation4 + $0xc2] sm:$0xff] }
 0x606   : > { %3925 = vst.msk [vmem:[#allocation5 + $0x88] sm:$0xff] %vm3907_vm5, %v3846_v61  ;;  %v3372_v61 = vld [vmem:[#allocation4 + $0xb0] sm:$0xff] }
 0x607   : > { %3475 = vrot.lane.b32.xlu2 %v3386_v50, %s4447_s23  ;;  %v3374_v50 = vld [vmem:[#allocation4 + $0xc8] sm:$0xff] }
 0x609   : > { %3634 = vrot.lane.b32.xlu1 %v3562_v62, %s4448_s24  ;;  %v3850_v51 = vpop.permute.xlu2 %3849 }
 0x60a   : > { %3827 = vrot.lane.b32.xlu0 %v3755_v60, %s4449_s25 }
 0x60b   : > { %v3621_v21 = vpop.permute.xlu1 %3620 }
 0x60c   : > { %v3814_v58 = vpop.permute.xlu0 %3813  ;;  %3716 = vst.msk [vmem:[#allocation5 + $0x8] sm:$0xff] %vm3714_vm4, %v3621_v21 }
 0x60d   : > { %3909 = vst.msk [vmem:[#allocation5 + $0x8] sm:$0xff] %vm3907_vm5, %v3814_v58  ;;  %v3957_v44 = vld [vmem:[#allocation5 + $0x88] sm:$0xff] }
 0x60e   : > { %4373 = vmatmul.msk.f32.gmra.mxu2 %vm3985_vm6, %v3957_v44  ;;  %v3776_v44 = vld [vmem:[#allocation4 + $0x18a] sm:$0xff] }
 0x60f   : > { %3861 = vrot.lane.b32.xlu2 %v3772_v11, %s4449_s25 }
 0x611   : > { %3668 = vrot.lane.b32.xlu1 %v3579_v16, %s4448_s24  ;;  %v3466_v42 = vpop.permute.xlu2 %3465 }
 0x612   : > { %3443 = vrot.lane.b32.xlu0 %v3370_v43, %s4447_s23  ;;  %3542 = vst.msk [vmem:[#allocation5 + $0xa0] sm:$0xff] %vm3521_vm3, %v3466_v42 }
 0x613   : > { %v3655_v22 = vpop.permute.xlu1 %3654 }
 0x614   : > { %v3430_v19 = vpop.permute.xlu0 %3429  ;;  %3733 = vst.msk [vmem:[#allocation5 + $0x90] sm:$0xff] %vm3714_vm4, %v3655_v22  ;;  %v3941_v3 = vld [vmem:[#allocation5 + $0x8] sm:$0xff] }
 0x615   : > { %3524 = vst.msk [vmem:[#allocation5 + $0x10] sm:$0xff] %vm3521_vm3, %v3430_v19  ;;  %4357 = vmatmul.msk.f32.gmra.mxu1 %vm3985_vm6, %v3941_v3  ;;  %v3391_v22 = vld [vmem:[#allocation4 + $0x198] sm:$0xff] }
 0x616   : > { %3926 = vst.msk [vmem:[#allocation5 + $0x90] sm:$0xff] %vm3907_vm5, %v3848_v18  ;;  %v3373_v18 = vld [vmem:[#allocation4 + $0xc0] sm:$0xff] }
 0x617   : > { %3477 = vrot.lane.b32.xlu2 %v3387_v2, %s4447_s23 }
 0x619   : > { %3636 = vrot.lane.b32.xlu1 %v3563_v46, %s4448_s24  ;;  %v3852_v40 = vpop.permute.xlu2 %3851  ;;  %v3777_v46 = vld [vmem:[#allocation4 + $0x19a] sm:$0xff] }
 0x61a   : > { %3829 = vrot.lane.b32.xlu0 %v3756_v0, %s4449_s25  ;;  %v3760_v0 = vld [vmem:[#allocation4 + $0xca] sm:$0xff] }
 0x61b   : > { %v3623_v24 = vpop.permute.xlu1 %3622 }
 0x61c   : > { %v3816_v7 = vpop.permute.xlu0 %3815  ;;  %3717 = vst.msk [vmem:[#allocation5 + $0x10] sm:$0xff] %vm3714_vm4, %v3623_v24  ;;  %v3584_v24 = vld [vmem:[#allocation4 + $0x199] sm:$0xff] }
 0x61d   : > { %3910 = vst.msk [vmem:[#allocation5 + $0x10] sm:$0xff] %vm3907_vm5, %v3816_v7  ;;  %v3958_v32 = vld [vmem:[#allocation5 + $0x90] sm:$0xff] }
 0x61e   : > { %4374 = vmatmul.msk.f32.gmra.mxu2 %vm3985_vm6, %v3958_v32 }
 0x61f   : > { %3863 = vrot.lane.b32.xlu2 %v3773_v23, %s4449_s25 }
 0x621   : > { %3670 = vrot.lane.b32.xlu1 %v3580_v4, %s4448_s24  ;;  %v3468_v36 = vpop.permute.xlu2 %3467  ;;  %v3375_v4 = vld [vmem:[#allocation4 + $0xd8] sm:$0xff] }
 0x622   : > { %3445 = vrot.lane.b32.xlu0 %v3371_v28, %s4447_s23  ;;  %3543 = vst.msk [vmem:[#allocation5 + $0xa8] sm:$0xff] %vm3521_vm3, %v3468_v36  ;;  %v3568_v28 = vld [vmem:[#allocation4 + $0xd9] sm:$0xff] }
 0x623   : > { %v3657_v53 = vpop.permute.xlu1 %3656 }
 0x624   : > { %v3432_v17 = vpop.permute.xlu0 %3431  ;;  %3734 = vst.msk [vmem:[#allocation5 + $0x98] sm:$0xff] %vm3714_vm4, %v3657_v53  ;;  %v3942_v26 = vld [vmem:[#allocation5 + $0x10] sm:$0xff] }
 0x625   : > { %3525 = vst.msk [vmem:[#allocation5 + $0x18] sm:$0xff] %vm3521_vm3, %v3432_v17  ;;  %4358 = vmatmul.msk.f32.gmra.mxu1 %vm3985_vm6, %v3942_v26  ;;  %v3392_v26 = vld [vmem:[#allocation4 + $0x1a0] sm:$0xff] }
 0x626   : > { %3927 = vst.msk [vmem:[#allocation5 + $0x98] sm:$0xff] %vm3907_vm5, %v3850_v51 }
 0x627   : > { %3638 = vrot.lane.b32.xlu2 %v3564_v5, %s4448_s24  ;;  %v3761_v5 = vld [vmem:[#allocation4 + $0xda] sm:$0xff] }
 0x629   : > { %3285 = vrot.lane.b32.xlu1 %v3772_v11, %s4446_s22  ;;  %v3854_v54 = vpop.permute.xlu2 %3853  ;;  %v3567_v11 = vld [vmem:[#allocation4 + $0xc9] sm:$0xff] }
 0x62a   : > { %3479 = vrot.lane.b32.xlu0 %v3388_v49, %s4447_s23  ;;  %v3585_v49 = vld [vmem:[#allocation4 + $0x1a1] sm:$0xff] }
 0x62b   : > { %v3625_v12 = vpop.permute.xlu1 %3624 }
 0x62c   : > { %v3818_v35 = vpop.permute.xlu0 %3817  ;;  %3718 = vst.msk [vmem:[#allocation5 + $0x18] sm:$0xff] %vm3714_vm4, %v3625_v12 }
 0x62d   : > { %3911 = vst.msk [vmem:[#allocation5 + $0x18] sm:$0xff] %vm3907_vm5, %v3818_v35  ;;  %v3959_v31 = vld [vmem:[#allocation5 + $0x98] sm:$0xff] }
 0x62e   : > { %4375 = vmatmul.msk.f32.gmra.mxu2 %vm3985_vm6, %v3959_v31 }
 0x62f   : > { %3672 = vrot.lane.b32.xlu2 %v3581_v37, %s4448_s24  ;;  %v3569_v37 = vld [vmem:[#allocation4 + $0xe1] sm:$0xff] }
 0x631   : > { %3831 = vrot.lane.b32.xlu1 %v3757_v8, %s4449_s25  ;;  %v3470_v30 = vpop.permute.xlu2 %3469  ;;  %v3778_v8 = vld [vmem:[#allocation4 + $0x1a2] sm:$0xff] }
 0x632   : > { %3865 = vrot.lane.b32.xlu0 %v3774_v29, %s4449_s25  ;;  %3544 = vst.msk [vmem:[#allocation5 + $0xb0] sm:$0xff] %vm3521_vm3, %v3470_v30 }
 0x633   : > { %v3659_v56 = vpop.permute.xlu1 %3658 }
 0x634   : > { %v3434_v9 = vpop.permute.xlu0 %3433  ;;  %3735 = vst.msk [vmem:[#allocation5 + $0xa0] sm:$0xff] %vm3714_vm4, %v3659_v56  ;;  %v3943_v27 = vld [vmem:[#allocation5 + $0x18] sm:$0xff] }
 0x635   : > { %3526 = vst.msk [vmem:[#allocation5 + $0x20] sm:$0xff] %vm3521_vm3, %v3434_v9  ;;  %4359 = vmatmul.msk.f32.gmra.mxu1 %vm3985_vm6, %v3943_v27 }
 0x636   : > { %3928 = vst.msk [vmem:[#allocation5 + $0xa0] sm:$0xff] %vm3907_vm5, %v3852_v40 }
 0x637   : > { %3287 = vrot.lane.b32.xlu2 %v3773_v23, %s4446_s22 }
 0x639   : > { %3447 = vrot.lane.b32.xlu1 %v3372_v61, %s4447_s23  ;;  %v3856_v48 = vpop.permute.xlu2 %3855 }
 0x63a   : > { %3640 = vrot.lane.b32.xlu0 %v3565_v25, %s4448_s24  ;;  %v3376_v25 = vld [vmem:[#allocation4 + $0xe0] sm:$0xff] }
 0x63b   : > { %v3627_v39 = vpop.permute.xlu1 %3626 }
 0x63c   : > { %v3820_v6 = vpop.permute.xlu0 %3819  ;;  %3719 = vst.msk [vmem:[#allocation5 + $0x20] sm:$0xff] %vm3714_vm4, %v3627_v39 }
 0x63d   : > { %3912 = vst.msk [vmem:[#allocation5 + $0x20] sm:$0xff] %vm3907_vm5, %v3820_v6  ;;  %v3960_v1 = vld [vmem:[#allocation5 + $0xa0] sm:$0xff] }
 0x63e   : > { %4376 = vmatmul.msk.f32.gmra.mxu2 %vm3985_vm6, %v3960_v1 }
 0x63f   : > { %3833 = vrot.lane.b32.xlu2 %v3758_v45, %s4449_s25 }
 0x641   : > { %3481 = vrot.lane.b32.xlu1 %v3389_v38, %s4447_s23  ;;  %v3472_v15 = vpop.permute.xlu2 %3471 }
 0x642   : > { %3674 = vrot.lane.b32.xlu0 %v6412_v55, %s4448_s24  ;;  %3545 = vst.msk [vmem:[#allocation5 + $0xb8] sm:$0xff] %vm3521_vm3, %v3472_v15 }
 0x643   : > { %v3661_v52 = vpop.permute.xlu1 %3660 }
 0x644   : > { %v3436_v63 = vpop.permute.xlu0 %3435  ;;  %3736 = vst.msk [vmem:[#allocation5 + $0xa8] sm:$0xff] %vm3714_vm4, %v3661_v52  ;;  %v3944_v47 = vld [vmem:[#allocation5 + $0x20] sm:$0xff]  ;;  %v3762_v52 = vld [vmem:[#allocation4 + $0xe2] sm:$0xff] }
 0x645   : > { %3527 = vst.msk [vmem:[#allocation5 + $0x28] sm:$0xff] %vm3521_vm3, %v3436_v63  ;;  %4360 = vmatmul.msk.f32.gmra.mxu1 %vm3985_vm6, %v3944_v47 }
 0x646   : > { %3929 = vst.msk [vmem:[#allocation5 + $0xa8] sm:$0xff] %vm3907_vm5, %v3854_v54  ;;  %v6753_v54 = vld [vmem:[%s6929_s4] ss:$0 sm:$0xff] }
 0x647   : > { %3449 = vrot.lane.b32.xlu2 %v3373_v18, %s4447_s23 }
 0x649   : > { %3867 = vrot.lane.b32.xlu1 %v3775_v13, %s4449_s25  ;;  %v3858_v57 = vpop.permute.xlu2 %3857 }
 0x64a   : > { %3289 = vrot.lane.b32.xlu0 %v3774_v29, %s4446_s22 }
 0x64b   : > { %v3629_v55 = vpop.permute.xlu1 %3628 }
 0x64c   : > { %v3822_v41 = vpop.permute.xlu0 %3821  ;;  %3720 = vst.msk [vmem:[#allocation5 + $0x28] sm:$0xff] %vm3714_vm4, %v3629_v55 }
 0x64d   : > { %3913 = vst.msk [vmem:[#allocation5 + $0x28] sm:$0xff] %vm3907_vm5, %v3822_v41  ;;  %v3961_v59 = vld [vmem:[#allocation5 + $0xa8] sm:$0xff] }
 0x64e   : > { %4377 = vmatmul.msk.f32.gmra.mxu2 %vm3985_vm6, %v3961_v59 }
 0x64f   : > { %3483 = vrot.lane.b32.xlu2 %v3390_v33, %s4447_s23 }
 0x651   : > { %3642 = vrot.lane.b32.xlu1 %v3566_v14, %s4448_s24  ;;  %v3474_v21 = vpop.permute.xlu2 %3473 }
 0x652   : > { %3835 = vrot.lane.b32.xlu0 %v3759_v20, %s4449_s25  ;;  %3546 = vst.msk [vmem:[#allocation5 + $0xc0] sm:$0xff] %vm3521_vm3, %v3474_v21 }
 0x653   : > { %v3663_v34 = vpop.permute.xlu1 %3662 }
 0x654   : > { %v3438_v62 = vpop.permute.xlu0 %3437  ;;  %3737 = vst.msk [vmem:[#allocation5 + $0xb0] sm:$0xff] %vm3714_vm4, %v3663_v34  ;;  %v3945_v60 = vld [vmem:[#allocation5 + $0x28] sm:$0xff] }
 0x655   : > { %3528 = vst.msk [vmem:[#allocation5 + $0x30] sm:$0xff] %vm3521_vm3, %v3438_v62  ;;  %4361 = vmatmul.msk.f32.gmra.mxu1 %vm3985_vm6, %v3945_v60 }
 0x656   : > { %3930 = vst.msk [vmem:[#allocation5 + $0xb0] sm:$0xff] %vm3907_vm5, %v3856_v48 }
 0x657   : > { %3869 = vrot.lane.b32.xlu2 %v3776_v44, %s4449_s25 }
 0x659   : > { %3676 = vrot.lane.b32.xlu1 %v6418_v10, %s4448_s24  ;;  %v3860_v43 = vpop.permute.xlu2 %3859 }
 0x65a   : > { %3451 = vrot.lane.b32.xlu0 %v3374_v50, %s4447_s23 }
 0x65b   : > { %v3631_v58 = vpop.permute.xlu1 %3630 }
 0x65c   : > { %v3824_v51 = vpop.permute.xlu0 %3823  ;;  %3721 = vst.msk [vmem:[#allocation5 + $0x30] sm:$0xff] %vm3714_vm4, %v3631_v58 }
 0x65d   : > { %3914 = vst.msk [vmem:[#allocation5 + $0x30] sm:$0xff] %vm3907_vm5, %v3824_v51  ;;  %v3962_v16 = vld [vmem:[#allocation5 + $0xb0] sm:$0xff] }
 0x65e   : > { %4378 = vmatmul.msk.f32.gmra.mxu2 %vm3985_vm6, %v3962_v16 }
 0x65f   : > { %3644 = vrot.lane.b32.xlu2 %v3567_v11, %s4448_s24 }
 0x661   : > { %3291 = vrot.lane.b32.xlu1 %v3775_v13, %s4446_s22  ;;  %v3476_v42 = vpop.permute.xlu2 %3475 }
 0x662   : > { %3485 = vrot.lane.b32.xlu0 %v3391_v22, %s4447_s23  ;;  %3547 = vst.msk [vmem:[#allocation5 + $0xc8] sm:$0xff] %vm3521_vm3, %v3476_v42 }
 0x663   : > { %v3665_v10 = vpop.permute.xlu1 %3664 }
 0x664   : > { %v3440_v19 = vpop.permute.xlu0 %3439  ;;  %3738 = vst.msk [vmem:[#allocation5 + $0xb8] sm:$0xff] %vm3714_vm4, %v3665_v10  ;;  %v3946_v3 = vld [vmem:[#allocation5 + $0x30] sm:$0xff] }
 0x665   : > { %3529 = vst.msk [vmem:[#allocation5 + $0x38] sm:$0xff] %vm3521_vm3, %v3440_v19  ;;  %4362 = vmatmul.msk.f32.gmra.mxu1 %vm3985_vm6, %v3946_v3 }
 0x666   : > { %3931 = vst.msk [vmem:[#allocation5 + $0xb8] sm:$0xff] %vm3907_vm5, %v3858_v57 }
 0x667   : > { %3678 = vrot.lane.b32.xlu2 %v3584_v24, %s4448_s24 }
 0x669   : > { %3837 = vrot.lane.b32.xlu1 %v3760_v0, %s4449_s25  ;;  %v3862_v40 = vpop.permute.xlu2 %3861 }
 0x66a   : > { %3871 = vrot.lane.b32.xlu0 %v3777_v46, %s4449_s25 }
 0x66b   : > { %v3633_v2 = vpop.permute.xlu1 %3632 }
 0x66c   : > { %v3826_v7 = vpop.permute.xlu0 %3825  ;;  %3722 = vst.msk [vmem:[#allocation5 + $0x38] sm:$0xff] %vm3714_vm4, %v3633_v2 }
 0x66d   : > { %3915 = vst.msk [vmem:[#allocation5 + $0x38] sm:$0xff] %vm3907_vm5, %v3826_v7  ;;  %v3963_v32 = vld [vmem:[#allocation5 + $0xb8] sm:$0xff] }
 0x66e   : > { %4379 = vmatmul.msk.f32.gmra.mxu2 %vm3985_vm6, %v3963_v32 }
 0x66f   : > { %3293 = vrot.lane.b32.xlu2 %v3776_v44, %s4446_s22 }
 0x671   : > { %3453 = vrot.lane.b32.xlu1 %v3375_v4, %s4447_s23  ;;  %v3478_v36 = vpop.permute.xlu2 %3477 }
 0x672   : > { %3646 = vrot.lane.b32.xlu0 %v3568_v28, %s4448_s24  ;;  %3548 = vst.msk [vmem:[#allocation5 + $0xd0] sm:$0xff] %vm3521_vm3, %v3478_v36 }
 0x673   : > { %v3667_v53 = vpop.permute.xlu1 %3666 }
 0x674   : > { %v3442_v23 = vpop.permute.xlu0 %3441  ;;  %3739 = vst.msk [vmem:[#allocation5 + $0xc0] sm:$0xff] %vm3714_vm4, %v3667_v53  ;;  %v3947_v17 = vld [vmem:[#allocation5 + $0x38] sm:$0xff] }
 0x675   : > { %3530 = vst.msk [vmem:[#allocation5 + $0x40] sm:$0xff] %vm3521_vm3, %v3442_v23  ;;  %4363 = vmatmul.msk.f32.gmra.mxu1 %vm3985_vm6, %v3947_v17 }
 0x676   : > { %3932 = vst.msk [vmem:[#allocation5 + $0xc0] sm:$0xff] %vm3907_vm5, %v3860_v43 }
 0x677   : > { %3839 = vrot.lane.b32.xlu2 %v3761_v5, %s4449_s25 }
 0x679   : > { %3487 = vrot.lane.b32.xlu1 %v3392_v26, %s4447_s23  ;;  %v3864_v29 = vpop.permute.xlu2 %3863 }
 0x67a   : > { %3680 = vrot.lane.b32.xlu0 %v3585_v49, %s4448_s24 }
 0x67b   : > { %v3635_v12 = vpop.permute.xlu1 %3634 }
 0x67c   : > { %v3828_v35 = vpop.permute.xlu0 %3827  ;;  %3723 = vst.msk [vmem:[#allocation5 + $0x40] sm:$0xff] %vm3714_vm4, %v3635_v12 }
 0x67d   : > { %3916 = vst.msk [vmem:[#allocation5 + $0x40] sm:$0xff] %vm3907_vm5, %v3828_v35  ;;  %v3964_v31 = vld [vmem:[#allocation5 + $0xc0] sm:$0xff] }
 0x67e   : > { %4380 = vmatmul.msk.f32.gmra.mxu2 %vm3985_vm6, %v3964_v31 }
 0x67f   : > { %3455 = vrot.lane.b32.xlu2 %v3376_v25, %s4447_s23 }
 0x681   : > { %v4147_v56 = vpop.f32.mrf.mxu2  ;;  %3873 = vrot.lane.b32.xlu1 %v3778_v8, %s4449_s25  ;;  %v3639_v38 = vpop.permute.xlu2 %3638 }
 0x682   : > { %v4148_v9 = vadd.f32 %v6753_v54, %v4147_v56  ;;  %3648 = vrot.lane.b32.xlu0 %v3569_v37, %s4448_s24  ;;  %v4099_v27 = vpop.f32.mrf.mxu1 }
 0x683   : > { %v4100_v30 = vadd.f32 %v6753_v54, %v4099_v27  ;;  %v3669_v61 = vpop.permute.xlu1 %3668 }
 0x684   : > { %v4211_v39 = vmax.f32 %v4148_v9, 0.0  ;;  %v3444_v6 = vpop.permute.xlu0 %3443  ;;  %3740 = vst.msk [vmem:[#allocation5 + $0xc8] sm:$0xff] %vm3714_vm4, %v3669_v61  ;;  %v3948_v1 = vld [vmem:[#allocation5 + $0x40] sm:$0xff] }
 0x685   : > { %v4195_v48 = vmax.f32 %v4100_v30, 0.0  ;;  %3531 = vst.msk [vmem:[#allocation5 + $0x48] sm:$0xff] %vm3521_vm3, %v3444_v6  ;;  %4364 = vmatmul.msk.f32.gmra.mxu1 %vm3985_vm6, %v3948_v1 }
 0x686   : > { %4243 = vst.msk [vmem:[%s6763_s29 + $0x80] sm:$0xff] %vm2242_vm12, %v4211_v39 }
 0x687   : > { %4227 = vst.msk [vmem:[%s6763_s29] sm:$0xff] %vm2242_vm12, %v4195_v48 }
 0x688   : > { %3933 = vst.msk [vmem:[#allocation5 + $0xc8] sm:$0xff] %vm3907_vm5, %v3862_v40 }
 0x689   : > { %3841 = vrot.lane.b32.xlu1 %v3762_v52, %s4449_s25  ;;  %v3673_v47 = vpop.permute.xlu2 %3672 }
 0x68b   : > { %v3637_v45 = vpop.permute.xlu1 %3636 }
 0x68c   : > { %v3830_v63 = vpop.permute.xlu0 %3829  ;;  %3724 = vst.msk [vmem:[#allocation5 + $0x48] sm:$0xff] %vm3714_vm4, %v3637_v45 }
 0x68d   : > { %3917 = vst.msk [vmem:[#allocation5 + $0x48] sm:$0xff] %vm3907_vm5, %v3830_v63 }
 0x68f   : > { %v3965_v15 = vld [vmem:[#allocation5 + $0xc8] sm:$0xff] }
 0x690   : > { %4381 = vmatmul.msk.f32.gmra.mxu2 %vm3985_vm6, %v3965_v15 }
 0x691   : > { %v4150_v13 = vpop.f32.mrf.mxu2  ;;  %v3288_v33 = vpop.permute.xlu2 %3287 }
 0x692   : > { %v4151_v55 = vadd.f32 %v6753_v54, %v4150_v13  ;;  %v4102_v18 = vpop.f32.mrf.mxu1  ;;  %3356 = vst.msk [vmem:[#allocation5 + $0xe0] sm:$0xff] %vm3327_vm2, %v3288_v33 }
 0x693   : > { %v4103_v41 = vadd.f32 %v6753_v54, %v4102_v18  ;;  %v3671_v59 = vpop.permute.xlu1 %3670 }
 0x694   : > { %v4212_v57 = vmax.f32 %v4151_v55, 0.0  ;;  %v3446_v14 = vpop.permute.xlu0 %3445  ;;  %3741 = vst.msk [vmem:[#allocation5 + $0xd0] sm:$0xff] %vm3714_vm4, %v3671_v59  ;;  %v3949_v20 = vld [vmem:[#allocation5 + $0x48] sm:$0xff] }
 0x695   : > { %v4196_v34 = vmax.f32 %v4103_v41, 0.0  ;;  %3532 = vst.msk [vmem:[#allocation5 + $0x50] sm:$0xff] %vm3521_vm3, %v3446_v14  ;;  %4365 = vmatmul.msk.f32.gmra.mxu1 %vm3985_vm6, %v3949_v20 }
 0x696   : > { %4244 = vst.msk [vmem:[%s6763_s29 + $0x88] sm:$0xff] %vm2242_vm12, %v4212_v57 }
 0x697   : > { %4228 = vst.msk [vmem:[%s6763_s29 + $0x8] sm:$0xff] %vm2242_vm12, %v4196_v34 }
 0x698   : > { %3725 = vst.msk [vmem:[#allocation5 + $0x50] sm:$0xff] %vm3714_vm4, %v3639_v38 }
 0x699   : > { %3934 = vst.msk [vmem:[#allocation5 + $0xd0] sm:$0xff] %vm3907_vm5, %v3864_v29  ;;  %v3834_v21 = vpop.permute.xlu2 %3833 }
 0x69b   : > { %v3286_v62 = vpop.permute.xlu1 %3285 }
 0x69c   : > { %v3480_v60 = vpop.permute.xlu0 %3479  ;;  %3355 = vst.msk [vmem:[#allocation5 + $0xd8] sm:$0xff] %vm3327_vm2, %v3286_v62 }
 0x69d   : > { %3549 = vst.msk [vmem:[#allocation5 + $0xd8] sm:$0xff] %vm3521_vm3, %v3480_v60 }
 0x69e   : > { %3742 = vst.msk [vmem:[#allocation5 + $0xd8] sm:$0xff] %vm3714_vm4, %v3673_v47 }
 0x6a0   : > { %v3966_v50 = vld [vmem:[#allocation5 + $0xd0] sm:$0xff] }
 0x6a1   : > { %v4153_v58 = vpop.f32.mrf.mxu2  ;;  %4382 = vmatmul.msk.f32.gmra.mxu2 %vm3985_vm6, %v3966_v50  ;;  %v3450_v19 = vpop.permute.xlu2 %3449 }
 0x6a2   : > { %v4154_v44 = vadd.f32 %v6753_v54, %v4153_v58  ;;  %v4105_v51 = vpop.f32.mrf.mxu1  ;;  %3534 = vst.msk [vmem:[#allocation5 + $0x60] sm:$0xff] %vm3521_vm3, %v3450_v19 }
 0x6a3   : > { %v4106_v16 = vadd.f32 %v6753_v54, %v4105_v51  ;;  %v3832_v43 = vpop.permute.xlu1 %3831 }
 0x6a4   : > { %v4213_v22 = vmax.f32 %v4154_v44, 0.0  ;;  %v3866_v10 = vpop.permute.xlu0 %3865  ;;  %3918 = vst.msk [vmem:[#allocation5 + $0x50] sm:$0xff] %vm3907_vm5, %v3832_v43 }
 0x6a5   : > { %v4197_v11 = vmax.f32 %v4106_v16, 0.0  ;;  %3935 = vst.msk [vmem:[#allocation5 + $0xd8] sm:$0xff] %vm3907_vm5, %v3866_v10 }
 0x6a6   : > { %4245 = vst.msk [vmem:[%s6763_s29 + $0x90] sm:$0xff] %vm2242_vm12, %v4213_v22 }
 0x6a7   : > { %4229 = vst.msk [vmem:[%s6763_s29 + $0x10] sm:$0xff] %vm2242_vm12, %v4197_v11 }
 0x6a9   : > { %v3484_v24 = vpop.permute.xlu2 %3483 }
 0x6ab   : > { %v3448_v3 = vpop.permute.xlu1 %3447  ;;  %v3950_v42 = vld [vmem:[#allocation5 + $0x50] sm:$0xff] }
 0x6ac   : > { %v3641_v46 = vpop.permute.xlu0 %3640  ;;  %3533 = vst.msk [vmem:[#allocation5 + $0x58] sm:$0xff] %vm3521_vm3, %v3448_v3  ;;  %4366 = vmatmul.msk.f32.gmra.mxu1 %vm3985_vm6, %v3950_v42  ;;  %v3967_v0 = vld [vmem:[#allocation5 + $0xd8] sm:$0xff] }
 0x6ad   : > { %3726 = vst.msk [vmem:[#allocation5 + $0x58] sm:$0xff] %vm3714_vm4, %v3641_v46  ;;  %4383 = vmatmul.msk.f32.gmra.mxu2 %vm3985_vm6, %v3967_v0 }
 0x6ae   : > { %3919 = vst.msk [vmem:[#allocation5 + $0x58] sm:$0xff] %vm3907_vm5, %v3834_v21 }
 0x6b1   : > { %v4156_v2 = vpop.f32.mrf.mxu2  ;;  %v3870_v26 = vpop.permute.xlu2 %3869 }
 0x6b2   : > { %v4157_v7 = vadd.f32 %v6753_v54, %v4156_v2  ;;  %v4108_v32 = vpop.f32.mrf.mxu1 }
 0x6b3   : > { %v4109_v40 = vadd.f32 %v6753_v54, %v4108_v32  ;;  %v3482_v4 = vpop.permute.xlu1 %3481 }
 0x6b4   : > { %v4214_v28 = vmax.f32 %v4157_v7, 0.0  ;;  %v3675_v53 = vpop.permute.xlu0 %3674  ;;  %3550 = vst.msk [vmem:[#allocation5 + $0xe0] sm:$0xff] %vm3521_vm3, %v3482_v4 }
 0x6b5   : > { %v4198_v23 = vmax.f32 %v4109_v40, 0.0  ;;  %3743 = vst.msk [vmem:[#allocation5 + $0xe0] sm:$0xff] %vm3714_vm4, %v3675_v53  ;;  %v3951_v17 = vld [vmem:[#allocation5 + $0x58] sm:$0xff] }
 0x6b6   : > { %4246 = vst.msk [vmem:[%s6763_s29 + $0x98] sm:$0xff] %vm2242_vm12, %v4214_v28  ;;  %4367 = vmatmul.msk.f32.gmra.mxu1 %vm3985_vm6, %v3951_v17 }
 0x6b7   : > { %4230 = vst.msk [vmem:[%s6763_s29 + $0x18] sm:$0xff] %vm2242_vm12, %v4198_v23 }
 0x6b9   : > { %v3645_v12 = vpop.permute.xlu2 %3644 }
 0x6bb   : > { %v3868_v36 = vpop.permute.xlu1 %3867 }
 0x6bc   : > { %v3290_v49 = vpop.permute.xlu0 %3289  ;;  %3936 = vst.msk [vmem:[#allocation5 + $0xe0] sm:$0xff] %vm3907_vm5, %v3868_v36 }
 0x6bd   : > { %3357 = vst.msk [vmem:[#allocation5 + $0xe8] sm:$0xff] %vm3327_vm2, %v3290_v49 }
 0x6be   : > { %3551 = vst.msk [vmem:[#allocation5 + $0xe8] sm:$0xff] %vm3521_vm3, %v3484_v24 }
 0x6c1   : > { %v4159_v5 = vpop.f32.mrf.mxu2  ;;  %v3679_v30 = vpop.permute.xlu2 %3678 }
 0x6c2   : > { %v4160_v35 = vadd.f32 %v6753_v54, %v4159_v5  ;;  %v4111_v31 = vpop.f32.mrf.mxu1 }
 0x6c3   : > { %v4112_v8 = vadd.f32 %v6753_v54, %v4111_v31  ;;  %v3643_v29 = vpop.permute.xlu1 %3642  ;;  %v3968_v56 = vld [vmem:[#allocation5 + $0xe0] sm:$0xff] }
 0x6c4   : > { %v4215_v37 = vmax.f32 %v4160_v35, 0.0  ;;  %v3836_v9 = vpop.permute.xlu0 %3835  ;;  %3727 = vst.msk [vmem:[#allocation5 + $0x60] sm:$0xff] %vm3714_vm4, %v3643_v29  ;;  %4384 = vmatmul.msk.f32.gmra.mxu2 %vm3985_vm6, %v3968_v56 }
 0x6c5   : > { %v4199_v27 = vmax.f32 %v4112_v8, 0.0  ;;  %3920 = vst.msk [vmem:[#allocation5 + $0x60] sm:$0xff] %vm3907_vm5, %v3836_v9 }
 0x6c6   : > { %4247 = vst.msk [vmem:[%s6763_s29 + $0xa0] sm:$0xff] %vm2242_vm12, %v4215_v37 }
 0x6c7   : > { %4231 = vst.msk [vmem:[%s6763_s29 + $0x20] sm:$0xff] %vm2242_vm12, %v4199_v27 }
 0x6c9   : > { %v3294_v6 = vpop.permute.xlu2 %3293 }
 0x6ca   : > { %3359 = vst.msk [vmem:[#allocation5 + $0xf8] sm:$0xff] %vm3327_vm2, %v3294_v6 }
 0x6cb   : > { %v3677_v61 = vpop.permute.xlu1 %3676 }
 0x6cc   : > { %v3452_v25 = vpop.permute.xlu0 %3451  ;;  %3744 = vst.msk [vmem:[#allocation5 + $0xe8] sm:$0xff] %vm3714_vm4, %v3677_v61  ;;  %v3952_v39 = vld [vmem:[#allocation5 + $0x60] sm:$0xff] }
 0x6cd   : > { %3535 = vst.msk [vmem:[#allocation5 + $0x68] sm:$0xff] %vm3521_vm3, %v3452_v25  ;;  %4368 = vmatmul.msk.f32.gmra.mxu1 %vm3985_vm6, %v3952_v39 }
 0x6ce   : > { %3728 = vst.msk [vmem:[#allocation5 + $0x68] sm:$0xff] %vm3714_vm4, %v3645_v12 }
 0x6cf   : > { %3937 = vst.msk [vmem:[#allocation5 + $0xe8] sm:$0xff] %vm3907_vm5, %v3870_v26 }
 0x6d1   : > { %v4162_v1 = vpop.f32.mrf.mxu2  ;;  %v3840_v55 = vpop.permute.xlu2 %3839 }
 0x6d2   : > { %v4163_v48 = vadd.f32 %v6753_v54, %v4162_v1  ;;  %v4114_v38 = vpop.f32.mrf.mxu1 }
 0x6d3   : > { %v4115_v52 = vadd.f32 %v6753_v54, %v4114_v38  ;;  %v3292_v45 = vpop.permute.xlu1 %3291 }
 0x6d4   : > { %v4216_v63 = vmax.f32 %v4163_v48, 0.0  ;;  %v3486_v47 = vpop.permute.xlu0 %3485  ;;  %3358 = vst.msk [vmem:[#allocation5 + $0xf0] sm:$0xff] %vm3327_vm2, %v3292_v45 }
 0x6d5   : > { %v4200_v15 = vmax.f32 %v4115_v52, 0.0  ;;  %3552 = vst.msk [vmem:[#allocation5 + $0xf0] sm:$0xff] %vm3521_vm3, %v3486_v47 }
 0x6d6   : > { %4248 = vst.msk [vmem:[%s6763_s29 + $0xa8] sm:$0xff] %vm2242_vm12, %v4216_v63  ;;  %v3969_v13 = vld [vmem:[#allocation5 + $0xe8] sm:$0xff] }
 0x6d7   : > { %4232 = vst.msk [vmem:[%s6763_s29 + $0x28] sm:$0xff] %vm2242_vm12, %v4200_v15  ;;  %4385 = vmatmul.msk.f32.gmra.mxu2 %vm3985_vm6, %v3969_v13 }
 0x6d8   : > { %3745 = vst.msk [vmem:[#allocation5 + $0xf0] sm:$0xff] %vm3714_vm4, %v3679_v30 }
 0x6d9   : > { %v3456_v59 = vpop.permute.xlu2 %3455 }
 0x6da   : > { %3537 = vst.msk [vmem:[#allocation5 + $0x78] sm:$0xff] %vm3521_vm3, %v3456_v59 }
 0x6db   : > { %v3838_v18 = vpop.permute.xlu1 %3837 }
 0x6dc   : > { %v3872_v41 = vpop.permute.xlu0 %3871  ;;  %3921 = vst.msk [vmem:[#allocation5 + $0x68] sm:$0xff] %vm3907_vm5, %v3838_v18 }
 0x6dd   : > { %3938 = vst.msk [vmem:[#allocation5 + $0xf0] sm:$0xff] %vm3907_vm5, %v3872_v41 }
 0x6e1   : > { %v4165_v57 = vpop.f32.mrf.mxu2 }
 0x6e2   : > { %v4166_v14 = vadd.f32 %v6753_v54, %v4165_v57  ;;  %v4117_v20 = vpop.f32.mrf.mxu1 }
 0x6e3   : > { %v4118_v34 = vadd.f32 %v6753_v54, %v4117_v20  ;;  %v3454_v33 = vpop.permute.xlu1 %3453  ;;  %v3953_v62 = vld [vmem:[#allocation5 + $0x68] sm:$0xff] }
 0x6e4   : > { %v4217_v60 = vmax.f32 %v4166_v14, 0.0  ;;  %v3647_v21 = vpop.permute.xlu0 %3646  ;;  %3536 = vst.msk [vmem:[#allocation5 + $0x70] sm:$0xff] %vm3521_vm3, %v3454_v33  ;;  %4369 = vmatmul.msk.f32.gmra.mxu1 %vm3985_vm6, %v3953_v62  ;;  %v3970_v50 = vld [vmem:[#allocation5 + $0xf0] sm:$0xff] }
 0x6e5   : > { %v4201_v58 = vmax.f32 %v4118_v34, 0.0  ;;  %3729 = vst.msk [vmem:[#allocation5 + $0x70] sm:$0xff] %vm3714_vm4, %v3647_v21  ;;  %4386 = vmatmul.msk.f32.gmra.mxu2 %vm3985_vm6, %v3970_v50 }
 0x6e6   : > { %4249 = vst.msk [vmem:[%s6763_s29 + $0xb0] sm:$0xff] %vm2242_vm12, %v4217_v60 }
 0x6e7   : > { %4233 = vst.msk [vmem:[%s6763_s29 + $0x30] sm:$0xff] %vm2242_vm12, %v4201_v58 }
 0x6e8   : > { %3922 = vst.msk [vmem:[#allocation5 + $0x70] sm:$0xff] %vm3907_vm5, %v3840_v55 }
 0x6eb   : > { %v3488_v44 = vpop.permute.xlu1 %3487 }
 0x6ec   : > { %v3681_v51 = vpop.permute.xlu0 %3680  ;;  %3553 = vst.msk [vmem:[#allocation5 + $0xf8] sm:$0xff] %vm3521_vm3, %v3488_v44 }
 0x6ed   : > { %3746 = vst.msk [vmem:[#allocation5 + $0xf8] sm:$0xff] %vm3714_vm4, %v3681_v51 }
 0x6ef   : > { %v3954_v16 = vld [vmem:[#allocation5 + $0x70] sm:$0xff] }
 0x6f0   : > { %4370 = vmatmul.msk.f32.gmra.mxu1 %vm3985_vm6, %v3954_v16 }
 0x6f1   : > { %v4168_v43 = vpop.f32.mrf.mxu2 }
 0x6f2   : > { %v4169_v22 = vadd.f32 %v6753_v54, %v4168_v43  ;;  %v4120_v10 = vpop.f32.mrf.mxu1 }
 0x6f3   : > { %v4121_v11 = vadd.f32 %v6753_v54, %v4120_v10  ;;  %v3874_v19 = vpop.permute.xlu1 %3873 }
 0x6f4   : > { %v4218_v3 = vmax.f32 %v4169_v22, 0.0  ;;  %v3649_v42 = vpop.permute.xlu0 %3648  ;;  %3939 = vst.msk [vmem:[#allocation5 + $0xf8] sm:$0xff] %vm3907_vm5, %v3874_v19 }
 0x6f5   : > { %v4202_v46 = vmax.f32 %v4121_v11, 0.0  ;;  %3730 = vst.msk [vmem:[#allocation5 + $0x78] sm:$0xff] %vm3714_vm4, %v3649_v42 }
 0x6f6   : > { %4250 = vst.msk [vmem:[%s6763_s29 + $0xb8] sm:$0xff] %vm2242_vm12, %v4218_v3 }
 0x6f7   : > { %4234 = vst.msk [vmem:[%s6763_s29 + $0x38] sm:$0xff] %vm2242_vm12, %v4202_v46 }
 0x6fb   : > { %v3842_v0 = vpop.permute.xlu1 %3841  ;;  %v3971_v24 = vld [vmem:[#allocation5 + $0xf8] sm:$0xff] }
 0x6fc   : > { %3923 = vst.msk [vmem:[#allocation5 + $0x78] sm:$0xff] %vm3907_vm5, %v3842_v0  ;;  %4387 = vmatmul.msk.f32.gmra.mxu2 %vm3985_vm6, %v3971_v24 }
 0x701   : > { %v4171_v2 = vpop.f32.mrf.mxu2 }
 0x702   : > { %v4172_v7 = vadd.f32 %v6753_v54, %v4171_v2  ;;  %v4123_v32 = vpop.f32.mrf.mxu1 }
 0x703   : > { %v4124_v40 = vadd.f32 %v6753_v54, %v4123_v32  ;;  %v3955_v4 = vld [vmem:[#allocation5 + $0x78] sm:$0xff] }
 0x704   : > { %v4219_v28 = vmax.f32 %v4172_v7, 0.0  ;;  %4371 = vmatmul.msk.f32.gmra.mxu1 %vm3985_vm6, %v3955_v4 }
 0x705   : > { %v4203_v53 = vmax.f32 %v4124_v40, 0.0 }
 0x706   : > { %4251 = vst.msk [vmem:[%s6763_s29 + $0xc0] sm:$0xff] %vm2242_vm12, %v4219_v28 }
 0x707   : > { %4235 = vst.msk [vmem:[%s6763_s29 + $0x40] sm:$0xff] %vm2242_vm12, %v4203_v53 }
 0x712   : > { %v4126_v23 = vpop.f32.mrf.mxu1 }
 0x713   : > { %v4174_v17 = vpop.f32.mrf.mxu2  ;;  %v4127_v26 = vadd.f32 %v6753_v54, %v4126_v23 }
 0x714   : > { %v4175_v36 = vadd.f32 %v6753_v54, %v4174_v17 }
 0x715   : > { %v4204_v49 = vmax.f32 %v4127_v26, 0.0 }
 0x716   : > { %v4220_v12 = vmax.f32 %v4175_v36, 0.0 }
 0x717   : > { %4236 = vst.msk [vmem:[%s6763_s29 + $0x48] sm:$0xff] %vm2242_vm12, %v4204_v49 }
 0x718   : > { %4252 = vst.msk [vmem:[%s6763_s29 + $0xc8] sm:$0xff] %vm2242_vm12, %v4220_v12 }
 0x724   : > { %v4177_v5 = vpop.f32.mrf.mxu2 }
 0x725   : > { %v4178_v35 = vadd.f32 %v6753_v54, %v4177_v5 }
 0x727   : > { %v4221_v31 = vmax.f32 %v4178_v35, 0.0 }
 0x729   : > { %v4129_v8 = vpop.f32.mrf.mxu1  ;;  %4253 = vst.msk [vmem:[%s6763_s29 + $0xd0] sm:$0xff] %vm2242_vm12, %v4221_v31 }
 0x72a   : > { %v4130_v29 = vadd.f32 %v6753_v54, %v4129_v8 }
 0x72c   : > { %v4205_v56 = vmax.f32 %v4130_v29, 0.0 }
 0x72e   : > { %4237 = vst.msk [vmem:[%s6763_s29 + $0x50] sm:$0xff] %vm2242_vm12, %v4205_v56 }
 0x730   : > { %v4180_v37 = vpop.f32.mrf.mxu2 }
 0x731   : > { %v4181_v9 = vadd.f32 %v6753_v54, %v4180_v37 }
 0x733   : > { %v4222_v27 = vmax.f32 %v4181_v9, 0.0  ;;  %v4132_v30 = vpop.f32.mrf.mxu1 }
 0x734   : > { %v4133_v61 = vadd.f32 %v6753_v54, %v4132_v30 }
 0x735   : > { %4254 = vst.msk [vmem:[%s6763_s29 + $0xd8] sm:$0xff] %vm2242_vm12, %v4222_v27 }
 0x736   : > { %v4206_v25 = vmax.f32 %v4133_v61, 0.0 }
 0x738   : > { %4238 = vst.msk [vmem:[%s6763_s29 + $0x58] sm:$0xff] %vm2242_vm12, %v4206_v25 }
 0x747   : > { %v4183_v39 = vpop.f32.mrf.mxu2 }
 0x748   : > { %v4184_v6 = vadd.f32 %v6753_v54, %v4183_v39 }
 0x74a   : > { %v4223_v1 = vmax.f32 %v4184_v6, 0.0  ;;  %v4135_v48 = vpop.f32.mrf.mxu1 }
 0x74b   : > { %v4136_v38 = vadd.f32 %v6753_v54, %v4135_v48 }
 0x74c   : > { %4255 = vst.msk [vmem:[%s6763_s29 + $0xe0] sm:$0xff] %vm2242_vm12, %v4223_v1 }
 0x74d   : > { %v4207_v52 = vmax.f32 %v4136_v38, 0.0 }
 0x74f   : > { %4239 = vst.msk [vmem:[%s6763_s29 + $0x60] sm:$0xff] %vm2242_vm12, %v4207_v52 }
 0x75a   : > { %v4186_v45 = vpop.f32.mrf.mxu2 }
 0x75b   : > { %v4187_v63 = vadd.f32 %v6753_v54, %v4186_v45 }
 0x75d   : > { %v4224_v47 = vmax.f32 %v4187_v63, 0.0 }
 0x75f   : > { %4256 = vst.msk [vmem:[%s6763_s29 + $0xe8] sm:$0xff] %vm2242_vm12, %v4224_v47 }
 0x761   : > { %v4138_v15 = vpop.f32.mrf.mxu1 }
 0x762   : > { %v4139_v13 = vadd.f32 %v6753_v54, %v4138_v15 }
 0x764   : > { %v4208_v55 = vmax.f32 %v4139_v13, 0.0 }
 0x766   : > { %4240 = vst.msk [vmem:[%s6763_s29 + $0x68] sm:$0xff] %vm2242_vm12, %v4208_v55 }
 0x768   : > { %v4189_v18 = vpop.f32.mrf.mxu2 }
 0x769   : > { %v4190_v41 = vadd.f32 %v6753_v54, %v4189_v18 }
 0x76b   : > { %v4225_v59 = vmax.f32 %v4190_v41, 0.0 }
 0x76d   : > { %v4141_v57 = vpop.f32.mrf.mxu1  ;;  %4257 = vst.msk [vmem:[%s6763_s29 + $0xf0] sm:$0xff] %vm2242_vm12, %v4225_v59 }
 0x76e   : > { %v4142_v14 = vadd.f32 %v6753_v54, %v4141_v57 }
 0x770   : > { %v4209_v20 = vmax.f32 %v4142_v14, 0.0 }
 0x772   : > { %4241 = vst.msk [vmem:[%s6763_s29 + $0x70] sm:$0xff] %vm2242_vm12, %v4209_v20 }
 0x77f   : > { %v4192_v34 = vpop.f32.mrf.mxu2 }
 0x780   : > { %v4193_v33 = vadd.f32 %v6753_v54, %v4192_v34 }
 0x781   : > { %v4144_v62 = vpop.f32.mrf.mxu1 }
 0x782   : > { %v4226_v60 = vmax.f32 %v4193_v33, 0.0  ;;  %v4145_v21 = vadd.f32 %v6753_v54, %v4144_v62 }
 0x784   : > { %4258 = vst.msk [vmem:[%s6763_s29 + $0xf8] sm:$0xff] %vm2242_vm12, %v4226_v60  ;;  %v4210_v50 = vmax.f32 %v4145_v21, 0.0 }
 0x786   : > { %4242 = vst.msk [vmem:[%s6763_s29 + $0x78] sm:$0xff] %vm2242_vm12, %v4210_v50 }
 0x787 PF: > { %s15_s18 = sadd.s32 1, %s4435_s18  }
 0x788   : > { %p12_p4 = scmp.ge.s32.totalorder %s15_s18, 4  }
 0x78a   :  { %14 = sbr.rel (!%p12_p4) target bundleno = 1 (0x1), region = 74 }

</bundles_post_ra>
